<compile_context>
chip_gen: v6e
topology: v6e:2x2x1
jax: 0.10.0
libtpu: 0.0.40
codegen_flags: <defaults>
</compile_context>

<pallas_src>
import functools

import jax
import jax.numpy as jnp
from jax.experimental import pallas as pl
from jax.experimental.pallas import tpu as pltpu

_LANES = 128
_MXU_DTYPE = jnp.bfloat16      # full-rate MXU dtype on v5e / v6e / v7x
_DEFAULT_TILE_M = 512          # lane-axis tile for the streamed rows dimension


# ----------------------------------------------------------------------------
# Small helpers
# ----------------------------------------------------------------------------
def _round_up(x, m):
    return (x + m - 1) // m * m


def _pick_tile(m, tile_max=_DEFAULT_TILE_M):
    """Lane-axis tile (multiple of 128) and the padded extent it divides."""
    tm = min(tile_max, _round_up(m, _LANES))
    return tm, _round_up(m, tm)


def _pad_lanes(x, mp):
    """Zero-pad the last (lane) axis of a 2-D matrix to length mp."""
    m = x.shape[-1]
    if m == mp:
        return x
    return jnp.pad(x, ((0, 0), (0, mp - m)))


def _mosaic_params(semantics, streamed_bytes, resident_bytes):
    """CompilerParams with a VMEM limit sized from the tile working set."""
    limit = 2 * streamed_bytes + resident_bytes + (4 << 20)   # 2x: double buffering
    limit = int(min(max(limit, 8 << 20), 60 << 20))           # stay below v7x 64 MiB
    return pltpu.CompilerParams(dimension_semantics=semantics,
                                vmem_limit_bytes=limit)


# ----------------------------------------------------------------------------
# Conv matmul kernel: out(Cout, tm) = relu?(W(Cout,Kc) @ relu?(cols(Kc,tm)) + b)
# ----------------------------------------------------------------------------
def _conv_matmul_kernel(w_ref, x_ref, b_ref, o_ref, *, relu_in, relu_out):
    x = x_ref[...]                                  # (Kc, tm) bf16, streamed
    if relu_in:
        x = jnp.maximum(x, 0)
    acc = jnp.dot(w_ref[...], x, preferred_element_type=jnp.float32)   # (Cout, tm)
    acc = acc + b_ref[...]                          # (Cout, 1) broadcast over lanes
    if relu_out:
        acc = jnp.maximum(acc, 0.0)
    o_ref[...] = acc


def conv_matmul(wmat, cols, bias, *, relu_in=False, relu_out=False,
                tile_m=_DEFAULT_TILE_M):
    cout, kc = wmat.shape
    m = cols.shape[1]
    tm, mp = _pick_tile(m, tile_m)
    cols_p = _pad_lanes(cols.astype(_MXU_DTYPE), mp)
    w = wmat.astype(_MXU_DTYPE)
    b = bias.reshape(cout, 1).astype(jnp.float32)

    streamed = kc * tm * 2 + cout * tm * 4              # one cols block + one out block
    resident = cout * kc * 2 + cout * _LANES * 4        # weight + bias
    out = pl.pallas_call(
        functools.partial(_conv_matmul_kernel, relu_in=relu_in, relu_out=relu_out),
        grid=(mp // tm,),
        in_specs=[pl.BlockSpec((cout, kc), lambda i: (0, 0)),   # resident weight
                  pl.BlockSpec((kc, tm), lambda i: (0, i)),     # streamed im2col rows
                  pl.BlockSpec((cout, 1), lambda i: (0, 0))],   # resident bias
        out_specs=pl.BlockSpec((cout, tm), lambda i: (0, i)),
        out_shape=jax.ShapeDtypeStruct((cout, mp), jnp.float32),
        compiler_params=_mosaic_params(("parallel",), streamed, resident),
    )(w, cols_p, b)
    return out[:, :m]


# ----------------------------------------------------------------------------
# Fused residual block kernel: x + Conv1x1(ReLU(Conv3x3(ReLU(x))))
# ----------------------------------------------------------------------------
def _residual_kernel(x_ref, cols_ref, w1_ref, w2_ref, o_ref):
    a = jnp.maximum(cols_ref[...], 0)                                     # ReLU
    h = jnp.dot(w1_ref[...], a, preferred_element_type=jnp.float32)      # 3x3 conv (no bias)
    h = jnp.maximum(h, 0.0).astype(w2_ref.dtype)                          # ReLU
    y = jnp.dot(w2_ref[...], h, preferred_element_type=jnp.float32)      # 1x1 conv (no bias)
    o_ref[...] = x_ref[...] + y                                           # residual add


def residual_layer(x_cf, w1, w2, *, tile_m=_DEFAULT_TILE_M):
    c, n, hh, ww = x_cf.shape
    res_h = w1.shape[0]
    cols, _ = _im2col_cf(x_cf, 3, 3, 1, 1)                    # (9*c, n*hh*ww)
    m = n * hh * ww
    tm, mp = _pick_tile(m, tile_m)
    cols_p = _pad_lanes(cols.astype(_MXU_DTYPE), mp)
    x_p = _pad_lanes(x_cf.reshape(c, m), mp)                  # f32 identity path
    w1m = jnp.transpose(w1, (0, 2, 3, 1)).reshape(res_h, 9 * c).astype(_MXU_DTYPE)
    w2m = w2.reshape(c, res_h).astype(_MXU_DTYPE)

    streamed = (9 * c) * tm * 2 + 2 * c * tm * 4
    resident = res_h * 9 * c * 2 + c * res_h * 2
    out = pl.pallas_call(
        _residual_kernel,
        grid=(mp // tm,),
        in_specs=[pl.BlockSpec((c, tm), lambda i: (0, i)),         # identity
                  pl.BlockSpec((9 * c, tm), lambda i: (0, i)),     # im2col rows
                  pl.BlockSpec((res_h, 9 * c), lambda i: (0, 0)),  # resident W1
                  pl.BlockSpec((c, res_h), lambda i: (0, 0))],     # resident W2
        out_specs=pl.BlockSpec((c, tm), lambda i: (0, i)),
        out_shape=jax.ShapeDtypeStruct((c, mp), jnp.float32),
        compiler_params=_mosaic_params(("parallel",), streamed, resident),
    )(x_p, cols_p, w1m, w2m)
    return out[:, :m].reshape(c, n, hh, ww)


# ----------------------------------------------------------------------------
# Fused (trailing-ReLU + 1x1 pre-quant conv + vector quantizer) kernel
# ----------------------------------------------------------------------------
def _vq_kernel(h_ref, wpq_ref, bpq_ref, e_ref, et_ref, esq_ref,
               zq_ref, loss_ref, perp_ref, loss_acc, hist_acc,
               *, beta, m_valid, d_valid):
    i = pl.program_id(0)
    tm = h_ref.shape[1]
    kp = e_ref.shape[0]

    @pl.when(i == 0)
    def _():
        loss_acc[...] = jnp.zeros_like(loss_acc)
        hist_acc[...] = jnp.zeros_like(hist_acc)

    # Fused: trailing ReLU of the encoder ResidualStack + 1x1 pre-quant conv.
    h = jnp.maximum(h_ref[...], 0.0)                                      # (C, tm)
    z = jnp.dot(wpq_ref[...], h, preferred_element_type=jnp.float32) + bpq_ref[...]  # (D, tm)

    # Mask for the zero-padded lane columns (padded rows of flattened N*H*W).
    col = jax.lax.broadcasted_iota(jnp.int32, (1, tm), 1) + i * tm
    valid = (col < m_valid).astype(jnp.float32)                           # (1, tm)

    # Squared distances ||z_m - e_k||^2, (Kp, tm); padded codes carry +1e30.
    zsq = jnp.sum(z * z, axis=0, keepdims=True)                           # (1, tm)
    d = esq_ref[...] + zsq - 2.0 * jnp.dot(e_ref[...], z,
                                           preferred_element_type=jnp.float32)

    # First-occurrence argmin over codes (matches torch.argmin tie-breaking).
    dmin = jnp.min(d, axis=0, keepdims=True)
    krow = jax.lax.broadcasted_iota(jnp.int32, (kp, tm), 0).astype(jnp.float32)
    first = jnp.min(jnp.where(d <= dmin, krow, float(kp)), axis=0, keepdims=True)
    onehot = (krow == first).astype(jnp.float32) * valid                  # (Kp, tm)

    zq = jnp.dot(et_ref[...], onehot, preferred_element_type=jnp.float32)  # (D, tm)
    zq_ref[...] = zq

    # loss = mean((sg(zq)-z)^2) + beta*mean((zq-sg(z))^2) == (1+beta)*mean((zq-z)^2)
    # TODO(synk): forward value only; the straight-through estimator (custom VJP)
    # is not implemented since only the forward pass is required here.
    diff = (zq - z) * valid
    sq = diff * diff
    loss_acc[...] += jnp.sum(jnp.sum(sq, axis=0, keepdims=True), axis=1, keepdims=True)
    hist_acc[...] += jnp.sum(onehot, axis=1, keepdims=True)               # (Kp, 1)

    @pl.when(i == pl.num_programs(0) - 1)
    def _():
        loss_ref[...] = (1.0 + beta) * loss_acc[...] / float(m_valid * d_valid)
        e_mean = hist_acc[...] / float(m_valid)
        ent = jnp.sum(e_mean * jnp.log(e_mean + 1e-10), axis=0, keepdims=True)
        perp_ref[...] = jnp.exp(-ent)


def pre_quant_and_vq(h_cf, wpq, bpq, codebook, beta, *, tile_m=_DEFAULT_TILE_M):
    c, n, hh, ww = h_cf.shape
    d = wpq.shape[0]
    k = codebook.shape[0]
    kp = _round_up(k, _LANES)          # pad codebook so (K, tile) math is full-lane
    m = n * hh * ww
    tm, mp = _pick_tile(m, tile_m)

    h_p = _pad_lanes(h_cf.reshape(c, m), mp)
    wpq_m = wpq.reshape(d, c).astype(jnp.float32)
    bpq_m = bpq.reshape(d, 1).astype(jnp.float32)
    cb = codebook.astype(jnp.float32)
    e = jnp.zeros((kp, d), jnp.float32).at[:k].set(cb)
    et = jnp.transpose(e)
    esq = jnp.full((kp, 1), 1e30, jnp.float32).at[:k, 0].set(jnp.sum(cb * cb, axis=1))

    streamed = c * tm * 4 + d * tm * 4
    resident = (d * c + d + 2 * kp * d + 2 * kp + 1) * 4
    zq, loss, perp = pl.pallas_call(
        functools.partial(_vq_kernel, beta=float(beta), m_valid=m, d_valid=d),
        grid=(mp // tm,),
        in_specs=[pl.BlockSpec((c, tm), lambda i: (0, i)),     # streamed features
                  pl.BlockSpec((d, c), lambda i: (0, 0)),      # pre-quant weight
                  pl.BlockSpec((d, 1), lambda i: (0, 0)),      # pre-quant bias
                  pl.BlockSpec((kp, d), lambda i: (0, 0)),     # codebook
                  pl.BlockSpec((d, kp), lambda i: (0, 0)),     # codebook^T
                  pl.BlockSpec((kp, 1), lambda i: (0, 0))],    # ||e_k||^2
        out_specs=(pl.BlockSpec((d, tm), lambda i: (0, i)),
                   pl.BlockSpec((1, 1), lambda i: (0, 0)),
                   pl.BlockSpec((1, 1), lambda i: (0, 0))),
        out_shape=(jax.ShapeDtypeStruct((d, mp), jnp.float32),
                   jax.ShapeDtypeStruct((1, 1), jnp.float32),
                   jax.ShapeDtypeStruct((1, 1), jnp.float32)),
        scratch_shapes=[pltpu.VMEM((1, 1), jnp.float32),       # running loss sum
                        pltpu.VMEM((kp, 1), jnp.float32)],     # code histogram
        # "arbitrary": loss/histogram accumulate in scratch across M tiles.
        compiler_params=_mosaic_params(("arbitrary",), streamed, resident),
    )(h_p, wpq_m, bpq_m, e, et, esq)
    return zq[:, :m].reshape(d, n, hh, ww), loss[0, 0], perp[0, 0]


# ----------------------------------------------------------------------------
# Conv glue (im2col in channels-first layout; matmul in Pallas)
# ----------------------------------------------------------------------------
def _im2col_cf(x, kh, kw, stride, pad):
    """Channels-first im2col: x (C,N,H,W) -> cols (kh*kw*C, N*Ho*Wo)."""
    c, n, h, w = x.shape
    xp = jnp.pad(x, ((0, 0), (0, 0), (pad, pad), (pad, pad)))
    ho = (h + 2 * pad - kh) // stride + 1
    wo = (w + 2 * pad - kw) // stride + 1
    patches = []
    for i in range(kh):
        for j in range(kw):
            patches.append(xp[:, :, i:i + stride * (ho - 1) + 1:stride,
                                    j:j + stride * (wo - 1) + 1:stride])
    cols = jnp.concatenate(patches, axis=0)        # (kh*kw*C, N, Ho, Wo)
    # TODO(synk): move the patch extraction inside the Pallas kernel (kh*kw
    # reduction grid axis / halo DMA) so the expanded cols never round-trip HBM.
    return cols.reshape(kh * kw * c, n * ho * wo), (n, ho, wo)


def conv2d_cf(x_cf, w, b, stride, pad, *, relu_in=False, relu_out=False):
    """x_cf: (Cin,N,H,W); w: (Cout,Cin,kh,kw) PyTorch Conv2d layout; b: (Cout,)."""
    cout, cin, kh, kw = w.shape
    cols, (n, ho, wo) = _im2col_cf(x_cf, kh, kw, stride, pad)
    wmat = jnp.transpose(w, (0, 2, 3, 1)).reshape(cout, kh * kw * cin)
    out = conv_matmul(wmat, cols, b, relu_in=relu_in, relu_out=relu_out)
    return out.reshape(cout, n, ho, wo)


def conv_transpose2d_cf(x_cf, w, b, stride, pad, *, relu_in=False, relu_out=False):
    """x_cf: (Cin,N,H,W); w: (Cin,Cout,kh,kw) PyTorch ConvTranspose2d layout."""
    c, n, h, ww = x_cf.shape
    cin, cout, kh, kw = w.shape
    if stride > 1:
        # TODO(synk): replace zero-insertion with the stride^2 sub-pixel phase
        # decomposition to avoid ~75% wasted MXU FLOPs / im2col bytes at stride 2.
        hd, wd = (h - 1) * stride + 1, (ww - 1) * stride + 1
        xd = jnp.zeros((c, n, hd, wd), x_cf.dtype).at[:, :, ::stride, ::stride].set(x_cf)
    else:
        xd = x_cf
    # Equivalent stride-1 conv: swap in/out channels and flip spatially.
    w_conv = jnp.transpose(jnp.flip(w, axis=(2, 3)), (1, 0, 2, 3))
    return conv2d_cf(xd, w_conv, b, 1, kh - 1 - pad, relu_in=relu_in, relu_out=relu_out)


# ----------------------------------------------------------------------------
# VQVAE forward
# ----------------------------------------------------------------------------
def vqvae_forward(params, x_nchw, *, beta=0.25, n_res_layers=2):
    x = jnp.transpose(x_nchw, (1, 0, 2, 3))      # NCHW -> (C, N, H, W)

    # ---- Encoder ----
    h = conv2d_cf(x, params['enc_w1'], params['enc_b1'], 2, 1, relu_out=True)
    h = conv2d_cf(h, params['enc_w2'], params['enc_b2'], 2, 1, relu_out=True)
    h = conv2d_cf(h, params['enc_w3'], params['enc_b3'], 1, 1)
    for _ in range(n_res_layers):                # ModuleList([layer]*n) shares weights
        h = residual_layer(h, params['enc_res_w1'], params['enc_res_w2'])
    # The ResidualStack trailing ReLU + 1x1 pre-quant conv are fused into the
    # vector-quantization kernel below (z_e never touches HBM).

    # ---- Vector quantization (fused with pre-quantization conv) ----
    z_q, loss, perp = pre_quant_and_vq(h, params['pq_w'], params['pq_b'],
                                       params['codebook'], beta)

    # ---- Decoder ----
    h = conv_transpose2d_cf(z_q, params['dec_w1'], params['dec_b1'], 1, 1)
    for _ in range(n_res_layers):
        h = residual_layer(h, params['dec_res_w1'], params['dec_res_w2'])
    h = conv_transpose2d_cf(h, params['dec_w2'], params['dec_b2'], 2, 1,
                            relu_in=True, relu_out=True)
    x_hat = conv_transpose2d_cf(h, params['dec_w3'], params['dec_b3'], 2, 1)

    return loss, jnp.transpose(x_hat, (1, 0, 2, 3)), perp   # back to NCHW


# ----------------------------------------------------------------------------
# Deterministic parameter init (synthetic weights, PyTorch shapes)
# ----------------------------------------------------------------------------
def init_params(key, h_dim=32, res_h_dim=16, n_embeddings=64, embedding_dim=16):
    ks = jax.random.split(key, 20)
    w = lambda k, s, scale=0.05: scale * jax.random.normal(k, s, jnp.float32)
    p = {}
    # Encoder
    p['enc_w1'] = w(ks[0], (h_dim // 2, 3, 4, 4));     p['enc_b1'] = w(ks[1], (h_dim // 2,), 0.01)
    p['enc_w2'] = w(ks[2], (h_dim, h_dim // 2, 4, 4)); p['enc_b2'] = w(ks[3], (h_dim,), 0.01)
    p['enc_w3'] = w(ks[4], (h_dim, h_dim, 3, 3));      p['enc_b3'] = w(ks[5], (h_dim,), 0.01)
    p['enc_res_w1'] = w(ks[6], (res_h_dim, h_dim, 3, 3))
    p['enc_res_w2'] = w(ks[7], (h_dim, res_h_dim, 1, 1))
    # Pre-quantization conv
    p['pq_w'] = w(ks[8], (embedding_dim, h_dim, 1, 1)); p['pq_b'] = w(ks[9], (embedding_dim,), 0.01)
    # Codebook (nn.Embedding init: U(-1/K, 1/K))
    p['codebook'] = jax.random.uniform(ks[10], (n_embeddings, embedding_dim),
                                       jnp.float32, -1.0 / n_embeddings, 1.0 / n_embeddings)
    # Decoder (ConvTranspose2d weights are (Cin, Cout, kh, kw))
    p['dec_w1'] = w(ks[11], (embedding_dim, h_dim, 3, 3)); p['dec_b1'] = w(ks[12], (h_dim,), 0.01)
    p['dec_res_w1'] = w(ks[13], (res_h_dim, h_dim, 3, 3))
    p['dec_res_w2'] = w(ks[14], (h_dim, res_h_dim, 1, 1))
    p['dec_w2'] = w(ks[15], (h_dim, h_dim // 2, 4, 4));    p['dec_b2'] = w(ks[16], (h_dim // 2,), 0.01)
    p['dec_w3'] = w(ks[17], (h_dim // 2, 3, 4, 4));        p['dec_b3'] = w(ks[18], (3,), 0.01)
    return p


if __name__ == "__main__":
    key = jax.random.PRNGKey(0)
    k_x, k_p = jax.random.split(key)

    # Small shapes: batch=2, 3x16x16 images, h_dim=32, res_h_dim=16,
    # n_res_layers=2, n_embeddings=64, embedding_dim=16, beta=0.25
    x = jax.random.normal(k_x, (2, 3, 16, 16), jnp.float32)
    params = init_params(k_p)

    fwd = jax.jit(functools.partial(vqvae_forward, beta=0.25, n_res_layers=2))
    embedding_loss, x_hat, perplexity = fwd(params, x)
    jax.block_until_ready((embedding_loss, x_hat, perplexity))

    assert x_hat.shape == (2, 3, 16, 16)
    assert embedding_loss.shape == () and perplexity.shape == ()
    assert bool(jnp.all(jnp.isfinite(x_hat)))
    assert bool(jnp.isfinite(embedding_loss)) and bool(jnp.isfinite(perplexity))
    print("KERNEL_OK")
</pallas_src>

<mosaic_0001>
module attributes {stable_mosaic.version = 11 : i64} {
  func.func @_conv_matmul_kernel(%arg0: i32, %arg1: memref<16x48xbf16, #tpu.memory_space<vmem>>, %arg2: memref<48x128xbf16, #tpu.memory_space<vmem>>, %arg3: memref<16x1xf32, #tpu.memory_space<vmem>>, %arg4: memref<16x128xf32, #tpu.memory_space<vmem>>) attributes {dimension_semantics = [#tpu.dimension_semantics<parallel>], iteration_bounds = array<i64: 1>, scalar_prefetch = 0 : i64, scratch_operands = 0 : i64, tpu.core_type = #tpu.core_type<tc>, window_params = [{pipeline_mode = #tpu.pipeline_mode<synchronous>, transform_indices = @transform_0, window_bounds = array<i64: 16, 48>}, {transform_indices = @transform_1, window_bounds = array<i64: 48, 128>}, {pipeline_mode = #tpu.pipeline_mode<synchronous>, transform_indices = @transform_2, window_bounds = array<i64: 16, 1>}, {transform_indices = @transform_3, window_bounds = array<i64: 16, 128>}]} {
    %c0 = arith.constant 0 : index
    %c0_0 = arith.constant 0 : index
    %0 = vector.load %arg2[%c0, %c0_0] : memref<48x128xbf16, #tpu.memory_space<vmem>>, vector<48x128xbf16>
    %c0_1 = arith.constant 0 : index
    %c0_2 = arith.constant 0 : index
    %1 = vector.load %arg1[%c0_1, %c0_2] : memref<16x48xbf16, #tpu.memory_space<vmem>>, vector<16x48xbf16>
    %cst = arith.constant dense<0.000000e+00> : vector<16x128xf32>
    %2 = tpu.matmul %1, %0, %cst {dimension_numbers = #tpu.dot_dimension_numbers<[1], [0], [0], [1], [0, 0, 1, 1], [], []>} : vector<16x48xbf16>, vector<48x128xbf16>, vector<16x128xf32> -> vector<16x128xf32>
    %c0_3 = arith.constant 0 : index
    %c0_4 = arith.constant 0 : index
    %3 = vector.load %arg3[%c0_3, %c0_4] : memref<16x1xf32, #tpu.memory_space<vmem>>, vector<16x1xf32>
    %4 = vector.broadcast %3 : vector<16x1xf32> to vector<16x128xf32>
    %5 = arith.addf %2, %4 : vector<16x128xf32>
    %cst_5 = arith.constant 0.000000e+00 : f32
    %6 = vector.broadcast %cst_5 : f32 to vector<16x128xf32>
    %7 = arith.maximumf %5, %6 : vector<16x128xf32>
    %c0_6 = arith.constant 0 : index
    %c0_7 = arith.constant 0 : index
    %8 = vector.load %arg4[%c0_6, %c0_7] : memref<16x128xf32, #tpu.memory_space<vmem>>, vector<16x128xf32>
    tpu.vector_store %arg4[%c0_6, %c0_7], %7 {strides = array<i32>} : memref<16x128xf32, #tpu.memory_space<vmem>>, vector<16x128xf32>,
    return
  }
  func.func @transform_0(%arg0: i32) -> (i32, i32) {
    %c0_i32 = arith.constant 0 : i32
    %c0_i32_0 = arith.constant 0 : i32
    %c0_i32_1 = arith.constant 0 : i32
    return %c0_i32, %c0_i32_0 : i32, i32
  }
  func.func @transform_1(%arg0: i32) -> (i32, i32) {
    %c0_i32 = arith.constant 0 : i32
    %c0_i32_0 = arith.constant 0 : i32
    return %c0_i32, %arg0 : i32, i32
  }
  func.func @transform_2(%arg0: i32) -> (i32, i32) {
    %c0_i32 = arith.constant 0 : i32
    %c0_i32_0 = arith.constant 0 : i32
    %c0_i32_1 = arith.constant 0 : i32
    return %c0_i32, %c0_i32_0 : i32, i32
  }
  func.func @transform_3(%arg0: i32) -> (i32, i32) {
    %c0_i32 = arith.constant 0 : i32
    %c0_i32_0 = arith.constant 0 : i32
    return %c0_i32, %arg0 : i32, i32
  }
}

module attributes {stable_mosaic.version = 11 : i64} {
  func.func @_conv_matmul_kernel(%arg0: i32, %arg1: memref<32x256xbf16, #tpu.memory_space<vmem>>, %arg2: memref<256x128xbf16, #tpu.memory_space<vmem>>, %arg3: memref<32x1xf32, #tpu.memory_space<vmem>>, %arg4: memref<32x128xf32, #tpu.memory_space<vmem>>) attributes {dimension_semantics = [#tpu.dimension_semantics<parallel>], iteration_bounds = array<i64: 1>, scalar_prefetch = 0 : i64, scratch_operands = 0 : i64, tpu.core_type = #tpu.core_type<tc>, window_params = [{pipeline_mode = #tpu.pipeline_mode<synchronous>, transform_indices = @transform_0, window_bounds = array<i64: 32, 256>}, {transform_indices = @transform_1, window_bounds = array<i64: 256, 128>}, {pipeline_mode = #tpu.pipeline_mode<synchronous>, transform_indices = @transform_2, window_bounds = array<i64: 32, 1>}, {transform_indices = @transform_3, window_bounds = array<i64: 32, 128>}]} {
    %c0 = arith.constant 0 : index
    %c0_0 = arith.constant 0 : index
    %0 = vector.load %arg2[%c0, %c0_0] : memref<256x128xbf16, #tpu.memory_space<vmem>>, vector<256x128xbf16>
    %c0_1 = arith.constant 0 : index
    %c0_2 = arith.constant 0 : index
    %1 = vector.load %arg1[%c0_1, %c0_2] : memref<32x256xbf16, #tpu.memory_space<vmem>>, vector<32x256xbf16>
    %cst = arith.constant dense<0.000000e+00> : vector<32x128xf32>
    %2 = tpu.matmul %1, %0, %cst {dimension_numbers = #tpu.dot_dimension_numbers<[1], [0], [0], [1], [0, 0, 1, 1], [], []>} : vector<32x256xbf16>, vector<256x128xbf16>, vector<32x128xf32> -> vector<32x128xf32>
    %c0_3 = arith.constant 0 : index
    %c0_4 = arith.constant 0 : index
    %3 = vector.load %arg3[%c0_3, %c0_4] : memref<32x1xf32, #tpu.memory_space<vmem>>, vector<32x1xf32>
    %4 = vector.broadcast %3 : vector<32x1xf32> to vector<32x128xf32>
    %5 = arith.addf %2, %4 : vector<32x128xf32>
    %cst_5 = arith.constant 0.000000e+00 : f32
    %6 = vector.broadcast %cst_5 : f32 to vector<32x128xf32>
    %7 = arith.maximumf %5, %6 : vector<32x128xf32>
    %c0_6 = arith.constant 0 : index
    %c0_7 = arith.constant 0 : index
    %8 = vector.load %arg4[%c0_6, %c0_7] : memref<32x128xf32, #tpu.memory_space<vmem>>, vector<32x128xf32>
    tpu.vector_store %arg4[%c0_6, %c0_7], %7 {strides = array<i32>} : memref<32x128xf32, #tpu.memory_space<vmem>>, vector<32x128xf32>,
    return
  }
  func.func @transform_0(%arg0: i32) -> (i32, i32) {
    %c0_i32 = arith.constant 0 : i32
    %c0_i32_0 = arith.constant 0 : i32
    %c0_i32_1 = arith.constant 0 : i32
    return %c0_i32, %c0_i32_0 : i32, i32
  }
  func.func @transform_1(%arg0: i32) -> (i32, i32) {
    %c0_i32 = arith.constant 0 : i32
    %c0_i32_0 = arith.constant 0 : i32
    return %c0_i32, %arg0 : i32, i32
  }
  func.func @transform_2(%arg0: i32) -> (i32, i32) {
    %c0_i32 = arith.constant 0 : i32
    %c0_i32_0 = arith.constant 0 : i32
    %c0_i32_1 = arith.constant 0 : i32
    return %c0_i32, %c0_i32_0 : i32, i32
  }
  func.func @transform_3(%arg0: i32) -> (i32, i32) {
    %c0_i32 = arith.constant 0 : i32
    %c0_i32_0 = arith.constant 0 : i32
    return %c0_i32, %arg0 : i32, i32
  }
}

module attributes {stable_mosaic.version = 11 : i64} {
  func.func @_conv_matmul_kernel(%arg0: i32, %arg1: memref<32x288xbf16, #tpu.memory_space<vmem>>, %arg2: memref<288x128xbf16, #tpu.memory_space<vmem>>, %arg3: memref<32x1xf32, #tpu.memory_space<vmem>>, %arg4: memref<32x128xf32, #tpu.memory_space<vmem>>) attributes {dimension_semantics = [#tpu.dimension_semantics<parallel>], iteration_bounds = array<i64: 1>, scalar_prefetch = 0 : i64, scratch_operands = 0 : i64, tpu.core_type = #tpu.core_type<tc>, window_params = [{pipeline_mode = #tpu.pipeline_mode<synchronous>, transform_indices = @transform_0, window_bounds = array<i64: 32, 288>}, {transform_indices = @transform_1, window_bounds = array<i64: 288, 128>}, {pipeline_mode = #tpu.pipeline_mode<synchronous>, transform_indices = @transform_2, window_bounds = array<i64: 32, 1>}, {transform_indices = @transform_3, window_bounds = array<i64: 32, 128>}]} {
    %c0 = arith.constant 0 : index
    %c0_0 = arith.constant 0 : index
    %0 = vector.load %arg2[%c0, %c0_0] : memref<288x128xbf16, #tpu.memory_space<vmem>>, vector<288x128xbf16>
    %c0_1 = arith.constant 0 : index
    %c0_2 = arith.constant 0 : index
    %1 = vector.load %arg1[%c0_1, %c0_2] : memref<32x288xbf16, #tpu.memory_space<vmem>>, vector<32x288xbf16>
    %cst = arith.constant dense<0.000000e+00> : vector<32x128xf32>
    %2 = tpu.matmul %1, %0, %cst {dimension_numbers = #tpu.dot_dimension_numbers<[1], [0], [0], [1], [0, 0, 1, 1], [], []>} : vector<32x288xbf16>, vector<288x128xbf16>, vector<32x128xf32> -> vector<32x128xf32>
    %c0_3 = arith.constant 0 : index
    %c0_4 = arith.constant 0 : index
    %3 = vector.load %arg3[%c0_3, %c0_4] : memref<32x1xf32, #tpu.memory_space<vmem>>, vector<32x1xf32>
    %4 = vector.broadcast %3 : vector<32x1xf32> to vector<32x128xf32>
    %5 = arith.addf %2, %4 : vector<32x128xf32>
    %c0_5 = arith.constant 0 : index
    %c0_6 = arith.constant 0 : index
    %6 = vector.load %arg4[%c0_5, %c0_6] : memref<32x128xf32, #tpu.memory_space<vmem>>, vector<32x128xf32>
    tpu.vector_store %arg4[%c0_5, %c0_6], %5 {strides = array<i32>} : memref<32x128xf32, #tpu.memory_space<vmem>>, vector<32x128xf32>,
    return
  }
  func.func @transform_0(%arg0: i32) -> (i32, i32) {
    %c0_i32 = arith.constant 0 : i32
    %c0_i32_0 = arith.constant 0 : i32
    %c0_i32_1 = arith.constant 0 : i32
    return %c0_i32, %c0_i32_0 : i32, i32
  }
  func.func @transform_1(%arg0: i32) -> (i32, i32) {
    %c0_i32 = arith.constant 0 : i32
    %c0_i32_0 = arith.constant 0 : i32
    return %c0_i32, %arg0 : i32, i32
  }
  func.func @transform_2(%arg0: i32) -> (i32, i32) {
    %c0_i32 = arith.constant 0 : i32
    %c0_i32_0 = arith.constant 0 : i32
    %c0_i32_1 = arith.constant 0 : i32
    return %c0_i32, %c0_i32_0 : i32, i32
  }
  func.func @transform_3(%arg0: i32) -> (i32, i32) {
    %c0_i32 = arith.constant 0 : i32
    %c0_i32_0 = arith.constant 0 : i32
    return %c0_i32, %arg0 : i32, i32
  }
}

module attributes {stable_mosaic.version = 11 : i64} {
  func.func @_residual_kernel(%arg0: i32, %arg1: memref<32x128xf32, #tpu.memory_space<vmem>>, %arg2: memref<288x128xbf16, #tpu.memory_space<vmem>>, %arg3: memref<16x288xbf16, #tpu.memory_space<vmem>>, %arg4: memref<32x16xbf16, #tpu.memory_space<vmem>>, %arg5: memref<32x128xf32, #tpu.memory_space<vmem>>) attributes {dimension_semantics = [#tpu.dimension_semantics<parallel>], iteration_bounds = array<i64: 1>, scalar_prefetch = 0 : i64, scratch_operands = 0 : i64, tpu.core_type = #tpu.core_type<tc>, window_params = [{transform_indices = @transform_0, window_bounds = array<i64: 32, 128>}, {transform_indices = @transform_1, window_bounds = array<i64: 288, 128>}, {pipeline_mode = #tpu.pipeline_mode<synchronous>, transform_indices = @transform_2, window_bounds = array<i64: 16, 288>}, {pipeline_mode = #tpu.pipeline_mode<synchronous>, transform_indices = @transform_3, window_bounds = array<i64: 32, 16>}, {transform_indices = @transform_4, window_bounds = array<i64: 32, 128>}]} {
    %c0 = arith.constant 0 : index
    %c0_0 = arith.constant 0 : index
    %0 = vector.load %arg2[%c0, %c0_0] : memref<288x128xbf16, #tpu.memory_space<vmem>>, vector<288x128xbf16>
    %cst = arith.constant 0.000000e+00 : bf16
    %1 = vector.broadcast %cst : bf16 to vector<288x128xbf16>
    %2 = arith.maximumf %0, %1 : vector<288x128xbf16>
    %c0_1 = arith.constant 0 : index
    %c0_2 = arith.constant 0 : index
    %3 = vector.load %arg3[%c0_1, %c0_2] : memref<16x288xbf16, #tpu.memory_space<vmem>>, vector<16x288xbf16>
    %cst_3 = arith.constant dense<0.000000e+00> : vector<16x128xf32>
    %4 = tpu.matmul %3, %2, %cst_3 {dimension_numbers = #tpu.dot_dimension_numbers<[1], [0], [0], [1], [0, 0, 1, 1], [], []>} : vector<16x288xbf16>, vector<288x128xbf16>, vector<16x128xf32> -> vector<16x128xf32>
    %cst_4 = arith.constant 0.000000e+00 : f32
    %5 = vector.broadcast %cst_4 : f32 to vector<16x128xf32>
    %6 = arith.maximumf %4, %5 : vector<16x128xf32>
    %7 = arith.truncf %6 : vector<16x128xf32> to vector<16x128xbf16>
    %c0_5 = arith.constant 0 : index
    %c0_6 = arith.constant 0 : index
    %8 = vector.load %arg4[%c0_5, %c0_6] : memref<32x16xbf16, #tpu.memory_space<vmem>>, vector<32x16xbf16>
    %cst_7 = arith.constant dense<0.000000e+00> : vector<32x128xf32>
    %9 = tpu.matmul %8, %7, %cst_7 {dimension_numbers = #tpu.dot_dimension_numbers<[1], [0], [0], [1], [0, 0, 1, 1], [], []>} : vector<32x16xbf16>, vector<16x128xbf16>, vector<32x128xf32> -> vector<32x128xf32>
    %c0_8 = arith.constant 0 : index
    %c0_9 = arith.constant 0 : index
    %10 = vector.load %arg1[%c0_8, %c0_9] : memref<32x128xf32, #tpu.memory_space<vmem>>, vector<32x128xf32>
    %11 = arith.addf %10, %9 : vector<32x128xf32>
    %c0_10 = arith.constant 0 : index
    %c0_11 = arith.constant 0 : index
    %12 = vector.load %arg5[%c0_10, %c0_11] : memref<32x128xf32, #tpu.memory_space<vmem>>, vector<32x128xf32>
    tpu.vector_store %arg5[%c0_10, %c0_11], %11 {strides = array<i32>} : memref<32x128xf32, #tpu.memory_space<vmem>>, vector<32x128xf32>,
    return
  }
  func.func @transform_0(%arg0: i32) -> (i32, i32) {
    %c0_i32 = arith.constant 0 : i32
    %c0_i32_0 = arith.constant 0 : i32
    return %c0_i32, %arg0 : i32, i32
  }
  func.func @transform_1(%arg0: i32) -> (i32, i32) {
    %c0_i32 = arith.constant 0 : i32
    %c0_i32_0 = arith.constant 0 : i32
    return %c0_i32, %arg0 : i32, i32
  }
  func.func @transform_2(%arg0: i32) -> (i32, i32) {
    %c0_i32 = arith.constant 0 : i32
    %c0_i32_0 = arith.constant 0 : i32
    %c0_i32_1 = arith.constant 0 : i32
    return %c0_i32, %c0_i32_0 : i32, i32
  }
  func.func @transform_3(%arg0: i32) -> (i32, i32) {
    %c0_i32 = arith.constant 0 : i32
    %c0_i32_0 = arith.constant 0 : i32
    %c0_i32_1 = arith.constant 0 : i32
    return %c0_i32, %c0_i32_0 : i32, i32
  }
  func.func @transform_4(%arg0: i32) -> (i32, i32) {
    %c0_i32 = arith.constant 0 : i32
    %c0_i32_0 = arith.constant 0 : i32
    return %c0_i32, %arg0 : i32, i32
  }
}

module attributes {stable_mosaic.version = 11 : i64} {
  func.func @_vq_kernel(%arg0: i32, %arg1: memref<32x128xf32, #tpu.memory_space<vmem>>, %arg2: memref<16x32xf32, #tpu.memory_space<vmem>>, %arg3: memref<16x1xf32, #tpu.memory_space<vmem>>, %arg4: memref<128x16xf32, #tpu.memory_space<vmem>>, %arg5: memref<16x128xf32, #tpu.memory_space<vmem>>, %arg6: memref<128x1xf32, #tpu.memory_space<vmem>>, %arg7: memref<16x128xf32, #tpu.memory_space<vmem>>, %arg8: memref<1x1xf32, #tpu.memory_space<vmem>>, %arg9: memref<1x1xf32, #tpu.memory_space<vmem>>, %arg10: memref<1x1xf32, #tpu.memory_space<vmem>>, %arg11: memref<128x1xf32, #tpu.memory_space<vmem>>) attributes {dimension_semantics = [#tpu.dimension_semantics<arbitrary>], iteration_bounds = array<i64: 1>, scalar_prefetch = 0 : i64, scratch_operands = 2 : i64, tpu.core_type = #tpu.core_type<tc>, window_params = [{transform_indices = @transform_0, window_bounds = array<i64: 32, 128>}, {pipeline_mode = #tpu.pipeline_mode<synchronous>, transform_indices = @transform_1, window_bounds = array<i64: 16, 32>}, {pipeline_mode = #tpu.pipeline_mode<synchronous>, transform_indices = @transform_2, window_bounds = array<i64: 16, 1>}, {pipeline_mode = #tpu.pipeline_mode<synchronous>, transform_indices = @transform_3, window_bounds = array<i64: 128, 16>}, {pipeline_mode = #tpu.pipeline_mode<synchronous>, transform_indices = @transform_4, window_bounds = array<i64: 16, 128>}, {pipeline_mode = #tpu.pipeline_mode<synchronous>, transform_indices = @transform_5, window_bounds = array<i64: 128, 1>}, {transform_indices = @transform_6, window_bounds = array<i64: 16, 128>}, {pipeline_mode = #tpu.pipeline_mode<synchronous>, transform_indices = @transform_7, window_bounds = array<i64: 1, 1>}, {pipeline_mode = #tpu.pipeline_mode<synchronous>, transform_indices = @transform_8, window_bounds = array<i64: 1, 1>}]} {
    %c0_i32 = arith.constant 0 : i32
    %0 = arith.cmpi eq, %arg0, %c0_i32 : i32
    %1 = arith.extui %0 : i1 to i32
    %c0_i32_0 = arith.constant 0 : i32
    %2 = arith.cmpi ne, %1, %c0_i32_0 : i32
    scf.if %2 {
      %cst_35 = arith.constant 0.000000e+00 : f32
      %69 = vector.broadcast %cst_35 : f32 to vector<1x1xf32>
      %c0_36 = arith.constant 0 : index
      %c0_37 = arith.constant 0 : index
      %70 = vector.load %arg10[%c0_36, %c0_37] : memref<1x1xf32, #tpu.memory_space<vmem>>, vector<1x1xf32>
      tpu.vector_store %arg10[%c0_36, %c0_37], %69 {strides = array<i32>} : memref<1x1xf32, #tpu.memory_space<vmem>>, vector<1x1xf32>,
      %cst_38 = arith.constant 0.000000e+00 : f32
      %71 = vector.broadcast %cst_38 : f32 to vector<128x1xf32>
      %c0_39 = arith.constant 0 : index
      %c0_40 = arith.constant 0 : index
      %72 = vector.load %arg11[%c0_39, %c0_40] : memref<128x1xf32, #tpu.memory_space<vmem>>, vector<128x1xf32>
      tpu.vector_store %arg11[%c0_39, %c0_40], %71 {strides = array<i32>} : memref<128x1xf32, #tpu.memory_space<vmem>>, vector<128x1xf32>,
    } else {
    }
    %c0 = arith.constant 0 : index
    %c0_1 = arith.constant 0 : index
    %3 = vector.load %arg1[%c0, %c0_1] : memref<32x128xf32, #tpu.memory_space<vmem>>, vector<32x128xf32>
    %cst = arith.constant 0.000000e+00 : f32
    %4 = vector.broadcast %cst : f32 to vector<32x128xf32>
    %5 = arith.maximumf %3, %4 : vector<32x128xf32>
    %c0_2 = arith.constant 0 : index
    %c0_3 = arith.constant 0 : index
    %6 = vector.load %arg2[%c0_2, %c0_3] : memref<16x32xf32, #tpu.memory_space<vmem>>, vector<16x32xf32>
    %cst_4 = arith.constant dense<0.000000e+00> : vector<16x128xf32>
    %7 = tpu.matmul %6, %5, %cst_4 {dimension_numbers = #tpu.dot_dimension_numbers<[1], [0], [0], [1], [0, 0, 1, 1], [], []>} : vector<16x32xf32>, vector<32x128xf32>, vector<16x128xf32> -> vector<16x128xf32>
    %c0_5 = arith.constant 0 : index
    %c0_6 = arith.constant 0 : index
    %8 = vector.load %arg3[%c0_5, %c0_6] : memref<16x1xf32, #tpu.memory_space<vmem>>, vector<16x1xf32>
    %9 = vector.broadcast %8 : vector<16x1xf32> to vector<16x128xf32>
    %10 = arith.addf %7, %9 : vector<16x128xf32>
    %11 = tpu.iota {dimensions = array<i32: 1>} : vector<1x128xi32>
    %c128_i32 = arith.constant 128 : i32
    %12 = arith.muli %arg0, %c128_i32 : i32
    %13 = vector.broadcast %12 : i32 to vector<1x128xi32>
    %14 = arith.addi %11, %13 : vector<1x128xi32>
    %c32_i32 = arith.constant 32 : i32
    %15 = vector.broadcast %c32_i32 : i32 to vector<1x128xi32>
    %16 = arith.cmpi slt, %14, %15 : vector<1x128xi32>
    %17 = arith.extui %16 : vector<1x128xi1> to vector<1x128xi32>
    %18 = arith.sitofp %17 : vector<1x128xi32> to vector<1x128xf32>
    %19 = arith.mulf %10, %10 : vector<16x128xf32>
    %cst_7 = arith.constant dense<0.000000e+00> : vector<128xf32>
    %20 = vector.multi_reduction <add>, %19, %cst_7 [0] : vector<16x128xf32> to vector<128xf32>
    %21 = vector.shape_cast %20 : vector<128xf32> to vector<1x128xf32>
    %c0_8 = arith.constant 0 : index
    %c0_9 = arith.constant 0 : index
    %22 = vector.load %arg6[%c0_8, %c0_9] : memref<128x1xf32, #tpu.memory_space<vmem>>, vector<128x1xf32>
    %23 = vector.broadcast %22 : vector<128x1xf32> to vector<128x128xf32>
    %24 = vector.broadcast %21 : vector<1x128xf32> to vector<128x128xf32>
    %25 = arith.addf %23, %24 : vector<128x128xf32>
    %c0_10 = arith.constant 0 : index
    %c0_11 = arith.constant 0 : index
    %26 = vector.load %arg4[%c0_10, %c0_11] : memref<128x16xf32, #tpu.memory_space<vmem>>, vector<128x16xf32>
    %cst_12 = arith.constant dense<0.000000e+00> : vector<128x128xf32>
    %27 = tpu.matmul %26, %10, %cst_12 {dimension_numbers = #tpu.dot_dimension_numbers<[1], [0], [0], [1], [0, 0, 1, 1], [], []>} : vector<128x16xf32>, vector<16x128xf32>, vector<128x128xf32> -> vector<128x128xf32>
    %cst_13 = arith.constant 2.000000e+00 : f32
    %28 = vector.broadcast %cst_13 : f32 to vector<128x128xf32>
    %29 = arith.mulf %28, %27 : vector<128x128xf32>
    %30 = arith.subf %25, %29 : vector<128x128xf32>
    %cst_14 = arith.constant dense<0x7F800000> : vector<128xf32>
    %31 = vector.multi_reduction <minimumf>, %30, %cst_14 [0] : vector<128x128xf32> to vector<128xf32>
    %32 = vector.shape_cast %31 : vector<128xf32> to vector<1x128xf32>
    %33 = tpu.iota {dimensions = array<i32: 0>} : vector<128x128xi32>
    %34 = arith.sitofp %33 : vector<128x128xi32> to vector<128x128xf32>
    %35 = vector.broadcast %32 : vector<1x128xf32> to vector<128x128xf32>
    %36 = arith.cmpf ole, %30, %35 : vector<128x128xf32>
    %cst_15 = arith.constant 1.280000e+02 : f32
    %37 = vector.broadcast %cst_15 : f32 to vector<128x128xf32>
    %38 = arith.select %36, %34, %37 : vector<128x128xi1>, vector<128x128xf32>
    %cst_16 = arith.constant dense<0x7F800000> : vector<128xf32>
    %39 = vector.multi_reduction <minimumf>, %38, %cst_16 [0] : vector<128x128xf32> to vector<128xf32>
    %40 = vector.shape_cast %39 : vector<128xf32> to vector<1x128xf32>
    %41 = vector.broadcast %40 : vector<1x128xf32> to vector<128x128xf32>
    %42 = arith.cmpf oeq, %34, %41 : vector<128x128xf32>
    %43 = arith.extui %42 : vector<128x128xi1> to vector<128x128xi32>
    %44 = arith.sitofp %43 : vector<128x128xi32> to vector<128x128xf32>
    %45 = vector.broadcast %18 : vector<1x128xf32> to vector<128x128xf32>
    %46 = arith.mulf %44, %45 : vector<128x128xf32>
    %c0_17 = arith.constant 0 : index
    %c0_18 = arith.constant 0 : index
    %47 = vector.load %arg5[%c0_17, %c0_18] : memref<16x128xf32, #tpu.memory_space<vmem>>, vector<16x128xf32>
    %cst_19 = arith.constant dense<0.000000e+00> : vector<16x128xf32>
    %48 = tpu.matmul %47, %46, %cst_19 {dimension_numbers = #tpu.dot_dimension_numbers<[1], [0], [0], [1], [0, 0, 1, 1], [], []>} : vector<16x128xf32>, vector<128x128xf32>, vector<16x128xf32> -> vector<16x128xf32>
    %c0_20 = arith.constant 0 : index
    %c0_21 = arith.constant 0 : index
    %49 = vector.load %arg7[%c0_20, %c0_21] : memref<16x128xf32, #tpu.memory_space<vmem>>, vector<16x128xf32>
    tpu.vector_store %arg7[%c0_20, %c0_21], %48 {strides = array<i32>} : memref<16x128xf32, #tpu.memory_space<vmem>>, vector<16x128xf32>,
    %50 = arith.subf %48, %10 : vector<16x128xf32>
    %51 = vector.broadcast %18 : vector<1x128xf32> to vector<16x128xf32>
    %52 = arith.mulf %50, %51 : vector<16x128xf32>
    %53 = arith.mulf %52, %52 : vector<16x128xf32>
    %c0_22 = arith.constant 0 : index
    %c0_23 = arith.constant 0 : index
    %54 = vector.load %arg10[%c0_22, %c0_23] : memref<1x1xf32, #tpu.memory_space<vmem>>, vector<1x1xf32>
    %cst_24 = arith.constant dense<0.000000e+00> : vector<128xf32>
    %55 = vector.multi_reduction <add>, %53, %cst_24 [0] : vector<16x128xf32> to vector<128xf32>
    %56 = vector.shape_cast %55 : vector<128xf32> to vector<1x128xf32>
    %cst_25 = arith.constant dense<0.000000e+00> : vector<1xf32>
    %57 = vector.multi_reduction <add>, %56, %cst_25 [1] : vector<1x128xf32> to vector<1xf32>
    %58 = vector.shape_cast %57 : vector<1xf32> to vector<1x1xf32>
    %59 = arith.addf %54, %58 : vector<1x1xf32>
    %c0_26 = arith.constant 0 : index
    %c0_27 = arith.constant 0 : index
    %60 = vector.load %arg10[%c0_26, %c0_27] : memref<1x1xf32, #tpu.memory_space<vmem>>, vector<1x1xf32>
    tpu.vector_store %arg10[%c0_26, %c0_27], %59 {strides = array<i32>} : memref<1x1xf32, #tpu.memory_space<vmem>>, vector<1x1xf32>,
    %c0_28 = arith.constant 0 : index
    %c0_29 = arith.constant 0 : index
    %61 = vector.load %arg11[%c0_28, %c0_29] : memref<128x1xf32, #tpu.memory_space<vmem>>, vector<128x1xf32>
    %cst_30 = arith.constant dense<0.000000e+00> : vector<128xf32>
    %62 = vector.multi_reduction <add>, %46, %cst_30 [1] : vector<128x128xf32> to vector<128xf32>
    %63 = vector.shape_cast %62 : vector<128xf32> to vector<128x1xf32>
    %64 = arith.addf %61, %63 : vector<128x1xf32>
    %c0_31 = arith.constant 0 : index
    %c0_32 = arith.constant 0 : index
    %65 = vector.load %arg11[%c0_31, %c0_32] : memref<128x1xf32, #tpu.memory_space<vmem>>, vector<128x1xf32>
    tpu.vector_store %arg11[%c0_31, %c0_32], %64 {strides = array<i32>} : memref<128x1xf32, #tpu.memory_space<vmem>>, vector<128x1xf32>,
    %c0_i32_33 = arith.constant 0 : i32
    %66 = arith.cmpi eq, %arg0, %c0_i32_33 : i32
    %67 = arith.extui %66 : i1 to i32
    %c0_i32_34 = arith.constant 0 : i32
    %68 = arith.cmpi ne, %67, %c0_i32_34 : i32
    scf.if %68 {
      %c0_35 = arith.constant 0 : index
      %c0_36 = arith.constant 0 : index
      %69 = vector.load %arg10[%c0_35, %c0_36] : memref<1x1xf32, #tpu.memory_space<vmem>>, vector<1x1xf32>
      %cst_37 = arith.constant 1.250000e+00 : f32
      %70 = vector.broadcast %cst_37 : f32 to vector<1x1xf32>
      %71 = arith.mulf %70, %69 : vector<1x1xf32>
      %cst_38 = arith.constant 5.120000e+02 : f32
      %72 = vector.broadcast %cst_38 : f32 to vector<1x1xf32>
      %73 = arith.divf %71, %72 : vector<1x1xf32>
      %c0_39 = arith.constant 0 : index
      %c0_40 = arith.constant 0 : index
      %74 = vector.load %arg8[%c0_39, %c0_40] : memref<1x1xf32, #tpu.memory_space<vmem>>, vector<1x1xf32>
      tpu.vector_store %arg8[%c0_39, %c0_40], %73 {strides = array<i32>} : memref<1x1xf32, #tpu.memory_space<vmem>>, vector<1x1xf32>,
      %c0_41 = arith.constant 0 : index
      %c0_42 = arith.constant 0 : index
      %75 = vector.load %arg11[%c0_41, %c0_42] : memref<128x1xf32, #tpu.memory_space<vmem>>, vector<128x1xf32>
      %cst_43 = arith.constant 3.200000e+01 : f32
      %76 = vector.broadcast %cst_43 : f32 to vector<128x1xf32>
      %77 = arith.divf %75, %76 : vector<128x1xf32>
      %cst_44 = arith.constant 1.000000e-10 : f32
      %78 = vector.broadcast %cst_44 : f32 to vector<128x1xf32>
      %79 = arith.addf %77, %78 : vector<128x1xf32>
      %80 = math.log %79 : vector<128x1xf32>
      %81 = arith.mulf %77, %80 : vector<128x1xf32>
      %cst_45 = arith.constant dense<0.000000e+00> : vector<1xf32>
      %82 = vector.multi_reduction <add>, %81, %cst_45 [0] : vector<128x1xf32> to vector<1xf32>
      %83 = vector.shape_cast %82 : vector<1xf32> to vector<1x1xf32>
      %cst_46 = arith.constant 0.000000e+00 : f32
      %84 = vector.broadcast %cst_46 : f32 to vector<1x1xf32>
      %85 = arith.subf %84, %83 : vector<1x1xf32>
      %86 = math.exp %85 : vector<1x1xf32>
      %c0_47 = arith.constant 0 : index
      %c0_48 = arith.constant 0 : index
      %87 = vector.load %arg9[%c0_47, %c0_48] : memref<1x1xf32, #tpu.memory_space<vmem>>, vector<1x1xf32>
      tpu.vector_store %arg9[%c0_47, %c0_48], %86 {strides = array<i32>} : memref<1x1xf32, #tpu.memory_space<vmem>>, vector<1x1xf32>,
    } else {
    }
    return
  }
  func.func @transform_0(%arg0: i32) -> (i32, i32) {
    %c0_i32 = arith.constant 0 : i32
    %c0_i32_0 = arith.constant 0 : i32
    return %c0_i32, %arg0 : i32, i32
  }
  func.func @transform_1(%arg0: i32) -> (i32, i32) {
    %c0_i32 = arith.constant 0 : i32
    %c0_i32_0 = arith.constant 0 : i32
    %c0_i32_1 = arith.constant 0 : i32
    return %c0_i32, %c0_i32_0 : i32, i32
  }
  func.func @transform_2(%arg0: i32) -> (i32, i32) {
    %c0_i32 = arith.constant 0 : i32
    %c0_i32_0 = arith.constant 0 : i32
    %c0_i32_1 = arith.constant 0 : i32
    return %c0_i32, %c0_i32_0 : i32, i32
  }
  func.func @transform_3(%arg0: i32) -> (i32, i32) {
    %c0_i32 = arith.constant 0 : i32
    %c0_i32_0 = arith.constant 0 : i32
    %c0_i32_1 = arith.constant 0 : i32
    return %c0_i32, %c0_i32_0 : i32, i32
  }
  func.func @transform_4(%arg0: i32) -> (i32, i32) {
    %c0_i32 = arith.constant 0 : i32
    %c0_i32_0 = arith.constant 0 : i32
    %c0_i32_1 = arith.constant 0 : i32
    return %c0_i32, %c0_i32_0 : i32, i32
  }
  func.func @transform_5(%arg0: i32) -> (i32, i32) {
    %c0_i32 = arith.constant 0 : i32
    %c0_i32_0 = arith.constant 0 : i32
    %c0_i32_1 = arith.constant 0 : i32
    return %c0_i32, %c0_i32_0 : i32, i32
  }
  func.func @transform_6(%arg0: i32) -> (i32, i32) {
    %c0_i32 = arith.constant 0 : i32
    %c0_i32_0 = arith.constant 0 : i32
    return %c0_i32, %arg0 : i32, i32
  }
  func.func @transform_7(%arg0: i32) -> (i32, i32) {
    %c0_i32 = arith.constant 0 : i32
    %c0_i32_0 = arith.constant 0 : i32
    %c0_i32_1 = arith.constant 0 : i32
    return %c0_i32, %c0_i32_0 : i32, i32
  }
  func.func @transform_8(%arg0: i32) -> (i32, i32) {
    %c0_i32 = arith.constant 0 : i32
    %c0_i32_0 = arith.constant 0 : i32
    %c0_i32_1 = arith.constant 0 : i32
    return %c0_i32, %c0_i32_0 : i32, i32
  }
}

module attributes {stable_mosaic.version = 11 : i64} {
  func.func @_conv_matmul_kernel(%arg0: i32, %arg1: memref<32x144xbf16, #tpu.memory_space<vmem>>, %arg2: memref<144x128xbf16, #tpu.memory_space<vmem>>, %arg3: memref<32x1xf32, #tpu.memory_space<vmem>>, %arg4: memref<32x128xf32, #tpu.memory_space<vmem>>) attributes {dimension_semantics = [#tpu.dimension_semantics<parallel>], iteration_bounds = array<i64: 1>, scalar_prefetch = 0 : i64, scratch_operands = 0 : i64, tpu.core_type = #tpu.core_type<tc>, window_params = [{pipeline_mode = #tpu.pipeline_mode<synchronous>, transform_indices = @transform_0, window_bounds = array<i64: 32, 144>}, {transform_indices = @transform_1, window_bounds = array<i64: 144, 128>}, {pipeline_mode = #tpu.pipeline_mode<synchronous>, transform_indices = @transform_2, window_bounds = array<i64: 32, 1>}, {transform_indices = @transform_3, window_bounds = array<i64: 32, 128>}]} {
    %c0 = arith.constant 0 : index
    %c0_0 = arith.constant 0 : index
    %0 = vector.load %arg2[%c0, %c0_0] : memref<144x128xbf16, #tpu.memory_space<vmem>>, vector<144x128xbf16>
    %c0_1 = arith.constant 0 : index
    %c0_2 = arith.constant 0 : index
    %1 = vector.load %arg1[%c0_1, %c0_2] : memref<32x144xbf16, #tpu.memory_space<vmem>>, vector<32x144xbf16>
    %cst = arith.constant dense<0.000000e+00> : vector<32x128xf32>
    %2 = tpu.matmul %1, %0, %cst {dimension_numbers = #tpu.dot_dimension_numbers<[1], [0], [0], [1], [0, 0, 1, 1], [], []>} : vector<32x144xbf16>, vector<144x128xbf16>, vector<32x128xf32> -> vector<32x128xf32>
    %c0_3 = arith.constant 0 : index
    %c0_4 = arith.constant 0 : index
    %3 = vector.load %arg3[%c0_3, %c0_4] : memref<32x1xf32, #tpu.memory_space<vmem>>, vector<32x1xf32>
    %4 = vector.broadcast %3 : vector<32x1xf32> to vector<32x128xf32>
    %5 = arith.addf %2, %4 : vector<32x128xf32>
    %c0_5 = arith.constant 0 : index
    %c0_6 = arith.constant 0 : index
    %6 = vector.load %arg4[%c0_5, %c0_6] : memref<32x128xf32, #tpu.memory_space<vmem>>, vector<32x128xf32>
    tpu.vector_store %arg4[%c0_5, %c0_6], %5 {strides = array<i32>} : memref<32x128xf32, #tpu.memory_space<vmem>>, vector<32x128xf32>,
    return
  }
  func.func @transform_0(%arg0: i32) -> (i32, i32) {
    %c0_i32 = arith.constant 0 : i32
    %c0_i32_0 = arith.constant 0 : i32
    %c0_i32_1 = arith.constant 0 : i32
    return %c0_i32, %c0_i32_0 : i32, i32
  }
  func.func @transform_1(%arg0: i32) -> (i32, i32) {
    %c0_i32 = arith.constant 0 : i32
    %c0_i32_0 = arith.constant 0 : i32
    return %c0_i32, %arg0 : i32, i32
  }
  func.func @transform_2(%arg0: i32) -> (i32, i32) {
    %c0_i32 = arith.constant 0 : i32
    %c0_i32_0 = arith.constant 0 : i32
    %c0_i32_1 = arith.constant 0 : i32
    return %c0_i32, %c0_i32_0 : i32, i32
  }
  func.func @transform_3(%arg0: i32) -> (i32, i32) {
    %c0_i32 = arith.constant 0 : i32
    %c0_i32_0 = arith.constant 0 : i32
    return %c0_i32, %arg0 : i32, i32
  }
}

module attributes {stable_mosaic.version = 11 : i64} {
  func.func @_conv_matmul_kernel(%arg0: i32, %arg1: memref<16x512xbf16, #tpu.memory_space<vmem>>, %arg2: memref<512x128xbf16, #tpu.memory_space<vmem>>, %arg3: memref<16x1xf32, #tpu.memory_space<vmem>>, %arg4: memref<16x128xf32, #tpu.memory_space<vmem>>) attributes {dimension_semantics = [#tpu.dimension_semantics<parallel>], iteration_bounds = array<i64: 1>, scalar_prefetch = 0 : i64, scratch_operands = 0 : i64, tpu.core_type = #tpu.core_type<tc>, window_params = [{pipeline_mode = #tpu.pipeline_mode<synchronous>, transform_indices = @transform_0, window_bounds = array<i64: 16, 512>}, {transform_indices = @transform_1, window_bounds = array<i64: 512, 128>}, {pipeline_mode = #tpu.pipeline_mode<synchronous>, transform_indices = @transform_2, window_bounds = array<i64: 16, 1>}, {transform_indices = @transform_3, window_bounds = array<i64: 16, 128>}]} {
    %c0 = arith.constant 0 : index
    %c0_0 = arith.constant 0 : index
    %0 = vector.load %arg2[%c0, %c0_0] : memref<512x128xbf16, #tpu.memory_space<vmem>>, vector<512x128xbf16>
    %cst = arith.constant 0.000000e+00 : bf16
    %1 = vector.broadcast %cst : bf16 to vector<512x128xbf16>
    %2 = arith.maximumf %0, %1 : vector<512x128xbf16>
    %c0_1 = arith.constant 0 : index
    %c0_2 = arith.constant 0 : index
    %3 = vector.load %arg1[%c0_1, %c0_2] : memref<16x512xbf16, #tpu.memory_space<vmem>>, vector<16x512xbf16>
    %cst_3 = arith.constant dense<0.000000e+00> : vector<16x128xf32>
    %4 = tpu.matmul %3, %2, %cst_3 {dimension_numbers = #tpu.dot_dimension_numbers<[1], [0], [0], [1], [0, 0, 1, 1], [], []>} : vector<16x512xbf16>, vector<512x128xbf16>, vector<16x128xf32> -> vector<16x128xf32>
    %c0_4 = arith.constant 0 : index
    %c0_5 = arith.constant 0 : index
    %5 = vector.load %arg3[%c0_4, %c0_5] : memref<16x1xf32, #tpu.memory_space<vmem>>, vector<16x1xf32>
    %6 = vector.broadcast %5 : vector<16x1xf32> to vector<16x128xf32>
    %7 = arith.addf %4, %6 : vector<16x128xf32>
    %cst_6 = arith.constant 0.000000e+00 : f32
    %8 = vector.broadcast %cst_6 : f32 to vector<16x128xf32>
    %9 = arith.maximumf %7, %8 : vector<16x128xf32>
    %c0_7 = arith.constant 0 : index
    %c0_8 = arith.constant 0 : index
    %10 = vector.load %arg4[%c0_7, %c0_8] : memref<16x128xf32, #tpu.memory_space<vmem>>, vector<16x128xf32>
    tpu.vector_store %arg4[%c0_7, %c0_8], %9 {strides = array<i32>} : memref<16x128xf32, #tpu.memory_space<vmem>>, vector<16x128xf32>,
    return
  }
  func.func @transform_0(%arg0: i32) -> (i32, i32) {
    %c0_i32 = arith.constant 0 : i32
    %c0_i32_0 = arith.constant 0 : i32
    %c0_i32_1 = arith.constant 0 : i32
    return %c0_i32, %c0_i32_0 : i32, i32
  }
  func.func @transform_1(%arg0: i32) -> (i32, i32) {
    %c0_i32 = arith.constant 0 : i32
    %c0_i32_0 = arith.constant 0 : i32
    return %c0_i32, %arg0 : i32, i32
  }
  func.func @transform_2(%arg0: i32) -> (i32, i32) {
    %c0_i32 = arith.constant 0 : i32
    %c0_i32_0 = arith.constant 0 : i32
    %c0_i32_1 = arith.constant 0 : i32
    return %c0_i32, %c0_i32_0 : i32, i32
  }
  func.func @transform_3(%arg0: i32) -> (i32, i32) {
    %c0_i32 = arith.constant 0 : i32
    %c0_i32_0 = arith.constant 0 : i32
    return %c0_i32, %arg0 : i32, i32
  }
}

module attributes {stable_mosaic.version = 11 : i64} {
  func.func @_conv_matmul_kernel(%arg0: i32, %arg1: memref<3x256xbf16, #tpu.memory_space<vmem>>, %arg2: memref<256x512xbf16, #tpu.memory_space<vmem>>, %arg3: memref<3x1xf32, #tpu.memory_space<vmem>>, %arg4: memref<3x512xf32, #tpu.memory_space<vmem>>) attributes {dimension_semantics = [#tpu.dimension_semantics<parallel>], iteration_bounds = array<i64: 1>, scalar_prefetch = 0 : i64, scratch_operands = 0 : i64, tpu.core_type = #tpu.core_type<tc>, window_params = [{pipeline_mode = #tpu.pipeline_mode<synchronous>, transform_indices = @transform_0, window_bounds = array<i64: 3, 256>}, {transform_indices = @transform_1, window_bounds = array<i64: 256, 512>}, {pipeline_mode = #tpu.pipeline_mode<synchronous>, transform_indices = @transform_2, window_bounds = array<i64: 3, 1>}, {transform_indices = @transform_3, window_bounds = array<i64: 3, 512>}]} {
    %c0 = arith.constant 0 : index
    %c0_0 = arith.constant 0 : index
    %0 = vector.load %arg2[%c0, %c0_0] : memref<256x512xbf16, #tpu.memory_space<vmem>>, vector<256x512xbf16>
    %c0_1 = arith.constant 0 : index
    %c0_2 = arith.constant 0 : index
    %1 = vector.load %arg1[%c0_1, %c0_2] : memref<3x256xbf16, #tpu.memory_space<vmem>>, vector<3x256xbf16>
    %cst = arith.constant dense<0.000000e+00> : vector<3x512xf32>
    %2 = tpu.matmul %1, %0, %cst {dimension_numbers = #tpu.dot_dimension_numbers<[1], [0], [0], [1], [0, 0, 1, 1], [], []>} : vector<3x256xbf16>, vector<256x512xbf16>, vector<3x512xf32> -> vector<3x512xf32>
    %c0_3 = arith.constant 0 : index
    %c0_4 = arith.constant 0 : index
    %3 = vector.load %arg3[%c0_3, %c0_4] : memref<3x1xf32, #tpu.memory_space<vmem>>, vector<3x1xf32>
    %4 = vector.broadcast %3 : vector<3x1xf32> to vector<3x512xf32>
    %5 = arith.addf %2, %4 : vector<3x512xf32>
    %c0_5 = arith.constant 0 : index
    %c0_6 = arith.constant 0 : index
    %6 = vector.load %arg4[%c0_5, %c0_6] : memref<3x512xf32, #tpu.memory_space<vmem>>, vector<3x512xf32>
    tpu.vector_store %arg4[%c0_5, %c0_6], %5 {strides = array<i32>} : memref<3x512xf32, #tpu.memory_space<vmem>>, vector<3x512xf32>,
    return
  }
  func.func @transform_0(%arg0: i32) -> (i32, i32) {
    %c0_i32 = arith.constant 0 : i32
    %c0_i32_0 = arith.constant 0 : i32
    %c0_i32_1 = arith.constant 0 : i32
    return %c0_i32, %c0_i32_0 : i32, i32
  }
  func.func @transform_1(%arg0: i32) -> (i32, i32) {
    %c0_i32 = arith.constant 0 : i32
    %c0_i32_0 = arith.constant 0 : i32
    return %c0_i32, %arg0 : i32, i32
  }
  func.func @transform_2(%arg0: i32) -> (i32, i32) {
    %c0_i32 = arith.constant 0 : i32
    %c0_i32_0 = arith.constant 0 : i32
    %c0_i32_1 = arith.constant 0 : i32
    return %c0_i32, %c0_i32_0 : i32, i32
  }
  func.func @transform_3(%arg0: i32) -> (i32, i32) {
    %c0_i32 = arith.constant 0 : i32
    %c0_i32_0 = arith.constant 0 : i32
    return %c0_i32, %arg0 : i32, i32
  }
}

</mosaic_0001>

<bundles_post_ra>
// kernel: vqvae_forward.11
= control target key start
LH: loop header
LB: loop body
LE: loop exit
PB: predicated region body
PF: predicated region fallthrough
CT: control target
= control target key end

     0   :  { %v138_v0 = vmov 0.0   ;;  %vm139_vm0 = vmmov 0   ;;  %v140_v2 = vmov 0   ;;  %vm58_vm1 = vcmask 392192   ;;  %s185_s1 = inlined_call_operand.vmem [shape: bf16[48,128], index: 1, kind: input, shape index: {}]   ;;  %s186_s2 = inlined_call_operand.vmem [shape: f32[16,1], index: 2, kind: input, shape index: {}]   ;;  %s187_s0 = inlined_call_operand.vmem [shape: bf16[16,48], index: 0, kind: input, shape index: {}]   ;;  %s188_s3 = inlined_call_operand.vmem [shape: f32[16,128], index: 3, kind: output, shape index: {}]  }
   0x1   :  { %120 = vmatprep.subr.bf16.mxu0 %v138_v0  ;;  %v134_v1 = vld [vmem:[%s185_s1 + $0x10] sm:$0xff]   ;;  %126 = vmatprep.mubr.msk.bf16.mxu0 %vm139_vm0, %v138_v0  ;;  %v135_v3 = vld [vmem:[%s185_s1 + $0x8] sm:$0xff]   ;;  %v23_v4 = vld [vmem:[%s186_s2] sm:$0xff] }
   0x2   :  { %133 = vset.pattern.permute.xlu0 %v140_v2  ;;  %121 = vmatpush3.bf16.msra.mxu0 %v134_v1  ;;  %v136_v5 = vld [vmem:[%s185_s1] sm:$0xff]   ;;  %v24_v6 = vld [vmem:[%s186_s2 + $0x8] sm:$0xff] }
   0x3   :  { %122 = vmatprep.subr.bf16.mxu0 %v138_v0  ;;  %27 = vperm.xlu0 %133, %v23_v4   ;;  %v137_v7 = vld [vmem:[%s187_s0] sm:$0xff]  }
   0x6   :  { %123 = vmatpush3.bf16.msra.mxu0 %v135_v3 }
   0x7   :  { %124 = vmatprep.subr.bf16.mxu0 %v138_v0  ;;  %32 = vperm.xlu0 %133, %v24_v6  }
   0xa   :  { %125 = vmatpush3.bf16.msra.mxu0 %v136_v5 }
   0xd   :  { %127 = vmatmul.mubr.msk.bf16.vlgmr.msra.gmra.mxu0 %vm58_vm1, %v137_v7 }
  0x7e   :  { %v28_v8 = vpop.permute.xlu0 %27 }
  0x82   :  { %v33_v13 = vpop.permute.xlu0 %32 }
  0xcd   :  { %v96_v9 = vpop.f32.mrf.mxu0 }
  0xce   :  { %v97_v10 = vadd.f32 %v96_v9, %v28_v8 }
  0xcf   :  { %v128_v11 = vpop.f32.mrf.mxu0 }
  0xd0   :  { %v103_v12 = vmax.f32 %v97_v10, 0.0 }
  0xd1   :  { %v99_v14 = vpop.f32.mrf.mxu0 }
  0xd2   :  { %105 = vst [vmem:[%s188_s3] sm:$0xff] %v103_v12  ;;  %v100_v15 = vadd.f32 %v99_v14, %v33_v13 }
  0xd3   :  { %v129_v16 = vpop.f32.mrf.mxu0 }
  0xd4   :  { %v104_v17 = vmax.f32 %v100_v15, 0.0 }
  0xd6   :  { %106 = vst [vmem:[%s188_s3 + $0x8] sm:$0xff] %v104_v17 }

// kernel: vqvae_forward.12
= control target key start
LH: loop header
LB: loop body
LE: loop exit
PB: predicated region body
PF: predicated region fallthrough
CT: control target
= control target key end

     0   :  { %v341_v1 = vmov 0   ;;  %s446_s1 = inlined_call_operand.vmem [shape: bf16[256,128], index: 1, kind: input, shape index: {}]   ;;  %s447_s0 = inlined_call_operand.vmem [shape: bf16[32,256], index: 0, kind: input, shape index: {}]   ;;  %s448_s2 = inlined_call_operand.vmem [shape: f32[32,1], index: 2, kind: input, shape index: {}]   ;;  %s449_s3 = inlined_call_operand.vmem [shape: f32[32,128], index: 3, kind: output, shape index: {}]  }
   0x1   :  { %v319_v0 = vld [vmem:[%s446_s1 + $0x78] sm:$0xff]   ;;  %318 = vset.pattern.permute.xlu1 %v341_v1  ;;  %317 = vset.pattern.permute.xlu0 %v341_v1  ;;  %v321_v3 = vld [vmem:[%s446_s1 + $0x70] sm:$0xff]   ;;  %v323_v5 = vld [vmem:[%s446_s1 + $0x68] sm:$0xff]  }
   0x2   :  { %v320_v2 = vld [vmem:[%s446_s1 + $0x38] sm:$0xff]   ;;  %272 = vmatprep.subr.bf16.mxu0 %v319_v0  ;;  %300 = vmatprep.subr.bf16.mxu1 %v319_v0  ;;  %v322_v4 = vld [vmem:[%s446_s1 + $0x30] sm:$0xff]   ;;  %v324_v6 = vld [vmem:[%s446_s1 + $0x28] sm:$0xff]  }
   0x3   :  { %273 = vmatpush3.bf16.msra.mxu0 %v320_v2  ;;  %308 = vmatpush3.bf16.msra.mxu1 %v320_v2  ;;  %v325_v7 = vld [vmem:[%s446_s1 + $0x60] sm:$0xff]   ;;  %v327_v9 = vld [vmem:[%s446_s1 + $0x58] sm:$0xff]   ;;  %v329_v11 = vld [vmem:[%s446_s1 + $0x50] sm:$0xff]  }
   0x4   :  { %274 = vmatprep.subr.bf16.mxu0 %v321_v3  ;;  %301 = vmatprep.subr.bf16.mxu1 %v321_v3  ;;  %v326_v8 = vld [vmem:[%s446_s1 + $0x20] sm:$0xff]   ;;  %v328_v10 = vld [vmem:[%s446_s1 + $0x18] sm:$0xff]   ;;  %v330_v14 = vld [vmem:[%s446_s1 + $0x10] sm:$0xff]  }
   0x5   :  { %v337_v12 = vld [vmem:[%s447_s0 + $0x4] ss:$8 sps:$4 sm:$0xff]   ;;  %v340_v13 = vld [vmem:[%s447_s0 + $0x14] ss:$8 sps:$4 sm:$0xff]   ;;  %v335_v23 = vld [vmem:[%s447_s0] ss:$8 sps:$4 sm:$0xff]  }
   0x6   :  { %v53_v15 = vld [vmem:[%s448_s2 + $0x10] sm:$0xff]  ;;  %v51_v16 = vld [vmem:[%s448_s2] sm:$0xff]  ;;  %v331_v17 = vld [vmem:[%s446_s1 + $0x48] sm:$0xff]   ;;  %223 = vmatprep.mubr.bf16.mxu0 %v337_v12  ;;  %231 = vmatprep.mubr.bf16.mxu1 %v340_v13 }
   0x7   :  { %275 = vmatpush3.bf16.msra.mxu0 %v322_v4  ;;  %309 = vmatpush3.bf16.msra.mxu1 %v322_v4  ;;  %v332_v18 = vld [vmem:[%s446_s1 + $0x8] sm:$0xff]   ;;  %v54_v19 = vld [vmem:[%s448_s2 + $0x18] sm:$0xff]  ;;  %v333_v21 = vld [vmem:[%s446_s1 + $0x40] sm:$0xff]  }
   0x8   :  { %276 = vmatprep.subr.bf16.mxu0 %v323_v5  ;;  %302 = vmatprep.subr.bf16.mxu1 %v323_v5  ;;  %v52_v20 = vld [vmem:[%s448_s2 + $0x8] sm:$0xff]  ;;  %v334_v22 = vld [vmem:[%s446_s1] sm:$0xff]   ;;  %v338_v24 = vld [vmem:[%s447_s0 + $0x10] ss:$8 sps:$4 sm:$0xff]  }
   0x9   :  { %67 = vperm.xlu1 %318, %v53_v15   ;;  %57 = vperm.xlu0 %317, %v51_v16  }
   0xb   :  { %277 = vmatpush3.bf16.msra.mxu0 %v324_v6  ;;  %310 = vmatpush3.bf16.msra.mxu1 %v324_v6 }
   0xc   :  { %278 = vmatprep.subr.bf16.mxu0 %v325_v7  ;;  %303 = vmatprep.subr.bf16.mxu1 %v325_v7 }
   0xd   :  { %72 = vperm.xlu1 %318, %v54_v19   ;;  %62 = vperm.xlu0 %317, %v52_v20  }
   0xf   :  { %279 = vmatpush3.bf16.msra.mxu0 %v326_v8  ;;  %311 = vmatpush3.bf16.msra.mxu1 %v326_v8 }
  0x10   :  { %280 = vmatprep.subr.bf16.mxu0 %v327_v9  ;;  %304 = vmatprep.subr.bf16.mxu1 %v327_v9 }
  0x13   :  { %281 = vmatpush3.bf16.msra.mxu0 %v328_v10  ;;  %312 = vmatpush3.bf16.msra.mxu1 %v328_v10 }
  0x14   :  { %282 = vmatprep.subr.bf16.mxu0 %v329_v11  ;;  %305 = vmatprep.subr.bf16.mxu1 %v329_v11 }
  0x17   :  { %283 = vmatpush3.bf16.msra.mxu0 %v330_v14  ;;  %313 = vmatpush3.bf16.msra.mxu1 %v330_v14 }
  0x18   :  { %284 = vmatprep.subr.bf16.mxu0 %v331_v17  ;;  %306 = vmatprep.subr.bf16.mxu1 %v331_v17 }
  0x1b   :  { %285 = vmatpush3.bf16.msra.mxu0 %v332_v18  ;;  %314 = vmatpush3.bf16.msra.mxu1 %v332_v18 }
  0x1c   :  { %286 = vmatprep.subr.bf16.mxu0 %v333_v21  ;;  %307 = vmatprep.subr.bf16.mxu1 %v333_v21 }
  0x1f   :  { %287 = vmatpush3.bf16.msra.mxu0 %v334_v22  ;;  %315 = vmatpush3.bf16.msra.mxu1 %v334_v22 }
  0x22   :  { %224 = vmatmul.mubr.bf16.vlgmr.msra.gmra.mxu0 %v335_v23  ;;  %232 = vmatmul.mubr.bf16.vlgmr.msra.gmra.mxu1 %v338_v24 }
  0x84   :  { %v68_v27 = vpop.permute.xlu1 %67  ;;  %v58_v28 = vpop.permute.xlu0 %57 }
  0x88   :  { %v73_v43 = vpop.permute.xlu1 %72  ;;  %v63_v44 = vpop.permute.xlu0 %62 }
  0xe2   :  { %v288_v25 = vpop.f32.mrf.mxu0  ;;  %v294_v26 = vpop.f32.mrf.mxu1 }
  0xe4   :  { %v289_v29 = vpop.f32.mrf.mxu0  ;;  %v295_v30 = vpop.f32.mrf.mxu1 }
  0xe5   :  { %v290_v31 = vadd.f32 %v289_v29, %v288_v25  ;;  %v296_v32 = vadd.f32 %v295_v30, %v294_v26 }
  0xe6   :  { %v291_v33 = vpop.f32.mrf.mxu0  ;;  %v297_v34 = vpop.f32.mrf.mxu1 }
  0xe7   :  { %v226_v35 = vadd.f32 %v290_v31, %v58_v28  ;;  %v234_v36 = vadd.f32 %v296_v32, %v68_v27 }
  0xe8   :  { %v292_v37 = vpop.f32.mrf.mxu0  ;;  %v298_v38 = vpop.f32.mrf.mxu1 }
  0xe9   :  { %v240_v39 = vmax.f32 %v226_v35, 0.0  ;;  %v242_v40 = vmax.f32 %v234_v36, 0.0  ;;  %v293_v41 = vadd.f32 %v292_v37, %v291_v33  ;;  %v299_v42 = vadd.f32 %v298_v38, %v297_v34 }
  0xeb   :  { %244 = vst [vmem:[%s449_s3] sm:$0xff] %v240_v39  ;;  %246 = vst [vmem:[%s449_s3 + $0x10] sm:$0xff] %v242_v40  ;;  %v229_v45 = vadd.f32 %v293_v41, %v63_v44  ;;  %v237_v46 = vadd.f32 %v299_v42, %v73_v43 }
  0xed   :  { %v241_v47 = vmax.f32 %v229_v45, 0.0  ;;  %v243_v48 = vmax.f32 %v237_v46, 0.0 }
  0xef   :  { %245 = vst [vmem:[%s449_s3 + $0x8] sm:$0xff] %v241_v47  ;;  %247 = vst [vmem:[%s449_s3 + $0x18] sm:$0xff] %v243_v48 }

// kernel: vqvae_forward.13
= control target key start
LH: loop header
LB: loop body
LE: loop exit
PB: predicated region body
PF: predicated region fallthrough
CT: control target
= control target key end

     0   :  { %v429_v1 = vmov 0   ;;  %vm221_vm0 = vcmask 261120   ;;  %s548_s1 = inlined_call_operand.vmem [shape: bf16[288,128], index: 1, kind: input, shape index: {}]   ;;  %s549_s0 = inlined_call_operand.vmem [shape: bf16[32,288], index: 0, kind: input, shape index: {}]   ;;  %s550_s2 = inlined_call_operand.vmem [shape: f32[32,1], index: 2, kind: input, shape index: {}]   ;;  %s551_s3 = inlined_call_operand.vmem [shape: f32[32,128], index: 3, kind: output, shape index: {}]  }
   0x1   :  { %v403_v0 = vld [vmem:[%s548_s1 + $0x78] sm:$0xff]   ;;  %401 = vset.pattern.permute.xlu0 %v429_v1  ;;  %402 = vset.pattern.permute.xlu1 %v429_v1  ;;  %v405_v3 = vld [vmem:[%s548_s1 + $0x70] sm:$0xff]   ;;  %v407_v5 = vld [vmem:[%s548_s1 + $0x68] sm:$0xff]  }
   0x2   :  { %v404_v2 = vld [vmem:[%s548_s1 + $0x38] sm:$0xff]   ;;  %360 = vmatprep.subr.bf16.mxu0 %v403_v0  ;;  %v406_v4 = vld [vmem:[%s548_s1 + $0x30] sm:$0xff]   ;;  %v408_v6 = vld [vmem:[%s548_s1 + $0x28] sm:$0xff]  }
   0x3   :  { %361 = vmatpush3.bf16.msra.mxu0 %v404_v2  ;;  %v409_v7 = vld [vmem:[%s548_s1 + $0x60] sm:$0xff]   ;;  %v411_v9 = vld [vmem:[%s548_s1 + $0x58] sm:$0xff]   ;;  %v418_v11 = vld [vmem:[%s548_s1 + $0x88] sm:$0xff]  }
   0x4   :  { %362 = vmatprep.subr.bf16.mxu0 %v405_v3  ;;  %v410_v8 = vld [vmem:[%s548_s1 + $0x20] sm:$0xff]   ;;  %v412_v10 = vld [vmem:[%s548_s1 + $0x18] sm:$0xff]   ;;  %v413_v12 = vld [vmem:[%s548_s1 + $0x50] sm:$0xff]   ;;  %392 = vmatprep.subr.bf16.mxu1 %v418_v11 }
   0x5   :  { %v414_v13 = vld [vmem:[%s548_s1 + $0x10] sm:$0xff]   ;;  %v415_v14 = vld [vmem:[%s548_s1 + $0x48] sm:$0xff]   ;;  %393 = vmatpush3.bf16.msra.mxu1 %v418_v11  ;;  %v423_v16 = vld [vmem:[%s548_s1 + $0x80] sm:$0xff]  }
   0x6   :  { %v422_v15 = vld [vmem:[%s549_s0 + $0x4] ss:$12 sps:$4 sm:$0xff]   ;;  %v424_v17 = vld [vmem:[%s549_s0 + $0x8] ss:$12 sps:$4 sm:$0xff]   ;;  %394 = vmatprep.subr.bf16.mxu1 %v423_v16  ;;  %v425_v18 = vld [vmem:[%s549_s0 + $0x20] ss:$12 sps:$4 sm:$0xff]  }
   0x7   :  { %363 = vmatpush3.bf16.msra.mxu0 %v406_v4  ;;  %260 = vmatprep.mubr.bf16.mxu0 %v422_v15  ;;  %v59_v19 = vld [vmem:[%s550_s2] sm:$0xff]  ;;  %v416_v20 = vld [vmem:[%s548_s1 + $0x8] sm:$0xff]   ;;  %v61_v21 = vld [vmem:[%s550_s2 + $0x10] sm:$0xff] }
   0x8   :  { %364 = vmatprep.subr.bf16.mxu0 %v407_v5  ;;  %396 = vmatprep.mubr.msk.bf16.mxu1 %vm221_vm0, %v424_v17  ;;  %v417_v22 = vld [vmem:[%s548_s1 + $0x40] sm:$0xff]   ;;  %v60_v23 = vld [vmem:[%s550_s2 + $0x8] sm:$0xff]  ;;  %v62_v24 = vld [vmem:[%s550_s2 + $0x18] sm:$0xff] }
   0x9   :  { %395 = vmatpush3.bf16.msra.mxu1 %v423_v16  ;;  %65 = vperm.xlu0 %401, %v59_v19   ;;  %v419_v25 = vld [vmem:[%s548_s1] sm:$0xff]   ;;  %v426_v27 = vld [vmem:[%s549_s0 + $0x1c] ss:$12 sps:$4 sm:$0xff]  }
   0xa   :  { %75 = vperm.xlu1 %402, %v61_v21   ;;  %v420_v26 = vld [vmem:[%s549_s0] ss:$12 sps:$4 sm:$0xff]   ;;  %v428_v28 = vld [vmem:[%s549_s0 + $0x18] ss:$12 sps:$4 sm:$0xff]  }
   0xb   :  { %365 = vmatpush3.bf16.msra.mxu0 %v408_v6 }
   0xc   :  { %366 = vmatprep.subr.bf16.mxu0 %v409_v7  ;;  %397 = vmatmul.mubr.msk.bf16.vlgmr.msra.gmra.mxu1 %vm221_vm0, %v425_v18 }
   0xd   :  { %70 = vperm.xlu0 %401, %v60_v23  }
   0xe   :  { %80 = vperm.xlu1 %402, %v62_v24  }
   0xf   :  { %367 = vmatpush3.bf16.msra.mxu0 %v410_v8 }
  0x10   :  { %368 = vmatprep.subr.bf16.mxu0 %v411_v9 }
  0x13   :  { %369 = vmatpush3.bf16.msra.mxu0 %v412_v10 }
  0x14   :  { %370 = vmatprep.subr.bf16.mxu0 %v413_v12 }
  0x17   :  { %371 = vmatpush3.bf16.msra.mxu0 %v414_v13 }
  0x18   :  { %372 = vmatprep.subr.bf16.mxu0 %v415_v14 }
  0x1b   :  { %373 = vmatpush3.bf16.msra.mxu0 %v416_v20 }
  0x1c   :  { %374 = vmatprep.subr.bf16.mxu0 %v417_v22 }
  0x1f   :  { %375 = vmatpush3.bf16.msra.mxu0 %v419_v25 }
  0x22   :  { %261 = vmatmul.mubr.bf16.vlgmr.msra.gmra.mxu0 %v420_v26 }
  0x23   :  { %268 = vmatprep.mubr.bf16.mxu0 %v426_v27 }
  0x2a   :  { %269 = vmatmul.mubr.bf16.gmra.mxu0 %v428_v28 }
  0x84   :  { %v66_v30 = vpop.permute.xlu0 %65 }
  0x85   :  { %v76_v45 = vpop.permute.xlu1 %75 }
  0x88   :  { %v71_v39 = vpop.permute.xlu0 %70 }
  0x89   :  { %v81_v54 = vpop.permute.xlu1 %80 }
  0xcc   :  { %v398_v29 = vpop.f32.mrf.mxu1 }
  0xce   :  { %v311_v32 = vpop.f32.mrf.mxu1 }
  0xd0   :  { %v399_v36 = vpop.f32.mrf.mxu1 }
  0xd2   :  { %v314_v43 = vpop.f32.mrf.mxu1 }
  0xe2   :  { %v376_v31 = vpop.f32.mrf.mxu0 }
  0xe4   :  { %v377_v33 = vpop.f32.mrf.mxu0 }
  0xe5   :  { %v378_v34 = vadd.f32 %v377_v33, %v376_v31 }
  0xe6   :  { %v379_v35 = vpop.f32.mrf.mxu0 }
  0xe7   :  { %v263_v37 = vadd.f32 %v378_v34, %v66_v30 }
  0xe8   :  { %v380_v38 = vpop.f32.mrf.mxu0 }
  0xe9   :  { %v381_v40 = vadd.f32 %v380_v38, %v379_v35  ;;  %v312_v41 = vadd.f32 %v311_v32, %v263_v37 }
  0xea   :  { %v382_v42 = vpop.f32.mrf.mxu0 }
  0xeb   :  { %326 = vst [vmem:[%s551_s3] sm:$0xff] %v312_v41  ;;  %v266_v44 = vadd.f32 %v381_v40, %v71_v39 }
  0xec   :  { %v383_v46 = vpop.f32.mrf.mxu0 }
  0xed   :  { %v384_v47 = vadd.f32 %v383_v46, %v382_v42  ;;  %v315_v48 = vadd.f32 %v314_v43, %v266_v44 }
  0xee   :  { %v385_v49 = vpop.f32.mrf.mxu0 }
  0xef   :  { %v271_v50 = vadd.f32 %v384_v47, %v76_v45  ;;  %327 = vst [vmem:[%s551_s3 + $0x8] sm:$0xff] %v315_v48 }
  0xf0   :  { %v386_v51 = vpop.f32.mrf.mxu0 }
  0xf1   :  { %v320_v52 = vadd.f32 %v398_v29, %v271_v50  ;;  %v387_v53 = vadd.f32 %v386_v51, %v385_v49 }
  0xf3   :  { %328 = vst [vmem:[%s551_s3 + $0x10] sm:$0xff] %v320_v52  ;;  %v274_v55 = vadd.f32 %v387_v53, %v81_v54 }
  0xf5   :  { %v323_v56 = vadd.f32 %v399_v36, %v274_v55 }
  0xf7   :  { %329 = vst [vmem:[%s551_s3 + $0x18] sm:$0xff] %v323_v56 }

// kernel: vqvae_forward.14
= control target key start
LH: loop header
LB: loop body
LE: loop exit
PB: predicated region body
PF: predicated region fallthrough
CT: control target
= control target key end

     0   :  { %v469_v3 = vmov 0.0   ;;  %vm470_vm0 = vmmov 0   ;;  %v471_v4 = vmov 0   ;;  %vm217_vm1 = vcmask 261120   ;;  %s685_s1 = inlined_call_operand.vmem [shape: bf16[288,128], index: 1, kind: input, shape index: {}]   ;;  %s686_s2 = inlined_call_operand.vmem [shape: bf16[16,288], index: 2, kind: input, shape index: {}]   ;;  %s687_s3 = inlined_call_operand.vmem [shape: bf16[32,16], index: 3, kind: input, shape index: {}]   ;;  %s688_s0 = inlined_call_operand.vmem [shape: f32[32,128], index: 0, kind: input, shape index: {}]   ;;  %s689_s4 = inlined_call_operand.vmem [shape: f32[32,128], index: 4, kind: output, shape index: {}]  }
   0x1   :  { %v48_v0 = vld [vmem:[%s685_s1 + $0x78] sm:$0xf]  ;;  %v49_v1 = vld [vmem:[%s685_s1 + $0x7c] sm:$0xf]  ;;  %446 = vmatprep.subr.bf16.mxu1 %v469_v3  ;;  %450 = vmatprep.mubr.msk.bf16.mxu1 %vm470_vm0, %v469_v3  ;;  %v46_v9 = vld [vmem:[%s685_s1 + $0x70] sm:$0xf] }
   0x2   :  { %v32_v2 = vld [vmem:[%s685_s1 + $0x38] sm:$0xf]  ;;  %v84_v5 = vmax.bf16 %v471_v4, %v48_v0  ;;  %v85_v6 = vmax.bf16 %v471_v4, %v49_v1  ;;  %v33_v7 = vld [vmem:[%s685_s1 + $0x3c] sm:$0xf]  ;;  %v47_v10 = vld [vmem:[%s685_s1 + $0x74] sm:$0xf]  ;;  %v82_v12 = vmax.bf16 %v471_v4, %v46_v9 }
   0x3   :  { %v68_v8 = vmax.bf16 %v471_v4, %v32_v2  ;;  %v69_v11 = vmax.bf16 %v471_v4, %v33_v7  ;;  %v83_v13 = vmax.bf16 %v471_v4, %v47_v10  ;;  %v30_v14 = vld [vmem:[%s685_s1 + $0x30] sm:$0xf]  ;;  %v31_v15 = vld [vmem:[%s685_s1 + $0x34] sm:$0xf]  ;;  %v44_v16 = vld [vmem:[%s685_s1 + $0x68] sm:$0xf] }
   0x4   :  { %v410_v17 = vcombine.low %v84_v5, %v85_v6  ;;  %v66_v18 = vmax.bf16 %v471_v4, %v30_v14  ;;  %v67_v19 = vmax.bf16 %v471_v4, %v31_v15  ;;  %v45_v20 = vld [vmem:[%s685_s1 + $0x6c] sm:$0xf]  ;;  %v80_v21 = vmax.bf16 %v471_v4, %v44_v16  ;;  %v28_v22 = vld [vmem:[%s685_s1 + $0x28] sm:$0xf]  ;;  %v42_v27 = vld [vmem:[%s685_s1 + $0x60] sm:$0xf] }
   0x5   :  { %v29_v23 = vld [vmem:[%s685_s1 + $0x2c] sm:$0xf]  ;;  %v402_v24 = vcombine.low %v68_v8, %v69_v11  ;;  %v409_v25 = vcombine.low %v82_v12, %v83_v13  ;;  %v81_v26 = vmax.bf16 %v471_v4, %v45_v20  ;;  %v43_v28 = vld [vmem:[%s685_s1 + $0x64] sm:$0xf]  ;;  %v64_v30 = vmax.bf16 %v471_v4, %v28_v22  ;;  %v26_v35 = vld [vmem:[%s685_s1 + $0x20] sm:$0xf] }
   0x6   :  { %418 = vmatprep.subr.bf16.mxu0 %v410_v17  ;;  %v401_v29 = vcombine.low %v66_v18, %v67_v19  ;;  %v65_v31 = vmax.bf16 %v471_v4, %v29_v23  ;;  %v78_v33 = vmax.bf16 %v471_v4, %v42_v27  ;;  %v79_v34 = vmax.bf16 %v471_v4, %v43_v28  ;;  %v27_v36 = vld [vmem:[%s685_s1 + $0x24] sm:$0xf]  ;;  %v40_v37 = vld [vmem:[%s685_s1 + $0x58] sm:$0xf]  ;;  %v41_v38 = vld [vmem:[%s685_s1 + $0x5c] sm:$0xf] }
   0x7   :  { %419 = vmatpush3.bf16.msra.mxu0 %v402_v24  ;;  %v408_v32 = vcombine.low %v80_v21, %v81_v26  ;;  %v52_v39 = vld [vmem:[%s685_s1 + $0x88] sm:$0xf]  ;;  %v53_v40 = vld [vmem:[%s685_s1 + $0x8c] sm:$0xf]  ;;  %v62_v43 = vmax.bf16 %v471_v4, %v26_v35  ;;  %v63_v44 = vmax.bf16 %v471_v4, %v27_v36  ;;  %v24_v45 = vld [vmem:[%s685_s1 + $0x18] sm:$0xf]  ;;  %v76_v50 = vmax.bf16 %v471_v4, %v40_v37 }
   0x8   :  { %420 = vmatprep.subr.bf16.mxu0 %v409_v25  ;;  %v88_v41 = vmax.bf16 %v471_v4, %v52_v39  ;;  %v400_v42 = vcombine.low %v64_v30, %v65_v31  ;;  %v89_v46 = vmax.bf16 %v471_v4, %v53_v40  ;;  %v50_v47 = vld [vmem:[%s685_s1 + $0x80] sm:$0xf]  ;;  %v51_v48 = vld [vmem:[%s685_s1 + $0x84] sm:$0xf]  ;;  %v407_v49 = vcombine.low %v78_v33, %v79_v34  ;;  %v25_v52 = vld [vmem:[%s685_s1 + $0x1c] sm:$0xf] }
   0x9   :  { %v77_v51 = vmax.bf16 %v471_v4, %v41_v38  ;;  %v38_v53 = vld [vmem:[%s685_s1 + $0x50] sm:$0xf]  ;;  %v39_v54 = vld [vmem:[%s685_s1 + $0x54] sm:$0xf]  ;;  %v86_v56 = vmax.bf16 %v471_v4, %v50_v47  ;;  %v87_v57 = vmax.bf16 %v471_v4, %v51_v48  ;;  %v60_v58 = vmax.bf16 %v471_v4, %v24_v45  ;;  %v36_v6 = vld [vmem:[%s685_s1 + $0x48] sm:$0xf] }
   0xa   :  { %v412_v55 = vcombine.low %v88_v41, %v89_v46  ;;  %v399_v59 = vcombine.low %v62_v43, %v63_v44  ;;  %v61_v60 = vmax.bf16 %v471_v4, %v25_v52  ;;  %v466_v62 = vld [vmem:[%s686_s2 + $0x4] ss:$12 sps:$4 sm:$0xff]   ;;  %v74_v0 = vmax.bf16 %v471_v4, %v38_v53  ;;  %v23_v5 = vld [vmem:[%s685_s1 + $0x14] sm:$0xf]  ;;  %v37_v7 = vld [vmem:[%s685_s1 + $0x4c] sm:$0xf] }
   0xb   :  { %421 = vmatpush3.bf16.msra.mxu0 %v401_v29  ;;  %v411_v61 = vcombine.low %v86_v56, %v87_v57  ;;  %v406_v63 = vcombine.low %v76_v50, %v77_v51  ;;  %v75_v1 = vmax.bf16 %v471_v4, %v39_v54  ;;  %v22_v2 = vld [vmem:[%s685_s1 + $0x10] sm:$0xf]  ;;  %253 = vmatprep.mubr.bf16.mxu0 %v466_v62  ;;  %v463_v8 = vld [vmem:[%s686_s2 + $0x8] ss:$12 sps:$4 sm:$0xff]   ;;  %v21_v15 = vld [vmem:[%s685_s1 + $0xc] sm:$0xf] }
   0xc   :  { %422 = vmatprep.subr.bf16.mxu0 %v408_v32  ;;  %447 = vmatpush3.bf16.msra.mxu1 %v412_v55  ;;  %v398_v9 = vcombine.low %v60_v58, %v61_v60  ;;  %v58_v10 = vmax.bf16 %v471_v4, %v22_v2  ;;  %v59_v11 = vmax.bf16 %v471_v4, %v23_v5  ;;  %v20_v14 = vld [vmem:[%s685_s1 + $0x8] sm:$0xf]  ;;  %v34_v16 = vld [vmem:[%s685_s1 + $0x40] sm:$0xf]  ;;  %v35_v17 = vld [vmem:[%s685_s1 + $0x44] sm:$0xf] }
   0xd   :  { %448 = vmatprep.subr.bf16.mxu1 %v469_v3  ;;  %v405_v3 = vcombine.low %v74_v0, %v75_v1  ;;  %v72_v12 = vmax.bf16 %v471_v4, %v36_v6  ;;  %v73_v13 = vmax.bf16 %v471_v4, %v37_v7  ;;  %v56_v19 = vmax.bf16 %v471_v4, %v20_v14  ;;  %v18_v24 = vld [vmem:[%s685_s1] sm:$0xf]  ;;  %v19_v25 = vld [vmem:[%s685_s1 + $0x4] sm:$0xf]  ;;  %v468_v47 = vld [vmem:[%s687_s3 + $0x8] sm:$0xff]  }
   0xe   :  { %v397_v18 = vcombine.low %v58_v10, %v59_v11  ;;  %v57_v20 = vmax.bf16 %v471_v4, %v21_v15  ;;  %v70_v22 = vmax.bf16 %v471_v4, %v34_v16  ;;  %v71_v23 = vmax.bf16 %v471_v4, %v35_v17  ;;  %v464_v31 = vld [vmem:[%s686_s2] ss:$12 sps:$4 sm:$0xff]   ;;  %v378_v48 = vld [vmem:[%s688_s0 + $0x10] sm:$0xff]  ;;  %v379_v53 = vld [vmem:[%s688_s0 + $0x18] sm:$0xff] }
   0xf   :  { %423 = vmatpush3.bf16.msra.mxu0 %v400_v42  ;;  %v404_v21 = vcombine.low %v72_v12, %v73_v13  ;;  %v54_v27 = vmax.bf16 %v471_v4, %v18_v24  ;;  %v55_v28 = vmax.bf16 %v471_v4, %v19_v25  ;;  %v467_v32 = vld [vmem:[%s687_s3] sm:$0xff]   ;;  %vm320_vm2 = vcmask 130048   ;;  %v377_v56 = vld [vmem:[%s688_s0 + $0x8] sm:$0xff] }
  0x10   :  { %424 = vmatprep.subr.bf16.mxu0 %v407_v49  ;;  %449 = vmatpush3.bf16.msra.mxu1 %v411_v61  ;;  %v396_v26 = vcombine.low %v56_v19, %v57_v20  ;;  %v403_v29 = vcombine.low %v70_v22, %v71_v23  ;;  %v376_v50 = vld [vmem:[%s688_s0] sm:$0xff] }
  0x11   :  { %v395_v30 = vcombine.low %v54_v27, %v55_v28 }
  0x13   :  { %425 = vmatpush3.bf16.msra.mxu0 %v399_v59  ;;  %451 = vmatmul.mubr.msk.bf16.vlgmr.msra.gmra.mxu1 %vm217_vm1, %v463_v8 }
  0x14   :  { %426 = vmatprep.subr.bf16.mxu0 %v406_v63  ;;  %456 = vmatprep.mubr.msk.bf16.mxu1 %vm320_vm2, %v467_v32 }
  0x17   :  { %427 = vmatpush3.bf16.msra.mxu0 %v398_v9 }
  0x18   :  { %428 = vmatprep.subr.bf16.mxu0 %v405_v3 }
  0x1b   :  { %429 = vmatpush3.bf16.msra.mxu0 %v397_v18 }
  0x1c   :  { %430 = vmatprep.subr.bf16.mxu0 %v404_v21 }
  0x1f   :  { %431 = vmatpush3.bf16.msra.mxu0 %v396_v26 }
  0x20   :  { %432 = vmatprep.subr.bf16.mxu0 %v403_v29 }
  0x23   :  { %433 = vmatpush3.bf16.msra.mxu0 %v395_v30 }
  0x26   :  { %254 = vmatmul.mubr.bf16.vlgmr.msra.gmra.mxu0 %v464_v31 }
  0xd3   :  { %v296_v33 = vpop.f32.mrf.mxu1 }
  0xd5   :  { %v452_v4 = vpop.f32.mrf.mxu1 }
  0xd7   :  { %v299_v34 = vpop.f32.mrf.mxu1 }
  0xd9   :  { %v453_v35 = vpop.f32.mrf.mxu1 }
  0xe6   :  { %v434_v36 = vpop.f32.mrf.mxu0 }
  0xe8   :  { %v435_v37 = vpop.f32.mrf.mxu0 }
  0xe9   :  { %v436_v38 = vadd.f32 %v435_v37, %v434_v36 }
  0xea   :  { %v437_v39 = vpop.f32.mrf.mxu0 }
  0xeb   :  { %v297_v41 = vadd.f32 %v436_v38, %v296_v33 }
  0xec   :  { %v438_v40 = vpop.f32.mrf.mxu0 }
  0xed   :  { %v439_v42 = vadd.f32 %v438_v40, %v437_v39  ;;  %v303_v44 = vmax.f32 %v297_v41, 0.0 }
  0xef   :  { %v300_v43 = vadd.f32 %v439_v42, %v299_v34 }
  0xf1   :  { %v304_v45 = vmax.f32 %v300_v43, 0.0 }
  0xf3   :  { %v305_v46 = vpack.c.bf16 %v304_v45, %v303_v44 }
  0xf5   :  { %454 = vmatprep.subr.bf16.mxu1 %v305_v46 }
  0xf6   :  { %455 = vmatpush3.bf16.msra.mxu1 %v305_v46 }
  0xf9   :  { %457 = vmatmul.mubr.msk.bf16.vlgmr.msra.gmra.mxu1 %vm320_vm2, %v468_v47 }
 0x1b9   :  { %v458_v49 = vpop.f32.mrf.mxu1 }
 0x1ba   :  { %v382_v51 = vadd.f32 %v458_v49, %v378_v48 }
 0x1bb   :  { %v361_v52 = vpop.f32.mrf.mxu1 }
 0x1bc   :  { %386 = vst [vmem:[%s689_s4 + $0x10] sm:$0xff] %v382_v51  ;;  %v380_v54 = vadd.f32 %v376_v50, %v361_v52 }
 0x1bd   :  { %v459_v55 = vpop.f32.mrf.mxu1 }
 0x1be   :  { %384 = vst [vmem:[%s689_s4] sm:$0xff] %v380_v54  ;;  %v383_v57 = vadd.f32 %v459_v55, %v379_v53 }
 0x1bf   :  { %v364_v58 = vpop.f32.mrf.mxu1 }
 0x1c0   :  { %387 = vst [vmem:[%s689_s4 + $0x18] sm:$0xff] %v383_v57  ;;  %v381_v59 = vadd.f32 %v377_v56, %v364_v58 }
 0x1c2   :  { %385 = vst [vmem:[%s689_s4 + $0x8] sm:$0xff] %v381_v59 }

// kernel: vqvae_forward.16
= control target key start
LH: loop header
LB: loop body
LE: loop exit
PB: predicated region body
PF: predicated region fallthrough
CT: control target
= control target key end

     0   :  { %14 = vsyncpa [#allocation5], 0  ;;  %vm73_vm0 = vcmask 261120   ;;  %v1289_v6 = vmov 0   ;;  %s1874_s0 = inlined_call_operand.vmem [shape: f32[32,128], index: 0, kind: input, shape index: {}]   ;;  %s1875_s1 = inlined_call_operand.vmem [shape: f32[16,32], index: 1, kind: input, shape index: {}]   ;;  %s1876_s2 = inlined_call_operand.vmem [shape: f32[16,1], index: 2, kind: input, shape index: {}]   ;;  %s1877_s3 = inlined_call_operand.vmem [shape: f32[128,16], index: 3, kind: input, shape index: {}]   ;;  %s1878_s4 = inlined_call_operand.vmem [shape: f32[16,128], index: 4, kind: input, shape index: {}]   ;;  %s1879_s5 = inlined_call_operand.vmem [shape: f32[128,1], index: 5, kind: input, shape index: {}]   ;;  %s1880_s6 = inlined_call_operand.vmem [shape: f32[16,128], index: 6, kind: output, shape index: {0}]   ;;  %s1881_s7 = inlined_call_operand.hbm [shape: f32[1,1], index: 7, kind: output, shape index: {1}]   ;;  %s1882_s8 = inlined_call_operand.hbm [shape: f32[1,1], index: 8, kind: output, shape index: {2}]  }
   0x1   :  { %v54_v0 = vld [vmem:[%s1874_s0 + $0x18] sm:$0xff]  ;;  %v53_v1 = vld [vmem:[%s1874_s0 + $0x10] sm:$0xff]  ;;  %v52_v2 = vld [vmem:[%s1874_s0 + $0x8] sm:$0xff]  ;;  %1209 = vset.pattern.permute.xlu0 %v1289_v6  ;;  %1210 = vset.pattern.permute.xlu1 %v1289_v6 }
   0x2   :  { %v58_v3 = vmax.f32 %v54_v0, 0.0  ;;  %v57_v4 = vmax.f32 %v53_v1, 0.0  ;;  %v59_v5 = vld [vmem:[%s1875_s1] sm:$0xff]  ;;  %v62_v8 = vld [vmem:[%s1876_s2 + $0x8] sm:$0xff]  ;;  %v56_v9 = vmax.f32 %v52_v2, 0.0  ;;  %v174_v15 = vld [vmem:[%s1879_s5 + $0x10] sm:$0xff] }
   0x3   :  { %v51_v7 = vld [vmem:[%s1874_s0] sm:$0xff]  ;;  %1139 = vmatprep.mubr.msk.f32.mxu0 %vm73_vm0, %v59_v5  ;;  %70 = vperm.xlu0 %1209, %v62_v8   ;;  %v173_v13 = vld [vmem:[%s1879_s5 + $0x8] sm:$0xff] }
   0x4   :  { %1131 = vmatprep.subr.mxu0 %v58_v3  ;;  %v61_v10 = vld [vmem:[%s1876_s2] sm:$0xff]  ;;  %v55_v12 = vmax.f32 %v51_v7, 0.0  ;;  %v60_v14 = vld [vmem:[%s1875_s1 + $0x8] sm:$0xff] }
   0x5   :  { %1132 = vmatpush3.msra.mxu0 %v58_v3  ;;  %v172_v11 = vld [vmem:[%s1879_s5] sm:$0xff] }
   0x6   :  { %1133 = vmatprep.subr.mxu0 %v57_v4  ;;  %190 = vperm.xlu1 %1210, %v172_v11  }
   0x7   :  { %1134 = vmatpush3.msra.mxu0 %v57_v4  ;;  %65 = vperm.xlu0 %1209, %v61_v10  }
   0x8   :  { %1135 = vmatprep.subr.mxu0 %v56_v9 }
   0x9   :  { %1136 = vmatpush3.msra.mxu0 %v56_v9 }
   0xa   :  { %15 = vsyncpa [#allocation7], 0  ;;  %1137 = vmatprep.subr.mxu0 %v55_v12  ;;  %195 = vperm.xlu1 %1210, %v173_v13   ;;  %v175_v16 = vld [vmem:[%s1879_s5 + $0x18] sm:$0xff]  ;;  %v176_v17 = vld [vmem:[%s1879_s5 + $0x20] sm:$0xff]  ;;  %vm300_vm1 = vcmask 130048   ;;  %vm34_vm2 = vcmask 7168  }
   0xb   :  { %1138 = vmatpush3.msra.mxu0 %v55_v12  ;;  %200 = vperm.xlu0 %1209, %v174_v15   ;;  %v177_v18 = vld [vmem:[%s1879_s5 + $0x28] sm:$0xff]  ;;  %v178_v19 = vld [vmem:[%s1879_s5 + $0x30] sm:$0xff]  ;;  %v179_v20 = vld [vmem:[%s1879_s5 + $0x38] sm:$0xff]  ;;  %v1290_v61 = vmov 0.0   ;;  %s1291_s14 = smov [#allocation6]  }
   0xc   :  { %1140 = vmatmul.mubr.msk.f32.vlgmr.msra.gmra.mxu0 %vm73_vm0, %v60_v14  ;;  %v180_v21 = vld [vmem:[%s1879_s5 + $0x40] sm:$0xff]  ;;  %v181_v22 = vld [vmem:[%s1879_s5 + $0x48] sm:$0xff]  ;;  %v182_v23 = vld [vmem:[%s1879_s5 + $0x50] sm:$0xff]  ;;  %36 = vst.msk [vmem:[#allocation3 + $0x8] sm:$0xff] %vm34_vm2, %v1290_v61  ;;  %s1040_s15 = sshll.u32 %s1291_s14, 4  ;;  %s1041_s15 = int_to_ptr.vmem [resolvable:$true] %s1040_s15 }
   0xd   :  { %v183_v24 = vld [vmem:[%s1879_s5 + $0x58] sm:$0xff]  ;;  %v184_v25 = vld [vmem:[%s1879_s5 + $0x60] sm:$0xff]  ;;  %v185_v26 = vld [vmem:[%s1879_s5 + $0x68] sm:$0xff]  ;;  %35 = vst.msk [vmem:[#allocation3] sm:$0xff] %vm34_vm2, %v1290_v61  ;;  %s1249_s16 = scalar_lea.vmem %s1041_s15, 32  ;;  %p1250_p1 = scmp.lt.s32.totalorder %s1041_s15, %s1041_s15 }
   0xe   :  { %205 = vperm.xlu1 %1210, %v175_v16   ;;  %v186_v27 = vld [vmem:[%s1879_s5 + $0x70] sm:$0xff]  ;;  %v187_v28 = vld [vmem:[%s1879_s5 + $0x78] sm:$0xff]  ;;  %v284_v29 = vld [vmem:[%s1877_s3] sm:$0xff]  ;;  %37 = vst.msk [vmem:[#allocation3 + $0x10] sm:$0xff] %vm34_vm2, %v1290_v61 }
   0xf   :  { %210 = vperm.xlu0 %1209, %v176_v17   ;;  %1146 = vmatprep.mubr.msk.f32.mxu1 %vm300_vm1, %v284_v29  ;;  %v285_v36 = vld [vmem:[%s1877_s3 + $0x8] sm:$0xff]  ;;  %v286_v37 = vld [vmem:[%s1877_s3 + $0x10] sm:$0xff]  ;;  %v287_v38 = vld [vmem:[%s1877_s3 + $0x18] sm:$0xff]  ;;  %38 = vst.msk [vmem:[#allocation3 + $0x18] sm:$0xff] %vm34_vm2, %v1290_v61 }
  0x10   :  { %v288_v39 = vld [vmem:[%s1877_s3 + $0x20] sm:$0xff]  ;;  %v289_v40 = vld [vmem:[%s1877_s3 + $0x28] sm:$0xff]  ;;  %v290_v41 = vld [vmem:[%s1877_s3 + $0x30] sm:$0xff]  ;;  %39 = vst.msk [vmem:[#allocation3 + $0x20] sm:$0xff] %vm34_vm2, %v1290_v61 }
  0x11   :  { %v291_v42 = vld [vmem:[%s1877_s3 + $0x38] sm:$0xff]  ;;  %v292_v43 = vld [vmem:[%s1877_s3 + $0x40] sm:$0xff]  ;;  %v293_v44 = vld [vmem:[%s1877_s3 + $0x48] sm:$0xff]  ;;  %40 = vst.msk [vmem:[#allocation3 + $0x28] sm:$0xff] %vm34_vm2, %v1290_v61 }
  0x12   :  { %215 = vperm.xlu1 %1210, %v177_v18   ;;  %v294_v45 = vld [vmem:[%s1877_s3 + $0x50] sm:$0xff]  ;;  %v295_v46 = vld [vmem:[%s1877_s3 + $0x58] sm:$0xff]  ;;  %v296_v47 = vld [vmem:[%s1877_s3 + $0x60] sm:$0xff]  ;;  %41 = vst.msk [vmem:[#allocation3 + $0x30] sm:$0xff] %vm34_vm2, %v1290_v61 }
  0x13   :  { %220 = vperm.xlu0 %1209, %v178_v19   ;;  %v297_v48 = vld [vmem:[%s1877_s3 + $0x68] sm:$0xff]  ;;  %v298_v49 = vld [vmem:[%s1877_s3 + $0x70] sm:$0xff]  ;;  %v299_v50 = vld [vmem:[%s1877_s3 + $0x78] sm:$0xff]  ;;  %42 = vst.msk [vmem:[#allocation3 + $0x38] sm:$0xff] %vm34_vm2, %v1290_v61 }
  0x14   :  { %v697_v58 = vld [vmem:[%s1878_s4] sm:$0xff]  ;;  %43 = vst.msk [vmem:[#allocation3 + $0x40] sm:$0xff] %vm34_vm2, %v1290_v61  ;;  %44 = vst.msk [vmem:[#allocation3 + $0x48] sm:$0xff] %vm34_vm2, %v1290_v61 }
  0x15   :  { %45 = vst.msk [vmem:[#allocation3 + $0x50] sm:$0xff] %vm34_vm2, %v1290_v61  ;;  %46 = vst.msk [vmem:[#allocation3 + $0x58] sm:$0xff] %vm34_vm2, %v1290_v61 }
  0x16   :  { %225 = vperm.xlu1 %1210, %v179_v20   ;;  %47 = vst.msk [vmem:[#allocation3 + $0x60] sm:$0xff] %vm34_vm2, %v1290_v61  ;;  %48 = vst.msk [vmem:[#allocation3 + $0x68] sm:$0xff] %vm34_vm2, %v1290_v61 }
  0x17   :  { %230 = vperm.xlu0 %1209, %v180_v21   ;;  %49 = vst.msk [vmem:[#allocation3 + $0x70] sm:$0xff] %vm34_vm2, %v1290_v61  ;;  %50 = vst.msk [vmem:[#allocation3 + $0x78] sm:$0xff] %vm34_vm2, %v1290_v61 }
  0x1a   :  { %235 = vperm.xlu1 %1210, %v181_v22  }
  0x1b   :  { %240 = vperm.xlu0 %1209, %v182_v23  }
  0x1e   :  { %245 = vperm.xlu1 %1210, %v183_v24  }
  0x1f   :  { %250 = vperm.xlu0 %1209, %v184_v25  }
  0x22   :  { %255 = vperm.xlu1 %1210, %v185_v26  }
  0x23   :  { %260 = vperm.xlu0 %1209, %v186_v27  }
  0x26   :  { %265 = vperm.xlu1 %1210, %v187_v28  }
  0x7e   :  { %v71_v30 = vpop.permute.xlu0 %70 }
  0x81   :  { %v191_v51 = vpop.permute.xlu1 %190 }
  0x82   :  { %v66_v33 = vpop.permute.xlu0 %65 }
  0x85   :  { %v196_v52 = vpop.permute.xlu1 %195 }
  0x86   :  { %v201_v59 = vpop.permute.xlu0 %200 }
  0x89   :  { %v206_v53 = vpop.permute.xlu1 %205 }
  0x8a   :  { %v211_v63 = vpop.permute.xlu0 %210 }
  0x8d   :  { %v216_v54 = vpop.permute.xlu1 %215 }
  0x8e   :  { %v221_v6 = vpop.permute.xlu0 %220 }
  0x91   :  { %v226_v60 = vpop.permute.xlu1 %225 }
  0x92   :  { %v231_v12 = vpop.permute.xlu0 %230 }
  0x95   :  { %v236_v1 = vpop.permute.xlu1 %235 }
  0x96   :  { %v241_v19 = vpop.permute.xlu0 %240 }
  0x99   :  { %v246_v7 = vpop.permute.xlu1 %245 }
  0x9d   :  { %v256_v14 = vpop.permute.xlu1 %255 }
  0xa1   :  { %v266_v20 = vpop.permute.xlu1 %265 }
  0xcc   :  { %v1141_v31 = vpop.f32.mrf.mxu0 }
  0xcd   :  { %v1416_v32 = vadd.f32 %v1141_v31, %v71_v30 }
  0xce   :  { %v146_v34 = vpop.f32.mrf.mxu0 }
  0xcf   :  { %v1418_v35 = vadd.f32 %v146_v34, %v66_v33  ;;  %1142 = vmatprep.subr.mxu1 %v1416_v32  ;;  %v164_v56 = vmul.f32 %v1416_v32, %v1416_v32 }
  0xd0   :  { %1143 = vmatpush3.msra.mxu1 %v1416_v32 }
  0xd1   :  { %1144 = vmatprep.subr.mxu1 %v1418_v35  ;;  %v163_v55 = vmul.f32 %v1418_v35, %v1418_v35 }
  0xd2   :  { %1145 = vmatpush3.msra.mxu1 %v1418_v35 }
  0xd3   :  { %1147 = vmatmul.mubr.msk.f32.vlgmr.msra.gmra.mxu1 %vm300_vm1, %v285_v36  ;;  %v165_v57 = vadd.f32 %v164_v56, %v163_v55 }
  0xd4   :  { %1149 = vmatprep.mubr.msk.f32.mxu1 %vm300_vm1, %v286_v37 }
  0xd5   :  { %v166_v62 = vrot.slane %v165_v57, 4 }
  0xd7   :  { %1150 = vmatmul.mubr.msk.f32.gmra.mxu1 %vm300_vm1, %v287_v38  ;;  %v167_v0 = vadd.f32 %v166_v62, %v165_v57 }
  0xd8   :  { %1152 = vmatprep.mubr.msk.f32.mxu1 %vm300_vm1, %v288_v39 }
  0xd9   :  { %v168_v4 = vrot.slane %v167_v0, 2 }
  0xdb   :  { %1153 = vmatmul.mubr.msk.f32.gmra.mxu1 %vm300_vm1, %v289_v40  ;;  %v169_v9 = vadd.f32 %v168_v4, %v167_v0 }
  0xdc   :  { %1155 = vmatprep.mubr.msk.f32.mxu1 %vm300_vm1, %v290_v41 }
  0xdd   :  { %v170_v13 = vrot.slane %v169_v9, 1 }
  0xdf   :  { %1156 = vmatmul.mubr.msk.f32.gmra.mxu1 %vm300_vm1, %v291_v42  ;;  %v171_v17 = vadd.f32 %v170_v13, %v169_v9  ;;  %v251_v42 = vpop.permute.xlu0 %250 }
  0xe0   :  { %1158 = vmatprep.mubr.msk.f32.mxu1 %vm300_vm1, %v292_v43 }
  0xe1   :  { %v275_v22 = vadd.f32 %v226_v60, %v171_v17  ;;  %v277_v23 = vadd.f32 %v236_v1, %v171_v17  ;;  %v279_v24 = vadd.f32 %v246_v7, %v171_v17  ;;  %v281_v25 = vadd.f32 %v256_v14, %v171_v17 }
  0xe2   :  { %v283_v26 = vadd.f32 %v266_v20, %v171_v17  ;;  %v269_v27 = vadd.f32 %v196_v52, %v171_v17  ;;  %v268_v28 = vadd.f32 %v191_v51, %v171_v17  ;;  %v271_v31 = vadd.f32 %v206_v53, %v171_v17 }
  0xe3   :  { %1159 = vmatmul.mubr.msk.f32.gmra.mxu1 %vm300_vm1, %v293_v44  ;;  %v270_v33 = vadd.f32 %v201_v59, %v171_v17  ;;  %v273_v34 = vadd.f32 %v216_v54, %v171_v17  ;;  %v272_v36 = vadd.f32 %v211_v63, %v171_v17  ;;  %v274_v44 = vadd.f32 %v221_v6, %v171_v17  ;;  %v261_v7 = vpop.permute.xlu0 %260 }
  0xe4   :  { %1161 = vmatprep.mubr.msk.f32.mxu1 %vm300_vm1, %v294_v45  ;;  %v276_v45 = vadd.f32 %v231_v12, %v171_v17  ;;  %v278_v53 = vadd.f32 %v241_v19, %v171_v17  ;;  %v280_v55 = vadd.f32 %v251_v42, %v171_v17 }
  0xe7   :  { %1162 = vmatmul.mubr.msk.f32.gmra.mxu1 %vm300_vm1, %v295_v46 }
  0xe8   :  { %1164 = vmatprep.mubr.msk.f32.mxu1 %vm300_vm1, %v296_v47 }
  0xeb   :  { %1165 = vmatmul.mubr.msk.f32.gmra.mxu1 %vm300_vm1, %v297_v48 }
  0xec   :  { %1167 = vmatprep.mubr.msk.f32.mxu1 %vm300_vm1, %v298_v49 }
  0xef   :  { %1168 = vmatmul.mubr.msk.f32.gmra.mxu1 %vm300_vm1, %v299_v50 }
  0xf0   :  { %1202 = vmatprep.mubr.f32.mxu1 %v697_v58 }
 0x193   :  { %v1148_v2 = vpop.f32.mrf.mxu1 }
 0x194   :  { %v495_v43 = vmul.f32 2.0, %v1148_v2 }
 0x195   :  { %v415_v3 = vpop.f32.mrf.mxu1 }
 0x196   :  { %v494_v37 = vmul.f32 2.0, %v415_v3  ;;  %v1533_v62 = vsub.f32 %v269_v27, %v495_v43 }
 0x197   :  { %v1151_v5 = vpop.f32.mrf.mxu1 }
 0x198   :  { %v497_v47 = vmul.f32 2.0, %v1151_v5  ;;  %v1525_v56 = vsub.f32 %v268_v28, %v494_v37 }
 0x199   :  { %v425_v8 = vpop.f32.mrf.mxu1 }
 0x19a   :  { %v496_v48 = vmul.f32 2.0, %v425_v8  ;;  %v1537_v2 = vsub.f32 %v271_v31, %v497_v47 }
 0x19b   :  { %v1154_v10 = vpop.f32.mrf.mxu1 }
 0x19c   :  { %v499_v38 = vmul.f32 2.0, %v1154_v10  ;;  %v1539_v3 = vsub.f32 %v270_v33, %v496_v48 }
 0x19d   :  { %v435_v11 = vpop.f32.mrf.mxu1 }
 0x19e   :  { %v498_v29 = vmul.f32 2.0, %v435_v11  ;;  %v1527_v57 = vsub.f32 %v273_v34, %v499_v38 }
 0x19f   :  { %v1157_v15 = vpop.f32.mrf.mxu1 }
 0x1a0   :  { %v501_v39 = vmul.f32 2.0, %v1157_v15  ;;  %v1523_v49 = vsub.f32 %v272_v36, %v498_v29  ;;  %v527_v12 = vmin.f32 %v1533_v62, %v1527_v57  ;;  %v282_v15 = vadd.f32 %v261_v7, %v171_v17 }
 0x1a1   :  { %v445_v16 = vpop.f32.mrf.mxu1 }
 0x1a2   :  { %v500_v40 = vmul.f32 2.0, %v445_v16  ;;  %v1529_v58 = vsub.f32 %v275_v22, %v501_v39  ;;  %v526_v4 = vmin.f32 %v1525_v56, %v1523_v49 }
 0x1a3   :  { %v1160_v18 = vpop.f32.mrf.mxu1 }
 0x1a4   :  { %v503_v50 = vmul.f32 2.0, %v1160_v18  ;;  %v1531_v59 = vsub.f32 %v274_v44, %v500_v40  ;;  %v529_v13 = vmin.f32 %v1537_v2, %v1529_v58 }
 0x1a5   :  { %v455_v21 = vpop.f32.mrf.mxu1 }
 0x1a6   :  { %v502_v46 = vmul.f32 2.0, %v455_v21  ;;  %v1543_v5 = vsub.f32 %v277_v23, %v503_v50  ;;  %v528_v14 = vmin.f32 %v1539_v3, %v1531_v59 }
 0x1a7   :  { %v1163_v30 = vpop.f32.mrf.mxu1 }
 0x1a8   :  { %v505_v52 = vmul.f32 2.0, %v1163_v30  ;;  %v1535_v63 = vsub.f32 %v276_v45, %v502_v46  ;;  %v531_v22 = vmin.f32 %v527_v12, %v1543_v5 }
 0x1a9   :  { %v465_v41 = vpop.f32.mrf.mxu1 }
 0x1aa   :  { %v504_v54 = vmul.f32 2.0, %v465_v41  ;;  %v1545_v8 = vsub.f32 %v279_v24, %v505_v52  ;;  %v530_v18 = vmin.f32 %v526_v4, %v1535_v63 }
 0x1ab   :  { %v1166_v51 = vpop.f32.mrf.mxu1 }
 0x1ac   :  { %v507_v0 = vmul.f32 2.0, %v1166_v51  ;;  %v1547_v9 = vsub.f32 %v278_v53, %v504_v54  ;;  %v533_v23 = vmin.f32 %v529_v13, %v1545_v8 }
 0x1ad   :  { %v475_v60 = vpop.f32.mrf.mxu1 }
 0x1ae   :  { %v506_v1 = vmul.f32 2.0, %v475_v60  ;;  %v1558_v19 = vsub.f32 %v281_v25, %v507_v0  ;;  %v532_v24 = vmin.f32 %v528_v14, %v1547_v9 }
 0x1af   :  { %v1169_v6 = vpop.f32.mrf.mxu1 }
 0x1b0   :  { %v1549_v10 = vsub.f32 %v280_v55, %v506_v1  ;;  %v509_v11 = vmul.f32 2.0, %v1169_v6  ;;  %v535_v17 = vmin.f32 %v531_v22, %v1558_v19 }
 0x1b1   :  { %v485_v16 = vpop.f32.mrf.mxu1 }
 0x1b2   :  { %v1560_v20 = vsub.f32 %v283_v26, %v509_v11  ;;  %v508_v21 = vmul.f32 2.0, %v485_v16  ;;  %v534_v27 = vmin.f32 %v530_v18, %v1549_v10  ;;  %v155_v26 = vlaneseq }
 0x1b4   :  { %v1566_v28 = vsub.f32 %v282_v15, %v508_v21  ;;  %v537_v29 = vmin.f32 %v533_v23, %v1560_v20  ;;  %v538_v30 = vmin.f32 %v534_v27, %v535_v17  ;;  %v1572_v36 = vshrl.u32 %v155_v26, 7 }
 0x1b6   :  { %v536_v25 = vmin.f32 %v532_v24, %v1566_v28  ;;  %v1575_v39 = vadd.s32 16, %v1572_v36  ;;  %v1578_v40 = vadd.s32 48, %v1572_v36  ;;  %v1581_v41 = vadd.s32 80, %v1572_v36 }
 0x1b7   :  { %v1584_v42 = vadd.s32 112, %v1572_v36  ;;  %v1587_v44 = vadd.s32 8, %v1572_v36  ;;  %v1590_v45 = vadd.s32 24, %v1572_v36  ;;  %v1593_v46 = vadd.s32 32, %v1572_v36 }
 0x1b8   :  { %v539_v31 = vmin.f32 %v536_v25, %v537_v29  ;;  %v1596_v47 = vadd.s32 40, %v1572_v36  ;;  %v566_v50 = vcvt.s32.f32 %v1575_v39  ;;  %v570_v51 = vcvt.s32.f32 %v1578_v40 }
 0x1b9   :  { %v574_v52 = vcvt.s32.f32 %v1581_v41  ;;  %v578_v53 = vcvt.s32.f32 %v1584_v42  ;;  %v1603_v54 = vadd.s32 56, %v1572_v36  ;;  %v1606_v55 = vadd.s32 64, %v1572_v36 }
 0x1ba   :  { %v540_v33 = vmin.f32 %v538_v30, %v539_v31  ;;  %v1609_v60 = vadd.s32 72, %v1572_v36  ;;  %v1612_v1 = vadd.s32 88, %v1572_v36  ;;  %v1615_v4 = vadd.s32 96, %v1572_v36 }
 0x1bb   :  { %v1618_v6 = vadd.s32 104, %v1572_v36  ;;  %v1621_v7 = vadd.s32 120, %v1572_v36  ;;  %v564_v11 = vcvt.s32.f32 %v1572_v36  ;;  %v565_v12 = vcvt.s32.f32 %v1587_v44 }
 0x1bc   :  { %v541_v34 = vrot.slane %v540_v33, 4  ;;  %v567_v13 = vcvt.s32.f32 %v1590_v45  ;;  %v568_v14 = vcvt.s32.f32 %v1593_v46  ;;  %v569_v15 = vcvt.s32.f32 %v1596_v47 }
 0x1bd   :  { %v571_v21 = vcvt.s32.f32 %v1603_v54  ;;  %v572_v22 = vcvt.s32.f32 %v1606_v55  ;;  %v576_v24 = vcvt.s32.f32 %v1615_v4  ;;  %v577_v27 = vcvt.s32.f32 %v1618_v6 }
 0x1be   :  { %v542_v37 = vmin.f32 %v540_v33, %v541_v34  ;;  %v579_v17 = vcvt.s32.f32 %v1621_v7 }
 0x1c0   :  { %v543_v38 = vrot.slane %v542_v37, 2 }
 0x1c2   :  { %v544_v43 = vmin.f32 %v542_v37, %v543_v38 }
 0x1c4   :  { %v545_v48 = vrot.slane %v544_v43, 1 }
 0x1c6   :  { %v546_v0 = vmin.f32 %v544_v43, %v545_v48 }
 0x1c8   :  { %vm582_vm3 = vcmp.le.f32.partialorder %v1539_v3, %v546_v0  ;;  %vm586_vm4 = vcmp.le.f32.partialorder %v1531_v59, %v546_v0  ;;  %vm590_vm5 = vcmp.le.f32.partialorder %v1547_v9, %v546_v0  ;;  %v573_v3 = vcvt.s32.f32 %v1609_v60 }
 0x1c9   :  { %v598_v16 = vsel %vm582_vm3, %v566_v50, 128.0  ;;  %v602_v18 = vsel %vm586_vm4, %v570_v51, 128.0  ;;  %vm580_vm6 = vcmp.le.f32.partialorder %v1525_v56, %v546_v0  ;;  %vm581_vm7 = vcmp.le.f32.partialorder %v1533_v62, %v546_v0 }
 0x1ca   :  { %v614_v23 = vmin.f32 %v598_v16, %v602_v18  ;;  %vm583_vm8 = vcmp.le.f32.partialorder %v1537_v2, %v546_v0  ;;  %vm584_vm9 = vcmp.le.f32.partialorder %v1523_v49, %v546_v0  ;;  %vm585_vm10 = vcmp.le.f32.partialorder %v1527_v57, %v546_v0 }
 0x1cb   :  { %v575_v59 = vcvt.s32.f32 %v1612_v1  ;;  %vm587_vm11 = vcmp.le.f32.partialorder %v1529_v58, %v546_v0  ;;  %vm594_vm12 = vcmp.le.f32.partialorder %v1566_v28, %v546_v0  ;;  %v606_v56 = vsel %vm590_vm5, %v574_v52, 128.0 }
 0x1cc   :  { %vm588_vm13 = vcmp.le.f32.partialorder %v1535_v63, %v546_v0  ;;  %v596_v49 = vsel %vm580_vm6, %v564_v11, 128.0  ;;  %v597_v57 = vsel %vm581_vm7, %v565_v12, 128.0  ;;  %v599_v62 = vsel %vm583_vm8, %v567_v13, 128.0 }
 0x1cd   :  { %v600_v2 = vsel %vm584_vm9, %v568_v14, 128.0  ;;  %v601_v58 = vsel %vm585_vm10, %v569_v15, 128.0  ;;  %v618_v9 = vmin.f32 %v614_v23, %v606_v56  ;;  %vm589_vm14 = vcmp.le.f32.partialorder %v1543_v5, %v546_v0 }
 0x1ce   :  { %vm591_vm15 = vcmp.le.f32.partialorder %v1545_v8, %v546_v0  ;;  %v603_v63 = vsel %vm587_vm11, %v571_v21, 128.0  ;;  %vm592_vm0 = vcmp.le.f32.partialorder %v1549_v10, %v546_v0  ;;  %vm593_vm1 = vcmp.le.f32.partialorder %v1558_v19, %v546_v0 }
 0x1cf   :  { %v612_v29 = vmin.f32 %v596_v49, %v600_v2  ;;  %vm595_vm3 = vcmp.le.f32.partialorder %v1560_v20, %v546_v0  ;;  %v604_v25 = vsel %vm588_vm13, %v572_v22, 128.0  ;;  %v613_v30 = vmin.f32 %v597_v57, %v601_v58 }
 0x1d0   :  { %v615_v31 = vmin.f32 %v599_v62, %v603_v63  ;;  %v610_v5 = vsel %vm594_vm12, %v578_v53, 128.0  ;;  %v605_v8 = vsel %vm589_vm14, %v573_v3, 128.0  ;;  %v607_v10 = vsel %vm591_vm15, %v575_v59, 128.0 }
 0x1d1   :  { %v616_v19 = vmin.f32 %v612_v29, %v604_v25  ;;  %v622_v33 = vmin.f32 %v618_v9, %v610_v5  ;;  %v608_v34 = vsel %vm592_vm0, %v576_v24, 128.0  ;;  %v617_v20 = vmin.f32 %v613_v30, %v605_v8  ;;  %v795_v25 = vld [vmem:[#allocation3] sm:$0xff] }
 0x1d2   :  { %v619_v37 = vmin.f32 %v615_v31, %v607_v10  ;;  %v609_v38 = vsel %vm593_vm1, %v577_v27, 128.0  ;;  %v611_v43 = vsel %vm595_vm3, %v579_v17, 128.0  ;;  %v156_v23 = vand.u32 127, %v155_v26  ;;  %v799_v10 = vld [vmem:[#allocation3 + $0x20] sm:$0xff] }
 0x1d3   :  { %v620_v48 = vmin.f32 %v616_v19, %v608_v34  ;;  %v621_v4 = vmin.f32 %v617_v20, %v609_v38  ;;  %v797_v19 = vld [vmem:[#allocation3 + $0x10] sm:$0xff] }
 0x1d4   :  { %v623_v6 = vmin.f32 %v619_v37, %v611_v43  ;;  %vm160_vm4 = vcmp.lt.s32.totalorder %v156_v23, 32  ;;  %v801_v38 = vld [vmem:[#allocation3 + $0x30] sm:$0xff] }
 0x1d5   :  { %v624_v7 = vmin.f32 %v620_v48, %v621_v4  ;;  %v1681_v2 = vsel %vm160_vm4, 1.0, %v1290_v61 }
 0x1d6   :  { %v625_v16 = vmin.f32 %v622_v33, %v623_v6 }
 0x1d8   :  { %v626_v28 = vmin.f32 %v624_v7, %v625_v16  ;;  %v803_v16 = vld [vmem:[#allocation3 + $0x40] sm:$0xff] }
 0x1da   :  { %v627_v0 = vrot.slane %v626_v28, 4 }
 0x1dc   :  { %v628_v18 = vmin.f32 %v626_v28, %v627_v0 }
 0x1de   :  { %v629_v56 = vrot.slane %v628_v18, 2 }
 0x1e0   :  { %v630_v49 = vmin.f32 %v628_v18, %v629_v56  ;;  %v800_v18 = vld [vmem:[#allocation3 + $0x28] sm:$0xff] }
 0x1e2   :  { %v631_v57 = vrot.slane %v630_v49, 1 }
 0x1e4   :  { %v632_v62 = vmin.f32 %v630_v49, %v631_v57 }
 0x1e6   :  { %vm648_vm5 = vcmp.eq.f32.partialorder %v579_v17, %v632_v62  ;;  %vm634_vm6 = vcmp.eq.f32.partialorder %v565_v12, %v632_v62  ;;  %vm633_vm7 = vcmp.eq.f32.partialorder %v564_v11, %v632_v62  ;;  %vm647_vm8 = vcmp.eq.f32.partialorder %v578_v53, %v632_v62  ;;  %v796_v17 = vld [vmem:[#allocation3 + $0x8] sm:$0xff] }
 0x1e7   :  { %v1088_v26 = vsel %vm648_vm5, 1.0, %v1290_v61  ;;  %v1074_v58 = vsel %vm634_vm6, 1.0, %v1290_v61  ;;  %v1073_v9 = vsel %vm633_vm7, 1.0, %v1290_v61  ;;  %v1087_v63 = vsel %vm647_vm8, 1.0, %v1290_v61 }
 0x1e8   :  { %v1694_v29 = vmul.f32 %v1088_v26, %v1681_v2  ;;  %v1697_v44 = vmul.f32 %v1074_v58, %v1681_v2  ;;  %v1700_v36 = vmul.f32 %v1073_v9, %v1681_v2  ;;  %vm646_vm9 = vcmp.eq.f32.partialorder %v577_v27, %v632_v62 }
 0x1e9   :  { %vm637_vm10 = vcmp.eq.f32.partialorder %v568_v14, %v632_v62  ;;  %vm635_vm11 = vcmp.eq.f32.partialorder %v566_v50, %v632_v62  ;;  %vm645_vm12 = vcmp.eq.f32.partialorder %v576_v24, %v632_v62  ;;  %v1709_v42 = vmul.f32 %v1087_v63, %v1681_v2  ;;  %v805_v63 = vld [vmem:[#allocation3 + $0x50] sm:$0xff] }
 0x1ea   :  { %1170 = vmatprep.subr.mxu1 %v1694_v29  ;;  %813 = vadd.xlane.f32.xlu1 %v1697_v44  ;;  %v1086_v53 = vsel %vm646_vm9, 1.0, %v1290_v61  ;;  %v1077_v11 = vsel %vm637_vm10, 1.0, %v1290_v61  ;;  %v1075_v12 = vsel %vm635_vm11, 1.0, %v1290_v61  ;;  %v1085_v46 = vsel %vm645_vm12, 1.0, %v1290_v61 }
 0x1eb   :  { %811 = vadd.xlane.f32.xlu0 %v1700_v36  ;;  %1171 = vmatpush3.msra.mxu1 %v1694_v29  ;;  %v1717_v39 = vmul.f32 %v1086_v53, %v1681_v2  ;;  %v685_v50 = vmul.f32 %v1077_v11, %v1681_v2  ;;  %vm644_vm13 = vcmp.eq.f32.partialorder %v575_v59, %v632_v62  ;;  %vm32_vm6 = vcmask 0  }
 0x1ec   :  { %1172 = vmatprep.subr.mxu1 %v1709_v42  ;;  %vm639_vm14 = vcmp.eq.f32.partialorder %v570_v51, %v632_v62  ;;  %vm636_vm15 = vcmp.eq.f32.partialorder %v567_v13, %v632_v62  ;;  %v683_v14 = vmul.f32 %v1075_v12, %v1681_v2  ;;  %v1084_v24 = vsel %vm644_vm13, 1.0, %v1290_v61  ;;  %33 = vst.msk [vmem:[#allocation2] sm:$0x1] %vm32_vm6, %v1290_v61 }
 0x1ed   :  { %1173 = vmatpush3.msra.mxu1 %v1709_v42  ;;  %v1079_v27 = vsel %vm639_vm14, 1.0, %v1290_v61  ;;  %vm643_vm0 = vcmp.eq.f32.partialorder %v574_v52, %v632_v62  ;;  %v693_v40 = vmul.f32 %v1085_v46, %v1681_v2  ;;  %v1076_v51 = vsel %vm636_vm15, 1.0, %v1290_v61 }
 0x1ee   :  { %1174 = vmatprep.subr.mxu1 %v1717_v39  ;;  %819 = vadd.xlane.f32.xlu1 %v685_v50  ;;  %v1083_v45 = vsel %vm643_vm0, 1.0, %v1290_v61  ;;  %vm642_vm1 = vcmp.eq.f32.partialorder %v573_v3, %v632_v62  ;;  %vm641_vm3 = vcmp.eq.f32.partialorder %v572_v22, %v632_v62  ;;  %v692_v41 = vmul.f32 %v1084_v24, %v1681_v2  ;;  %v807_v24 = vld [vmem:[#allocation3 + $0x60] sm:$0xff] }
 0x1ef   :  { %815 = vadd.xlane.f32.xlu0 %v683_v14  ;;  %1175 = vmatpush3.msra.mxu1 %v1717_v39  ;;  %v687_v52 = vmul.f32 %v1079_v27, %v1681_v2  ;;  %vm638_vm4 = vcmp.eq.f32.partialorder %v569_v15, %v632_v62  ;;  %v684_v1 = vmul.f32 %v1076_v51, %v1681_v2  ;;  %v1082_v13 = vsel %vm642_vm1, 1.0, %v1290_v61  ;;  %v804_v51 = vld [vmem:[#allocation3 + $0x48] sm:$0xff] }
 0x1f0   :  { %1176 = vmatprep.subr.mxu1 %v693_v40  ;;  %v1081_v59 = vsel %vm641_vm3, 1.0, %v1290_v61  ;;  %v691_v55 = vmul.f32 %v1083_v45, %v1681_v2  ;;  %v1078_v60 = vsel %vm638_vm4, 1.0, %v1290_v61  ;;  %vm640_vm5 = vcmp.eq.f32.partialorder %v571_v21, %v632_v62  ;;  %v698_v21 = vld [vmem:[%s1878_s4 + $0x8] sm:$0xff] }
 0x1f1   :  { %1177 = vmatpush3.msra.mxu1 %v693_v40  ;;  %v690_v47 = vmul.f32 %v1082_v13, %v1681_v2  ;;  %v689_v15 = vmul.f32 %v1081_v59, %v1681_v2  ;;  %v686_v22 = vmul.f32 %v1078_v60, %v1681_v2  ;;  %v1080_v3 = vsel %vm640_vm5, 1.0, %v1290_v61  ;;  %v798_v61 = vld [vmem:[#allocation3 + $0x18] sm:$0xff] }
 0x1f2   :  { %1178 = vmatprep.subr.mxu1 %v692_v41  ;;  %823 = vadd.xlane.f32.xlu1 %v687_v52  ;;  %v688_v54 = vmul.f32 %v1080_v3, %v1681_v2  ;;  %v806_v3 = vld [vmem:[#allocation3 + $0x58] sm:$0xff] }
 0x1f3   :  { %817 = vadd.xlane.f32.xlu0 %v684_v1  ;;  %1179 = vmatpush3.msra.mxu1 %v692_v41 }
 0x1f4   :  { %1180 = vmatprep.subr.mxu1 %v691_v55 }
 0x1f5   :  { %1181 = vmatpush3.msra.mxu1 %v691_v55 }
 0x1f6   :  { %1182 = vmatprep.subr.mxu1 %v690_v47  ;;  %827 = vadd.xlane.f32.xlu1 %v689_v15 }
 0x1f7   :  { %821 = vadd.xlane.f32.xlu0 %v686_v22  ;;  %1183 = vmatpush3.msra.mxu1 %v690_v47 }
 0x1f8   :  { %1184 = vmatprep.subr.mxu1 %v689_v15 }
 0x1f9   :  { %1185 = vmatpush3.msra.mxu1 %v689_v15 }
 0x1fa   :  { %1186 = vmatprep.subr.mxu1 %v688_v54  ;;  %831 = vadd.xlane.f32.xlu1 %v691_v55 }
 0x1fb   :  { %825 = vadd.xlane.f32.xlu0 %v688_v54  ;;  %1187 = vmatpush3.msra.mxu1 %v688_v54 }
 0x1fc   :  { %1188 = vmatprep.subr.mxu1 %v687_v52 }
 0x1fd   :  { %1189 = vmatpush3.msra.mxu1 %v687_v52 }
 0x1fe   :  { %1190 = vmatprep.subr.mxu1 %v686_v22  ;;  %835 = vadd.xlane.f32.xlu1 %v693_v40 }
 0x1ff   :  { %829 = vadd.xlane.f32.xlu0 %v690_v47  ;;  %1191 = vmatpush3.msra.mxu1 %v686_v22  ;;  %v809_v47 = vld [vmem:[#allocation3 + $0x70] sm:$0xff] }
 0x200   :  { %1192 = vmatprep.subr.mxu1 %v685_v50 }
 0x201   :  { %1193 = vmatpush3.msra.mxu1 %v685_v50 }
 0x202   :  { %1194 = vmatprep.subr.mxu1 %v684_v1  ;;  %839 = vadd.xlane.f32.xlu1 %v1709_v42 }
 0x203   :  { %833 = vadd.xlane.f32.xlu0 %v692_v41  ;;  %1195 = vmatpush3.msra.mxu1 %v684_v1 }
 0x204   :  { %1196 = vmatprep.subr.mxu1 %v683_v14 }
 0x205   :  { %1197 = vmatpush3.msra.mxu1 %v683_v14 }
 0x206   :  { %1198 = vmatprep.subr.mxu1 %v1697_v44 }
 0x207   :  { %837 = vadd.xlane.f32.xlu0 %v1717_v39  ;;  %1199 = vmatpush3.msra.mxu1 %v1697_v44 }
 0x208   :  { %1200 = vmatprep.subr.mxu1 %v1700_v36 }
 0x209   :  { %1201 = vmatpush3.msra.mxu1 %v1700_v36  ;;  %v802_v36 = vld [vmem:[#allocation3 + $0x38] sm:$0xff] }
 0x20a   :  { %1203 = vmatmul.mubr.f32.vlgmr.msra.gmra.mxu1 %v698_v21 }
 0x20b   :  { %841 = vadd.xlane.f32.xlu0 %v1694_v29 }
 0x273   :  { %v814_v30 = vpop.xlane.xlu1 %813 }
 0x274   :  { %v844_v31 = vadd.f32 %v814_v30, %v796_v17  ;;  %v812_v5 = vpop.xlane.xlu0 %811 }
 0x275   :  { %v843_v8 = vadd.f32 %v812_v5, %v795_v25 }
 0x276   :  { %861 = vst.msk [vmem:[#allocation3 + $0x8] sm:$0xff] %vm34_vm2, %v844_v31 }
 0x277   :  { %860 = vst.msk [vmem:[#allocation3] sm:$0xff] %vm34_vm2, %v843_v8  ;;  %v820_v33 = vpop.xlane.xlu1 %819 }
 0x278   :  { %v847_v34 = vadd.f32 %v820_v33, %v799_v10  ;;  %v816_v20 = vpop.xlane.xlu0 %815  ;;  %v808_v33 = vld [vmem:[#allocation3 + $0x68] sm:$0xff] }
 0x279   :  { %v845_v37 = vadd.f32 %v816_v20, %v797_v19 }
 0x27a   :  { %864 = vst.msk [vmem:[#allocation3 + $0x20] sm:$0xff] %vm34_vm2, %v847_v34 }
 0x27b   :  { %862 = vst.msk [vmem:[#allocation3 + $0x10] sm:$0xff] %vm34_vm2, %v845_v37  ;;  %v824_v43 = vpop.xlane.xlu1 %823 }
 0x27c   :  { %v849_v48 = vadd.f32 %v824_v43, %v801_v38  ;;  %v818_v4 = vpop.xlane.xlu0 %817 }
 0x27d   :  { %v885_v6 = vld [vmem:[#allocation3 + $0x8] sm:$0xff]  ;;  %v846_v7 = vadd.f32 %v818_v4, %v798_v61 }
 0x27e   :  { %v1775_v28 = vmul.f32 0.03125, %v885_v6  ;;  %v884_v0 = vld [vmem:[#allocation3] sm:$0xff]  ;;  %866 = vst.msk [vmem:[#allocation3 + $0x30] sm:$0xff] %vm34_vm2, %v849_v48 }
 0x27f   :  { %v1778_v23 = vmul.f32 0.03125, %v884_v0  ;;  %863 = vst.msk [vmem:[#allocation3 + $0x18] sm:$0xff] %vm34_vm2, %v846_v7  ;;  %v828_v56 = vpop.xlane.xlu1 %827 }
 0x280   :  { %v918_v49 = vadd.f32 1e-10, %v1775_v28  ;;  %v851_v57 = vadd.f32 %v828_v56, %v803_v16  ;;  %v822_v62 = vpop.xlane.xlu0 %821 }
 0x281   :  { %v917_v26 = vadd.f32 1e-10, %v1778_v23  ;;  %v888_v58 = vld [vmem:[#allocation3 + $0x20] sm:$0xff]  ;;  %v848_v9 = vadd.f32 %v822_v62, %v800_v18  ;;  %v810_v18 = vld [vmem:[#allocation3 + $0x78] sm:$0xff] }
 0x282   :  { %1211 = vlog2.f32 %v918_v49  ;;  %v1783_v29 = vmul.f32 0.03125, %v888_v58  ;;  %v886_v44 = vld [vmem:[#allocation3 + $0x10] sm:$0xff]  ;;  %868 = vst.msk [vmem:[#allocation3 + $0x40] sm:$0xff] %vm34_vm2, %v851_v57 }
 0x283   :  { %1213 = vlog2.f32 %v917_v26  ;;  %v1786_v42 = vmul.f32 0.03125, %v886_v44  ;;  %865 = vst.msk [vmem:[#allocation3 + $0x28] sm:$0xff] %vm34_vm2, %v848_v9  ;;  %v832_v53 = vpop.xlane.xlu1 %831 }
 0x284   :  { %v921_v11 = vadd.f32 1e-10, %v1783_v29  ;;  %v853_v12 = vadd.f32 %v832_v53, %v805_v63  ;;  %v826_v39 = vpop.xlane.xlu0 %825 }
 0x285   :  { %v919_v46 = vadd.f32 1e-10, %v1786_v42  ;;  %v890_v50 = vld [vmem:[#allocation3 + $0x30] sm:$0xff]  ;;  %v850_v14 = vadd.f32 %v826_v39, %v802_v36 }
 0x286   :  { %1215 = vlog2.f32 %v921_v11  ;;  %v1791_v27 = vmul.f32 0.03125, %v890_v50  ;;  %v887_v40 = vld [vmem:[#allocation3 + $0x18] sm:$0xff]  ;;  %870 = vst.msk [vmem:[#allocation3 + $0x50] sm:$0xff] %vm34_vm2, %v853_v12 }
 0x287   :  { %1217 = vlog2.f32 %v919_v46  ;;  %v1794_v45 = vmul.f32 0.03125, %v887_v40  ;;  %867 = vst.msk [vmem:[#allocation3 + $0x38] sm:$0xff] %vm34_vm2, %v850_v14  ;;  %v836_v41 = vpop.xlane.xlu1 %835 }
 0x288   :  { %v923_v52 = vadd.f32 1e-10, %v1791_v27  ;;  %v855_v1 = vadd.f32 %v836_v41, %v807_v24  ;;  %v830_v13 = vpop.xlane.xlu0 %829 }
 0x289   :  { %v920_v59 = vadd.f32 1e-10, %v1794_v45  ;;  %v892_v55 = vld [vmem:[#allocation3 + $0x40] sm:$0xff]  ;;  %v852_v60 = vadd.f32 %v830_v13, %v804_v51 }
 0x28a   :  { %1219 = vlog2.f32 %v923_v52  ;;  %v1799_v15 = vmul.f32 0.03125, %v892_v55  ;;  %v889_v22 = vld [vmem:[#allocation3 + $0x28] sm:$0xff]  ;;  %872 = vst.msk [vmem:[#allocation3 + $0x60] sm:$0xff] %vm34_vm2, %v855_v1 }
 0x28b   :  { %1221 = vlog2.f32 %v920_v59  ;;  %v1802_v54 = vmul.f32 0.03125, %v889_v22  ;;  %869 = vst.msk [vmem:[#allocation3 + $0x48] sm:$0xff] %vm34_vm2, %v852_v60  ;;  %v840_v21 = vpop.xlane.xlu1 %839 }
 0x28c   :  { %v925_v17 = vadd.f32 1e-10, %v1799_v15  ;;  %v857_v25 = vadd.f32 %v840_v21, %v809_v47  ;;  %v834_v30 = vpop.xlane.xlu0 %833 }
 0x28d   :  { %v922_v31 = vadd.f32 1e-10, %v1802_v54  ;;  %v894_v5 = vld [vmem:[#allocation3 + $0x50] sm:$0xff]  ;;  %v854_v8 = vadd.f32 %v834_v30, %v806_v3 }
 0x28e   :  { %1223 = vlog2.f32 %v925_v17  ;;  %v1807_v10 = vmul.f32 0.03125, %v894_v5  ;;  %v891_v19 = vld [vmem:[#allocation3 + $0x38] sm:$0xff]  ;;  %874 = vst.msk [vmem:[#allocation3 + $0x70] sm:$0xff] %vm34_vm2, %v857_v25 }
 0x28f   :  { %v1212_v34 = vpop.eup %1211  ;;  %1225 = vlog2.f32 %v922_v31  ;;  %v1810_v20 = vmul.f32 0.03125, %v891_v19  ;;  %871 = vst.msk [vmem:[#allocation3 + $0x58] sm:$0xff] %vm34_vm2, %v854_v8 }
 0x290   :  { %v1214_v37 = vpop.eup %1213  ;;  %v936_v38 = vmul.f32 0.6931472, %v1212_v34  ;;  %v927_v61 = vadd.f32 1e-10, %v1807_v10  ;;  %v838_v43 = vpop.xlane.xlu0 %837 }
 0x291   :  { %v934_v48 = vmul.f32 0.6931472, %v1214_v37  ;;  %v924_v4 = vadd.f32 1e-10, %v1810_v20  ;;  %v856_v6 = vadd.f32 %v838_v43, %v808_v33  ;;  %v896_v7 = vld [vmem:[#allocation3 + $0x60] sm:$0xff] }
 0x292   :  { %v966_v16 = vmul.f32 %v936_v38, %v1775_v28  ;;  %1227 = vlog2.f32 %v927_v61  ;;  %v893_v0 = vld [vmem:[#allocation3 + $0x48] sm:$0xff]  ;;  %v1816_v56 = vmul.f32 0.03125, %v896_v7 }
 0x293   :  { %v1216_v49 = vpop.eup %1215  ;;  %v965_v57 = vmul.f32 %v934_v48, %v1778_v23  ;;  %1229 = vlog2.f32 %v924_v4  ;;  %v1819_v62 = vmul.f32 0.03125, %v893_v0  ;;  %873 = vst.msk [vmem:[#allocation3 + $0x68] sm:$0xff] %vm34_vm2, %v856_v6 }
 0x294   :  { %v1218_v26 = vpop.eup %1217  ;;  %v842_v58 = vpop.xlane.xlu0 %841  ;;  %v929_v9 = vadd.f32 1e-10, %v1816_v56  ;;  %v982_v53 = vsel %vm34_vm2, %v966_v16, 0.0  ;;  %v942_v11 = vmul.f32 0.6931472, %v1216_v49 }
 0x295   :  { %v938_v63 = vmul.f32 0.6931472, %v1218_v26  ;;  %v926_v28 = vadd.f32 1e-10, %v1819_v62  ;;  %v858_v44 = vadd.f32 %v842_v58, %v810_v18  ;;  %v898_v36 = vld [vmem:[#allocation3 + $0x70] sm:$0xff]  ;;  %v981_v46 = vsel %vm34_vm2, %v965_v57, 0.0 }
 0x296   :  { %v895_v12 = vld [vmem:[#allocation3 + $0x58] sm:$0xff]  ;;  %v1825_v39 = vmul.f32 0.03125, %v898_v36  ;;  %1231 = vlog2.f32 %v929_v9  ;;  %v983_v1 = vadd.f32 %v982_v53, %v981_v46  ;;  %v969_v13 = vmul.f32 %v942_v11, %v1783_v29 }
 0x297   :  { %v1220_v23 = vpop.eup %1219  ;;  %v967_v50 = vmul.f32 %v938_v63, %v1786_v42  ;;  %1233 = vlog2.f32 %v926_v28  ;;  %875 = vst.msk [vmem:[#allocation3 + $0x78] sm:$0xff] %vm34_vm2, %v858_v44  ;;  %v912_v14 = vmul.f32 0.03125, %v895_v12 }
 0x298   :  { %v1222_v24 = vpop.eup %1221  ;;  %v931_v40 = vadd.f32 1e-10, %v1825_v39  ;;  %v946_v59 = vmul.f32 0.6931472, %v1220_v23  ;;  %v988_v30 = vsel %vm34_vm2, %v969_v13, 0.0 }
 0x299   :  { %v984_v51 = vsel %vm34_vm2, %v967_v50, 0.0  ;;  %v940_v41 = vmul.f32 0.6931472, %v1222_v24  ;;  %v928_v52 = vadd.f32 1e-10, %v912_v14 }
 0x29a   :  { %v897_v55 = vld [vmem:[#allocation3 + $0x68] sm:$0xff]  ;;  %1235 = vlog2.f32 %v931_v40  ;;  %v985_v3 = vadd.f32 %v984_v51, %v983_v1  ;;  %v971_v31 = vmul.f32 %v946_v59, %v1791_v27 }
 0x29b   :  { %v1224_v60 = vpop.eup %1223  ;;  %v968_v42 = vmul.f32 %v940_v41, %v1794_v45  ;;  %v914_v47 = vmul.f32 0.03125, %v897_v55  ;;  %1237 = vlog2.f32 %v928_v52 }
 0x29c   :  { %v1226_v22 = vpop.eup %1225  ;;  %v950_v19 = vmul.f32 0.6931472, %v1224_v60  ;;  %v992_v48 = vsel %vm34_vm2, %v971_v31, 0.0 }
 0x29d   :  { %v986_v21 = vsel %vm34_vm2, %v968_v42, 0.0  ;;  %v944_v17 = vmul.f32 0.6931472, %v1226_v22  ;;  %v930_v25 = vadd.f32 1e-10, %v914_v47 }
 0x29e   :  { %v987_v5 = vadd.f32 %v986_v21, %v985_v3  ;;  %v899_v29 = vld [vmem:[#allocation3 + $0x78] sm:$0xff]  ;;  %v973_v27 = vmul.f32 %v950_v19, %v1799_v15 }
 0x29f   :  { %v1228_v8 = vpop.eup %1227  ;;  %v970_v33 = vmul.f32 %v944_v17, %v1802_v54  ;;  %v916_v34 = vmul.f32 0.03125, %v899_v29  ;;  %1239 = vlog2.f32 %v930_v25 }
 0x2a0   :  { %v1230_v45 = vpop.eup %1229  ;;  %v989_v37 = vadd.f32 %v988_v30, %v987_v5  ;;  %v954_v16 = vmul.f32 0.6931472, %v1228_v8  ;;  %v996_v28 = vsel %vm34_vm2, %v973_v27, 0.0 }
 0x2a1   :  { %v990_v38 = vsel %vm34_vm2, %v970_v33, 0.0  ;;  %v948_v61 = vmul.f32 0.6931472, %v1230_v45  ;;  %v932_v43 = vadd.f32 1e-10, %v916_v34 }
 0x2a2   :  { %v991_v4 = vadd.f32 %v990_v38, %v989_v37  ;;  %v975_v63 = vmul.f32 %v954_v16, %v1807_v10 }
 0x2a3   :  { %v1232_v6 = vpop.eup %1231  ;;  %v972_v7 = vmul.f32 %v948_v61, %v1810_v20  ;;  %1241 = vlog2.f32 %v932_v43 }
 0x2a4   :  { %v1234_v0 = vpop.eup %1233  ;;  %v993_v54 = vadd.f32 %v992_v48, %v991_v4  ;;  %v958_v58 = vmul.f32 0.6931472, %v1232_v6  ;;  %v1000_v46 = vsel %vm34_vm2, %v975_v63, 0.0 }
 0x2a5   :  { %v952_v18 = vmul.f32 0.6931472, %v1234_v0  ;;  %v994_v49 = vsel %vm34_vm2, %v972_v7, 0.0 }
 0x2a6   :  { %v995_v57 = vadd.f32 %v994_v49, %v993_v54  ;;  %v977_v23 = vmul.f32 %v958_v58, %v1816_v56 }
 0x2a7   :  { %v1236_v26 = vpop.eup %1235  ;;  %v974_v9 = vmul.f32 %v952_v18, %v1819_v62 }
 0x2a8   :  { %v1238_v44 = vpop.eup %1237  ;;  %v997_v15 = vadd.f32 %v996_v28, %v995_v57  ;;  %v962_v11 = vmul.f32 0.6931472, %v1236_v26  ;;  %v1004_v52 = vsel %vm34_vm2, %v977_v23, 0.0 }
 0x2a9   :  { %v956_v36 = vmul.f32 0.6931472, %v1238_v44  ;;  %v998_v20 = vsel %vm34_vm2, %v974_v9, 0.0 }
 0x2aa   :  { %v999_v53 = vadd.f32 %v998_v20, %v997_v15  ;;  %v979_v41 = vmul.f32 %v962_v11, %v1825_v39 }
 0x2ab   :  { %v976_v12 = vmul.f32 %v956_v36, %v912_v14 }
 0x2ac   :  { %v1240_v50 = vpop.eup %1239  ;;  %v1001_v24 = vadd.f32 %v1000_v46, %v999_v53  ;;  %v1008_v60 = vsel %vm34_vm2, %v979_v41, 0.0 }
 0x2ad   :  { %v960_v40 = vmul.f32 0.6931472, %v1240_v50  ;;  %v1002_v62 = vsel %vm34_vm2, %v976_v12, 0.0 }
 0x2ae   :  { %v1003_v10 = vadd.f32 %v1002_v62, %v1001_v24 }
 0x2af   :  { %v978_v51 = vmul.f32 %v960_v40, %v914_v47 }
 0x2b0   :  { %v1242_v1 = vpop.eup %1241  ;;  %v1005_v13 = vadd.f32 %v1004_v52, %v1003_v10 }
 0x2b1   :  { %v964_v59 = vmul.f32 0.6931472, %v1242_v1  ;;  %v1006_v14 = vsel %vm34_vm2, %v978_v51, 0.0 }
 0x2b2   :  { %v1007_v55 = vadd.f32 %v1006_v14, %v1005_v13 }
 0x2b3   :  { %v980_v56 = vmul.f32 %v964_v59, %v916_v34 }
 0x2b4   :  { %v1009_v42 = vadd.f32 %v1008_v60, %v1007_v55 }
 0x2b5   :  { %v1010_v22 = vsel %vm34_vm2, %v980_v56, 0.0 }
 0x2b6   :  { %v1011_v3 = vadd.f32 %v1010_v22, %v1009_v42 }
 0x2b8   :  { %v1012_v21 = vrot.slane %v1011_v3, 4 }
 0x2ba   :  { %v1013_v17 = vadd.f32 %v1012_v21, %v1011_v3 }
 0x2bc   :  { %v1014_v47 = vrot.slane %v1013_v17, 2 }
 0x2be   :  { %v1015_v25 = vadd.f32 %v1014_v47, %v1013_v17 }
 0x2c0   :  { %v1016_v39 = vrot.slane %v1015_v25, 1 }
 0x2c2   :  { %v1017_v30 = vadd.f32 %v1016_v39, %v1015_v25 }
 0x2c4   :  { %v1018_v31 = vsub.f32 0.0, %v1017_v30 }
 0x2c6   :  { %v1019_v5 = vmul.f32 1.442695, %v1018_v31 }
 0x2c8   :  { %1243 = vpow2.f32 %v1019_v5 }
 0x2ca   :  { %v1204_v29 = vpop.f32.mrf.mxu1 }
 0x2cb   :  { %775 = vst [vmem:[%s1880_s6 + $0x8] sm:$0xff] %v1204_v29  ;;  %v777_v8 = vsub.f32 %v1204_v29, %v1416_v32 }
 0x2cc   :  { %v765_v19 = vpop.f32.mrf.mxu1 }
 0x2cd   :  { %v779_v33 = vmul.f32 %v1681_v2, %v777_v8  ;;  %774 = vst [vmem:[%s1880_s6] sm:$0xff] %v765_v19  ;;  %v776_v34 = vsub.f32 %v765_v19, %v1418_v35  ;;  %s1245_s6 = scalar_lea.vmem %s1041_s15, 16 }
 0x2ce   :  { %p1246_p0 = scmp.ne.s32.totalorder %s1041_s15, %s1245_s6  ;;  %p1251_p2 = scmp.lt.s32.totalorder %s1249_s16, %s1245_s6 }
 0x2cf   :  { %v778_v45 = vmul.f32 %v1681_v2, %v776_v34  ;;  %v781_v37 = vmul.f32 %v779_v33, %v779_v33 }
 0x2d0   :  { %p1252_p3 = por %p1251_p2, %p1250_p1 }
 0x2d1   :  { %v780_v38 = vmul.f32 %v778_v45, %v778_v45 }
 0x2d2   :  { %p1253_p4 = pnand %p1252_p3, %p1246_p0 }
 0x2d3   :  { %v783_v61 = vadd.f32 %v781_v37, %v780_v38 }
 0x2d5   :  { %v1244_v43 = vpop.eup %1243  ;;  %v784_v48 = vrot.slane %v783_v61, 4 }
 0x2d6   :  { %1021 = vst.msk [vmem:[#allocation6] sm:$0x1] %vm32_vm6, %v1244_v43 }
 0x2d7   :  { %v785_v4 = vadd.f32 %v784_v48, %v783_v61 }
 0x2d9   :  { %v786_v32 = vrot.slane %v785_v4, 2 }
 0x2db   :  { %v787_v6 = vadd.f32 %v786_v32, %v785_v4 }
 0x2dd   :  { %v788_v27 = vrot.slane %v787_v6, 1 }
 0x2df   :  { %v789_v7 = vadd.f32 %v788_v27, %v787_v6 }
 0x2e1   :  { %790 = vadd.xlane.f32.xlu1 %v789_v7 }
 0x2e2   :  { %1256 = shalt.err (!%p1253_p4)
}
 0x2e3   :  { %1043 = dma.vmem_to_hbm [thread:$0]  %s1041_s15, 16, %s1882_s8, [#allocation7]   ;;  %v782_v35 = vld [vmem:[#allocation2] sm:$0x1] }
 0x2e4   :  { %s1292_s19 = smov [#allocation4]  }
 0x2e5   :  { %s1030_s20 = sshll.u32 %s1292_s19, 4  ;;  %s1031_s20 = int_to_ptr.vmem [resolvable:$true] %s1030_s20 }
 0x2e6   :  { %s1265_s0 = scalar_lea.vmem %s1031_s20, 16  ;;  %s1269_s21 = scalar_lea.vmem %s1031_s20, 32 }
 0x2e7   :  { %p1266_p5 = scmp.ne.s32.totalorder %s1031_s20, %s1265_s0  ;;  %p1270_p6 = scmp.lt.s32.totalorder %s1031_s20, %s1031_s20 }
 0x2e8   :  { %p1271_p7 = scmp.lt.s32.totalorder %s1269_s21, %s1265_s0 }
 0x2ea   :  { %p1272_p8 = por %p1271_p7, %p1270_p6 }
 0x2ec   :  { %p1273_p9 = pnand %p1272_p8, %p1266_p5 }
 0x36a   :  { %v791_v2 = vpop.xlane.xlu1 %790 }
 0x36b   :  { %v792_v16 = vadd.f32 %v791_v2, %v782_v35 }
 0x36d   :  { %794 = vst.msk [vmem:[#allocation2] sm:$0x1] %vm32_vm6, %v792_v16 }
 0x374   :  { %v879_v0 = vld [vmem:[#allocation2] sm:$0x1] }
 0x375   :  { %v880_v54 = vmul.f32 1.25, %v879_v0 }
 0x377   :  { %v882_v18 = vmul.f32 0.001953125, %v880_v54 }
 0x379   :  { %883 = vst.msk [vmem:[#allocation4] sm:$0x1] %vm32_vm6, %v882_v18 }
 0x37a   :  { %1276 = shalt.err (!%p1273_p9)
}
 0x37b   :  { %1033 = dma.vmem_to_hbm [thread:$0]  %s1031_s20, 16, %s1881_s7, [#allocation5]  }
 0x37c   :  { %1285 = dma.done.wait [#allocation5], 16  }
 0x37d   :  { %1286 = vsyncadd [#allocation5], 4294967280 }
 0x37e   :  { %1287 = dma.done.wait [#allocation7], 16  }
 0x37f   :  { %1288 = vsyncadd [#allocation7], 4294967280 }
 0x380   :  { %1052 = vsyncpa [#allocation5], 1 }
 0x381   :  { %1053 = vsyncpa [#allocation7], 1 }

// kernel: vqvae_forward.17
= control target key start
LH: loop header
LB: loop body
LE: loop exit
PB: predicated region body
PF: predicated region fallthrough
CT: control target
= control target key end

     0   :  { %v248_v0 = vmov 0   ;;  %vm133_vm0 = vcmask 130048   ;;  %s332_s1 = inlined_call_operand.vmem [shape: bf16[144,128], index: 1, kind: input, shape index: {}]   ;;  %s333_s0 = inlined_call_operand.vmem [shape: bf16[32,144], index: 0, kind: input, shape index: {}]   ;;  %s334_s2 = inlined_call_operand.vmem [shape: f32[32,1], index: 2, kind: input, shape index: {}]   ;;  %s335_s3 = inlined_call_operand.vmem [shape: f32[32,128], index: 3, kind: output, shape index: {}]  }
   0x1   :  { %140 = vmatprep.subr.bf16.mxu0 %v248_v0  ;;  %212 = vmatprep.subr.bf16.mxu1 %v248_v0  ;;  %v233_v1 = vld [vmem:[%s332_s1 + $0x38] sm:$0xff]   ;;  %v234_v2 = vld [vmem:[%s332_s1 + $0x30] sm:$0xff]   ;;  %v235_v3 = vld [vmem:[%s332_s1 + $0x28] sm:$0xff]  }
   0x2   :  { %232 = vset.pattern.permute.xlu1 %v248_v0  ;;  %231 = vset.pattern.permute.xlu0 %v248_v0  ;;  %v236_v4 = vld [vmem:[%s332_s1 + $0x20] sm:$0xff]   ;;  %v247_v6 = vld [vmem:[%s333_s0 + $0x14] ss:$8 sps:$4 sm:$0xff]   ;;  %v38_v11 = vld [vmem:[%s334_s2 + $0x8] sm:$0xff] }
   0x3   :  { %141 = vmatpush1.bf16.msra.mxu0 %v233_v1  ;;  %221 = vmatpush1.bf16.msra.mxu1 %v233_v1  ;;  %v244_v5 = vld [vmem:[%s333_s0 + $0x4] ss:$8 sps:$4 sm:$0xff]   ;;  %v39_v7 = vld [vmem:[%s334_s2 + $0x10] sm:$0xff]  ;;  %v40_v9 = vld [vmem:[%s334_s2 + $0x18] sm:$0xff] }
   0x4   :  { %142 = vmatprep.subr.bf16.mxu0 %v248_v0  ;;  %213 = vmatprep.subr.bf16.mxu1 %v248_v0  ;;  %v37_v8 = vld [vmem:[%s334_s2] sm:$0xff]  ;;  %v237_v10 = vld [vmem:[%s332_s1 + $0x18] sm:$0xff]   ;;  %v238_v12 = vld [vmem:[%s332_s1 + $0x10] sm:$0xff]  }
   0x5   :  { %210 = vmatprep.mubr.msk.bf16.mxu0 %vm133_vm0, %v244_v5  ;;  %53 = vperm.xlu1 %232, %v39_v7   ;;  %v239_v13 = vld [vmem:[%s332_s1 + $0x8] sm:$0xff]   ;;  %v240_v14 = vld [vmem:[%s332_s1] sm:$0xff]   ;;  %v245_v17 = vld [vmem:[%s333_s0 + $0x10] ss:$8 sps:$4 sm:$0xff]  }
   0x6   :  { %211 = vmatprep.mubr.msk.bf16.mxu1 %vm133_vm0, %v247_v6  ;;  %43 = vperm.xlu0 %231, %v37_v8   ;;  %v241_v15 = vld [vmem:[%s332_s1 + $0x40] sm:$0xff]  }
   0x7   :  { %143 = vmatpush1.bf16.msra.mxu0 %v234_v2  ;;  %222 = vmatpush1.bf16.msra.mxu1 %v234_v2  ;;  %v242_v16 = vld [vmem:[%s333_s0] ss:$8 sps:$4 sm:$0xff]  }
   0x8   :  { %144 = vmatprep.subr.bf16.mxu0 %v248_v0  ;;  %214 = vmatprep.subr.bf16.mxu1 %v248_v0 }
   0x9   :  { %58 = vperm.xlu1 %232, %v40_v9  }
   0xa   :  { %48 = vperm.xlu0 %231, %v38_v11  }
   0xb   :  { %145 = vmatpush1.bf16.msra.mxu0 %v235_v3  ;;  %223 = vmatpush1.bf16.msra.mxu1 %v235_v3 }
   0xc   :  { %146 = vmatprep.subr.bf16.mxu0 %v248_v0  ;;  %215 = vmatprep.subr.bf16.mxu1 %v248_v0 }
   0xf   :  { %147 = vmatpush1.bf16.msra.mxu0 %v236_v4  ;;  %224 = vmatpush1.bf16.msra.mxu1 %v236_v4 }
  0x10   :  { %148 = vmatprep.subr.bf16.mxu0 %v248_v0  ;;  %216 = vmatprep.subr.bf16.mxu1 %v248_v0 }
  0x13   :  { %149 = vmatpush1.bf16.msra.mxu0 %v237_v10  ;;  %225 = vmatpush1.bf16.msra.mxu1 %v237_v10 }
  0x14   :  { %150 = vmatprep.subr.bf16.mxu0 %v248_v0  ;;  %217 = vmatprep.subr.bf16.mxu1 %v248_v0 }
  0x17   :  { %151 = vmatpush1.bf16.msra.mxu0 %v238_v12  ;;  %226 = vmatpush1.bf16.msra.mxu1 %v238_v12 }
  0x18   :  { %152 = vmatprep.subr.bf16.mxu0 %v248_v0  ;;  %218 = vmatprep.subr.bf16.mxu1 %v248_v0 }
  0x1b   :  { %153 = vmatpush1.bf16.msra.mxu0 %v239_v13  ;;  %227 = vmatpush1.bf16.msra.mxu1 %v239_v13 }
  0x1c   :  { %154 = vmatprep.subr.bf16.mxu0 %v248_v0  ;;  %219 = vmatprep.subr.bf16.mxu1 %v248_v0 }
  0x1f   :  { %155 = vmatpush1.bf16.msra.mxu0 %v240_v14  ;;  %228 = vmatpush1.bf16.msra.mxu1 %v240_v14 }
  0x20   :  { %170 = vmatprep.subr.bf16.mxu0 %v248_v0  ;;  %220 = vmatprep.subr.bf16.mxu1 %v248_v0 }
  0x23   :  { %171 = vmatpush2.bf16.msra.mxu0 %v241_v15  ;;  %229 = vmatpush2.bf16.msra.mxu1 %v241_v15 }
  0x26   :  { %173 = vmatmul.mubr.bf16.vlgmr.msra.gmra.mxu0 %v242_v16  ;;  %181 = vmatmul.mubr.bf16.vlgmr.msra.gmra.mxu1 %v245_v17 }
  0x80   :  { %v54_v18 = vpop.permute.xlu1 %53 }
  0x81   :  { %v44_v19 = vpop.permute.xlu0 %43 }
  0x84   :  { %v59_v26 = vpop.permute.xlu1 %58 }
  0x85   :  { %v49_v27 = vpop.permute.xlu0 %48 }
  0xe6   :  { %v174_v20 = vpop.f32.mrf.mxu0  ;;  %v182_v21 = vpop.f32.mrf.mxu1 }
  0xe7   :  { %v175_v22 = vadd.f32 %v174_v20, %v44_v19  ;;  %v183_v23 = vadd.f32 %v182_v21, %v54_v18 }
  0xe8   :  { %v176_v24 = vpop.f32.mrf.mxu0  ;;  %v184_v25 = vpop.f32.mrf.mxu1 }
  0xe9   :  { %189 = vst [vmem:[%s335_s3] sm:$0xff] %v175_v22  ;;  %191 = vst [vmem:[%s335_s3 + $0x10] sm:$0xff] %v183_v23 }
  0xea   :  { %v177_v28 = vpop.f32.mrf.mxu0  ;;  %v185_v29 = vpop.f32.mrf.mxu1 }
  0xeb   :  { %v178_v30 = vadd.f32 %v177_v28, %v49_v27  ;;  %v186_v31 = vadd.f32 %v185_v29, %v59_v26 }
  0xec   :  { %v179_v32 = vpop.f32.mrf.mxu0  ;;  %v187_v33 = vpop.f32.mrf.mxu1 }
  0xed   :  { %190 = vst [vmem:[%s335_s3 + $0x8] sm:$0xff] %v178_v30  ;;  %192 = vst [vmem:[%s335_s3 + $0x18] sm:$0xff] %v186_v31 }

// kernel: vqvae_forward.20
= control target key start
LH: loop header
LB: loop body
LE: loop exit
PB: predicated region body
PF: predicated region fallthrough
CT: control target
= control target key end

     0   :  { %v549_v3 = vmov 0   ;;  %s851_s1 = inlined_call_operand.vmem [shape: bf16[512,128], index: 1, kind: input, shape index: {}]   ;;  %s852_s0 = inlined_call_operand.vmem [shape: bf16[16,512], index: 0, kind: input, shape index: {}]   ;;  %s853_s2 = inlined_call_operand.vmem [shape: f32[16,1], index: 2, kind: input, shape index: {}]   ;;  %s854_s3 = inlined_call_operand.vmem [shape: f32[16,128], index: 3, kind: output, shape index: {}]  }
   0x1   :  { %v45_v0 = vld [vmem:[%s851_s1 + $0x78] sm:$0xf]  ;;  %v46_v1 = vld [vmem:[%s851_s1 + $0x7c] sm:$0xf]  ;;  %542 = vset.pattern.permute.xlu0 %v549_v3  ;;  %v43_v15 = vld [vmem:[%s851_s1 + $0x70] sm:$0xf] }
   0x2   :  { %v77_v2 = vld [vmem:[%s851_s1 + $0xf8] sm:$0xf]  ;;  %v109_v4 = vmax.bf16 %v549_v3, %v45_v0  ;;  %v110_v5 = vmax.bf16 %v549_v3, %v46_v1  ;;  %v78_v6 = vld [vmem:[%s851_s1 + $0xfc] sm:$0xf]  ;;  %v44_v19 = vld [vmem:[%s851_s1 + $0x74] sm:$0xf]  ;;  %v107_v20 = vmax.bf16 %v549_v3, %v43_v15 }
   0x3   :  { %v141_v7 = vmax.bf16 %v549_v3, %v77_v2  ;;  %v29_v8 = vld [vmem:[%s851_s1 + $0x38] sm:$0xf]  ;;  %v30_v9 = vld [vmem:[%s851_s1 + $0x3c] sm:$0xf]  ;;  %v142_v10 = vmax.bf16 %v549_v3, %v78_v6  ;;  %v75_v21 = vld [vmem:[%s851_s1 + $0xf0] sm:$0xf]  ;;  %v108_v25 = vmax.bf16 %v549_v3, %v44_v19 }
   0x4   :  { %v93_v11 = vmax.bf16 %v549_v3, %v29_v8  ;;  %v94_v12 = vmax.bf16 %v549_v3, %v30_v9  ;;  %v61_v13 = vld [vmem:[%s851_s1 + $0xb8] sm:$0xf]  ;;  %v62_v14 = vld [vmem:[%s851_s1 + $0xbc] sm:$0xf]  ;;  %v480_v16 = vcombine.low %v109_v4, %v110_v5  ;;  %v76_v22 = vld [vmem:[%s851_s1 + $0xf4] sm:$0xf]  ;;  %v139_v26 = vmax.bf16 %v549_v3, %v75_v21 }
   0x5   :  { %v125_v17 = vmax.bf16 %v549_v3, %v61_v13  ;;  %v126_v18 = vmax.bf16 %v549_v3, %v62_v14  ;;  %v496_v23 = vcombine.low %v141_v7, %v142_v10  ;;  %v27_v27 = vld [vmem:[%s851_s1 + $0x30] sm:$0xf]  ;;  %v28_v28 = vld [vmem:[%s851_s1 + $0x34] sm:$0xf]  ;;  %v140_v31 = vmax.bf16 %v549_v3, %v76_v22  ;;  %v41_v35 = vld [vmem:[%s851_s1 + $0x68] sm:$0xf] }
   0x6   :  { %v472_v24 = vcombine.low %v93_v11, %v94_v12  ;;  %v59_v29 = vld [vmem:[%s851_s1 + $0xb0] sm:$0xf]  ;;  %497 = vmatprep.subr.bf16.mxu0 %v480_v16  ;;  %v91_v32 = vmax.bf16 %v549_v3, %v27_v27  ;;  %v92_v33 = vmax.bf16 %v549_v3, %v28_v28  ;;  %v60_v34 = vld [vmem:[%s851_s1 + $0xb4] sm:$0xf]  ;;  %v42_v36 = vld [vmem:[%s851_s1 + $0x6c] sm:$0xf]  ;;  %v479_v37 = vcombine.low %v107_v20, %v108_v25 }
   0x7   :  { %v488_v30 = vcombine.low %v125_v17, %v126_v18  ;;  %519 = vmatprep.subr.bf16.mxu1 %v496_v23  ;;  %v123_v38 = vmax.bf16 %v549_v3, %v59_v29  ;;  %v124_v39 = vmax.bf16 %v549_v3, %v60_v34  ;;  %v73_v40 = vld [vmem:[%s851_s1 + $0xe8] sm:$0xf]  ;;  %v74_v41 = vld [vmem:[%s851_s1 + $0xec] sm:$0xf]  ;;  %v495_v43 = vcombine.low %v139_v26, %v140_v31  ;;  %v39_v54 = vld [vmem:[%s851_s1 + $0x60] sm:$0xf] }
   0x8   :  { %498 = vmatpush3.bf16.msra.mxu0 %v472_v24  ;;  %v25_v42 = vld [vmem:[%s851_s1 + $0x28] sm:$0xf]  ;;  %v471_v44 = vcombine.low %v91_v32, %v92_v33  ;;  %v105_v45 = vmax.bf16 %v549_v3, %v41_v35  ;;  %v106_v46 = vmax.bf16 %v549_v3, %v42_v36  ;;  %v26_v47 = vld [vmem:[%s851_s1 + $0x2c] sm:$0xf]  ;;  %v137_v51 = vmax.bf16 %v549_v3, %v73_v40  ;;  %v40_v55 = vld [vmem:[%s851_s1 + $0x64] sm:$0xf] }
   0x9   :  { %520 = vmatpush3.bf16.msra.mxu1 %v488_v30  ;;  %v57_v48 = vld [vmem:[%s851_s1 + $0xa8] sm:$0xf]  ;;  %v58_v49 = vld [vmem:[%s851_s1 + $0xac] sm:$0xf]  ;;  %499 = vmatprep.subr.bf16.mxu0 %v479_v37  ;;  %v487_v50 = vcombine.low %v123_v38, %v124_v39  ;;  %v138_v52 = vmax.bf16 %v549_v3, %v74_v41  ;;  %v89_v53 = vmax.bf16 %v549_v3, %v25_v42  ;;  %v71_v56 = vld [vmem:[%s851_s1 + $0xe0] sm:$0xf] }
   0xa   :  { %521 = vmatprep.subr.bf16.mxu1 %v495_v43  ;;  %v478_v57 = vcombine.low %v105_v45, %v106_v46  ;;  %v90_v58 = vmax.bf16 %v549_v3, %v26_v47  ;;  %v121_v59 = vmax.bf16 %v549_v3, %v57_v48  ;;  %v122_v60 = vmax.bf16 %v549_v3, %v58_v49  ;;  %v72_v61 = vld [vmem:[%s851_s1 + $0xe4] sm:$0xf]  ;;  %v23_v62 = vld [vmem:[%s851_s1 + $0x20] sm:$0xf]  ;;  %v37_v7 = vld [vmem:[%s851_s1 + $0x58] sm:$0xf] }
   0xb   :  { %v24_v63 = vld [vmem:[%s851_s1 + $0x24] sm:$0xf]  ;;  %v494_v0 = vcombine.low %v137_v51, %v138_v52  ;;  %v103_v1 = vmax.bf16 %v549_v3, %v39_v54  ;;  %v104_v2 = vmax.bf16 %v549_v3, %v40_v55  ;;  %v135_v4 = vmax.bf16 %v549_v3, %v71_v56  ;;  %v55_v5 = vld [vmem:[%s851_s1 + $0xa0] sm:$0xf]  ;;  %v38_v11 = vld [vmem:[%s851_s1 + $0x5c] sm:$0xf] }
   0xc   :  { %500 = vmatpush3.bf16.msra.mxu0 %v471_v44  ;;  %v56_v6 = vld [vmem:[%s851_s1 + $0xa4] sm:$0xf]  ;;  %v470_v8 = vcombine.low %v89_v53, %v90_v58  ;;  %v486_v9 = vcombine.low %v121_v59, %v122_v60  ;;  %v136_v10 = vmax.bf16 %v549_v3, %v72_v61  ;;  %v69_v12 = vld [vmem:[%s851_s1 + $0xd8] sm:$0xf]  ;;  %v70_v13 = vld [vmem:[%s851_s1 + $0xdc] sm:$0xf]  ;;  %v87_v15 = vmax.bf16 %v549_v3, %v23_v62 }
   0xd   :  { %522 = vmatpush3.bf16.msra.mxu1 %v487_v50  ;;  %501 = vmatprep.subr.bf16.mxu0 %v478_v57  ;;  %v477_v14 = vcombine.low %v103_v1, %v104_v2  ;;  %v88_v16 = vmax.bf16 %v549_v3, %v24_v63  ;;  %v119_v17 = vmax.bf16 %v549_v3, %v55_v5  ;;  %v21_v18 = vld [vmem:[%s851_s1 + $0x18] sm:$0xf]  ;;  %v22_v19 = vld [vmem:[%s851_s1 + $0x1c] sm:$0xf]  ;;  %v35_v26 = vld [vmem:[%s851_s1 + $0x50] sm:$0xf] }
   0xe   :  { %523 = vmatprep.subr.bf16.mxu1 %v494_v0  ;;  %v493_v20 = vcombine.low %v135_v4, %v136_v10  ;;  %v120_v21 = vmax.bf16 %v549_v3, %v56_v6  ;;  %v101_v22 = vmax.bf16 %v549_v3, %v37_v7  ;;  %v102_v23 = vmax.bf16 %v549_v3, %v38_v11  ;;  %v53_v24 = vld [vmem:[%s851_s1 + $0x98] sm:$0xf]  ;;  %v54_v25 = vld [vmem:[%s851_s1 + $0x9c] sm:$0xf]  ;;  %v36_v31 = vld [vmem:[%s851_s1 + $0x54] sm:$0xf] }
   0xf   :  { %v469_v27 = vcombine.low %v87_v15, %v88_v16  ;;  %v133_v28 = vmax.bf16 %v549_v3, %v69_v12  ;;  %v134_v29 = vmax.bf16 %v549_v3, %v70_v13  ;;  %v85_v30 = vmax.bf16 %v549_v3, %v21_v18  ;;  %v67_v32 = vld [vmem:[%s851_s1 + $0xd0] sm:$0xf]  ;;  %v68_v33 = vld [vmem:[%s851_s1 + $0xd4] sm:$0xf]  ;;  %v33_v48 = vld [vmem:[%s851_s1 + $0x48] sm:$0xf] }
  0x10   :  { %502 = vmatpush3.bf16.msra.mxu0 %v470_v8  ;;  %v485_v34 = vcombine.low %v119_v17, %v120_v21  ;;  %v476_v35 = vcombine.low %v101_v22, %v102_v23  ;;  %v86_v36 = vmax.bf16 %v549_v3, %v22_v19  ;;  %v19_v37 = vld [vmem:[%s851_s1 + $0x10] sm:$0xf]  ;;  %v20_v38 = vld [vmem:[%s851_s1 + $0x14] sm:$0xf]  ;;  %v117_v41 = vmax.bf16 %v549_v3, %v53_v24  ;;  %v34_v49 = vld [vmem:[%s851_s1 + $0x4c] sm:$0xf] }
  0x11   :  { %524 = vmatpush3.bf16.msra.mxu1 %v486_v9  ;;  %503 = vmatprep.subr.bf16.mxu0 %v477_v14  ;;  %v51_v39 = vld [vmem:[%s851_s1 + $0x90] sm:$0xf]  ;;  %v492_v40 = vcombine.low %v133_v28, %v134_v29  ;;  %v118_v42 = vmax.bf16 %v549_v3, %v54_v25  ;;  %v99_v43 = vmax.bf16 %v549_v3, %v35_v26  ;;  %v52_v44 = vld [vmem:[%s851_s1 + $0x94] sm:$0xf]  ;;  %v65_v50 = vld [vmem:[%s851_s1 + $0xc8] sm:$0xf] }
  0x12   :  { %525 = vmatprep.subr.bf16.mxu1 %v493_v20  ;;  %v100_v45 = vmax.bf16 %v549_v3, %v36_v31  ;;  %v131_v46 = vmax.bf16 %v549_v3, %v67_v32  ;;  %v132_v47 = vmax.bf16 %v549_v3, %v68_v33  ;;  %v468_v51 = vcombine.low %v85_v30, %v86_v36  ;;  %v66_v55 = vld [vmem:[%s851_s1 + $0xcc] sm:$0xf]  ;;  %v17_v56 = vld [vmem:[%s851_s1 + $0x8] sm:$0xf]  ;;  %v31_v4 = vld [vmem:[%s851_s1 + $0x40] sm:$0xf] }
  0x13   :  { %v83_v52 = vmax.bf16 %v549_v3, %v19_v37  ;;  %v84_v53 = vmax.bf16 %v549_v3, %v20_v38  ;;  %v115_v54 = vmax.bf16 %v549_v3, %v51_v39  ;;  %v18_v57 = vld [vmem:[%s851_s1 + $0xc] sm:$0xf]  ;;  %v484_v58 = vcombine.low %v117_v41, %v118_v42  ;;  %v49_v61 = vld [vmem:[%s851_s1 + $0x88] sm:$0xf]  ;;  %v32_v5 = vld [vmem:[%s851_s1 + $0x44] sm:$0xf] }
  0x14   :  { %504 = vmatpush3.bf16.msra.mxu0 %v469_v27  ;;  %v475_v59 = vcombine.low %v99_v43, %v100_v45  ;;  %v116_v60 = vmax.bf16 %v549_v3, %v52_v44  ;;  %v50_v62 = vld [vmem:[%s851_s1 + $0x8c] sm:$0xf]  ;;  %v491_v63 = vcombine.low %v131_v46, %v132_v47  ;;  %v97_v0 = vmax.bf16 %v549_v3, %v33_v48  ;;  %v63_v6 = vld [vmem:[%s851_s1 + $0xc0] sm:$0xf]  ;;  %v64_v10 = vld [vmem:[%s851_s1 + $0xc4] sm:$0xf] }
  0x15   :  { %526 = vmatpush3.bf16.msra.mxu1 %v485_v34  ;;  %505 = vmatprep.subr.bf16.mxu0 %v476_v35  ;;  %v98_v1 = vmax.bf16 %v549_v3, %v34_v49  ;;  %v129_v2 = vmax.bf16 %v549_v3, %v65_v50  ;;  %v130_v7 = vmax.bf16 %v549_v3, %v66_v55  ;;  %v15_v15 = vld [vmem:[%s851_s1] sm:$0xf]  ;;  %v545_v16 = vld [vmem:[%s852_s0 + $0x4] ss:$16 sps:$4 sm:$0xff]   ;;  %v548_v21 = vld [vmem:[%s852_s0 + $0xc] ss:$16 sps:$4 sm:$0xff]  }
  0x16   :  { %527 = vmatprep.subr.bf16.mxu1 %v492_v40  ;;  %v81_v8 = vmax.bf16 %v549_v3, %v17_v56  ;;  %v82_v9 = vmax.bf16 %v549_v3, %v18_v57  ;;  %v467_v11 = vcombine.low %v83_v52, %v84_v53  ;;  %v483_v12 = vcombine.low %v115_v54, %v116_v60  ;;  %v16_v20 = vld [vmem:[%s851_s1 + $0x4] sm:$0xf]  ;;  %v47_v25 = vld [vmem:[%s851_s1 + $0x80] sm:$0xf]  ;;  %v148_v36 = vld [vmem:[%s853_s2 + $0x8] sm:$0xff] }
  0x17   :  { %v113_v13 = vmax.bf16 %v549_v3, %v49_v61  ;;  %v114_v14 = vmax.bf16 %v549_v3, %v50_v62  ;;  %v474_v17 = vcombine.low %v97_v0, %v98_v1  ;;  %v95_v18 = vmax.bf16 %v549_v3, %v31_v4  ;;  %v48_v26 = vld [vmem:[%s851_s1 + $0x84] sm:$0xf]  ;;  %403 = vmatprep.mubr.bf16.mxu0 %v545_v16  ;;  %v543_v39 = vld [vmem:[%s852_s0] ss:$16 sps:$4 sm:$0xff]  }
  0x18   :  { %506 = vmatpush3.bf16.msra.mxu0 %v468_v51  ;;  %v96_v19 = vmax.bf16 %v549_v3, %v32_v5  ;;  %v490_v22 = vcombine.low %v129_v2, %v130_v7  ;;  %v127_v23 = vmax.bf16 %v549_v3, %v63_v6  ;;  %v128_v24 = vmax.bf16 %v549_v3, %v64_v10  ;;  %v147_v28 = vld [vmem:[%s853_s2] sm:$0xff] }
  0x19   :  { %528 = vmatpush3.bf16.msra.mxu1 %v484_v58  ;;  %507 = vmatprep.subr.bf16.mxu0 %v475_v59  ;;  %v466_v27 = vcombine.low %v81_v8, %v82_v9  ;;  %v482_v29 = vcombine.low %v113_v13, %v114_v14  ;;  %v79_v30 = vmax.bf16 %v549_v3, %v15_v15 }
  0x1a   :  { %529 = vmatprep.subr.bf16.mxu1 %v491_v63  ;;  %v80_v31 = vmax.bf16 %v549_v3, %v16_v20  ;;  %444 = vmatprep.mubr.bf16.mxu1 %v548_v21  ;;  %v473_v32 = vcombine.low %v95_v18, %v96_v19  ;;  %v111_v33 = vmax.bf16 %v549_v3, %v47_v25 }
  0x1b   :  { %v112_v34 = vmax.bf16 %v549_v3, %v48_v26  ;;  %v489_v35 = vcombine.low %v127_v23, %v128_v24  ;;  %151 = vperm.xlu0 %542, %v147_v28   ;;  %v546_v3 = vld [vmem:[%s852_s0 + $0x8] ss:$16 sps:$4 sm:$0xff]  }
  0x1c   :  { %508 = vmatpush3.bf16.msra.mxu0 %v467_v11  ;;  %v465_v37 = vcombine.low %v79_v30, %v80_v31 }
  0x1d   :  { %530 = vmatpush3.bf16.msra.mxu1 %v483_v12  ;;  %509 = vmatprep.subr.bf16.mxu0 %v474_v17  ;;  %v481_v38 = vcombine.low %v111_v33, %v112_v34 }
  0x1e   :  { %531 = vmatprep.subr.bf16.mxu1 %v490_v22 }
  0x1f   :  { %156 = vperm.xlu0 %542, %v148_v36  }
  0x20   :  { %510 = vmatpush3.bf16.msra.mxu0 %v466_v27 }
  0x21   :  { %532 = vmatpush3.bf16.msra.mxu1 %v482_v29  ;;  %511 = vmatprep.subr.bf16.mxu0 %v473_v32 }
  0x22   :  { %533 = vmatprep.subr.bf16.mxu1 %v489_v35 }
  0x24   :  { %512 = vmatpush3.bf16.msra.mxu0 %v465_v37 }
  0x25   :  { %534 = vmatpush3.bf16.msra.mxu1 %v481_v38 }
  0x27   :  { %404 = vmatmul.mubr.bf16.vlgmr.msra.gmra.mxu0 %v543_v39 }
  0x28   :  { %445 = vmatmul.mubr.bf16.vlgmr.msra.gmra.mxu1 %v546_v3 }
  0x96   :  { %v152_v42 = vpop.permute.xlu0 %151 }
  0x9a   :  { %v157_v54 = vpop.permute.xlu0 %156 }
  0xe7   :  { %v513_v40 = vpop.f32.mrf.mxu0 }
  0xe8   :  { %v535_v41 = vpop.f32.mrf.mxu1 }
  0xe9   :  { %v514_v43 = vpop.f32.mrf.mxu0 }
  0xea   :  { %v515_v44 = vadd.f32 %v514_v43, %v513_v40  ;;  %v536_v45 = vpop.f32.mrf.mxu1 }
  0xeb   :  { %v516_v46 = vpop.f32.mrf.mxu0  ;;  %v537_v48 = vadd.f32 %v536_v45, %v535_v41 }
  0xec   :  { %v406_v47 = vadd.f32 %v515_v44, %v152_v42  ;;  %v538_v49 = vpop.f32.mrf.mxu1 }
  0xed   :  { %v517_v50 = vpop.f32.mrf.mxu0 }
  0xee   :  { %v447_v51 = vadd.f32 %v537_v48, %v406_v47  ;;  %v518_v52 = vadd.f32 %v517_v50, %v516_v46  ;;  %v539_v53 = vpop.f32.mrf.mxu1 }
  0xef   :  { %v540_v57 = vadd.f32 %v539_v53, %v538_v49 }
  0xf0   :  { %v453_v55 = vmax.f32 %v447_v51, 0.0  ;;  %v409_v56 = vadd.f32 %v518_v52, %v157_v54 }
  0xf2   :  { %455 = vst [vmem:[%s854_s3] sm:$0xff] %v453_v55  ;;  %v450_v58 = vadd.f32 %v540_v57, %v409_v56 }
  0xf4   :  { %v454_v59 = vmax.f32 %v450_v58, 0.0 }
  0xf6   :  { %456 = vst [vmem:[%s854_s3 + $0x8] sm:$0xff] %v454_v59 }

// kernel: vqvae_forward.21
= control target key start
LH: loop header
LB: loop body
LE: loop exit
PB: predicated region body
PF: predicated region fallthrough
CT: control target
= control target key end

     0   :  { %v675_v1 = vmov 0   ;;  %s900_s1 = inlined_call_operand.vmem [shape: bf16[256,512], index: 1, kind: input, shape index: {}]   ;;  %s901_s2 = inlined_call_operand.vmem [shape: f32[3,1], index: 2, kind: input, shape index: {}]   ;;  %s902_s0 = inlined_call_operand.vmem [shape: bf16[3,256], index: 0, kind: input, shape index: {}]   ;;  %s903_s3 = inlined_call_operand.vmem [shape: f32[3,512], index: 3, kind: output, shape index: {}]  }
   0x1   :  { %v579_v0 = vld [vmem:[%s900_s1 + $0xe4] ss:$16 sps:$4 sm:$0xff]   ;;  %578 = vset.pattern.permute.xlu0 %v675_v1  ;;  %v581_v2 = vld [vmem:[%s900_s1 + $0xec] ss:$16 sps:$4 sm:$0xff]   ;;  %v583_v3 = vld [vmem:[%s900_s1 + $0xe0] ss:$16 sps:$4 sm:$0xff]  }
   0x2   :  { %416 = vmatprep.subr.bf16.mxu0 %v579_v0  ;;  %v584_v4 = vld [vmem:[%s900_s1 + $0xe8] ss:$16 sps:$4 sm:$0xff]   ;;  %457 = vmatprep.subr.bf16.mxu1 %v581_v2  ;;  %v585_v5 = vld [vmem:[%s900_s1 + $0xc4] ss:$16 sps:$4 sm:$0xff]   ;;  %v587_v6 = vld [vmem:[%s900_s1 + $0xcc] ss:$16 sps:$4 sm:$0xff]  }
   0x3   :  { %417 = vmatpush1.bf16.msra.mxu0 %v583_v3  ;;  %458 = vmatpush1.bf16.msra.mxu1 %v584_v4  ;;  %v589_v7 = vld [vmem:[%s900_s1 + $0xc0] ss:$16 sps:$4 sm:$0xff]   ;;  %v590_v8 = vld [vmem:[%s900_s1 + $0xc8] ss:$16 sps:$4 sm:$0xff]   ;;  %v591_v9 = vld [vmem:[%s900_s1 + $0xa4] ss:$16 sps:$4 sm:$0xff]  }
   0x4   :  { %418 = vmatprep.subr.bf16.mxu0 %v585_v5  ;;  %459 = vmatprep.subr.bf16.mxu1 %v587_v6  ;;  %v593_v10 = vld [vmem:[%s900_s1 + $0xac] ss:$16 sps:$4 sm:$0xff]   ;;  %v595_v11 = vld [vmem:[%s900_s1 + $0xa0] ss:$16 sps:$4 sm:$0xff]   ;;  %v596_v12 = vld [vmem:[%s900_s1 + $0xa8] ss:$16 sps:$4 sm:$0xff]  }
   0x5   :  { %v597_v13 = vld [vmem:[%s900_s1 + $0x84] ss:$16 sps:$4 sm:$0xff]   ;;  %v599_v14 = vld [vmem:[%s900_s1 + $0x8c] ss:$16 sps:$4 sm:$0xff]   ;;  %v601_v15 = vld [vmem:[%s900_s1 + $0x80] ss:$16 sps:$4 sm:$0xff]  }
   0x6   :  { %v602_v16 = vld [vmem:[%s900_s1 + $0x88] ss:$16 sps:$4 sm:$0xff]   ;;  %v603_v17 = vld [vmem:[%s900_s1 + $0x64] ss:$16 sps:$4 sm:$0xff]   ;;  %v605_v18 = vld [vmem:[%s900_s1 + $0x6c] ss:$16 sps:$4 sm:$0xff]  }
   0x7   :  { %419 = vmatpush1.bf16.msra.mxu0 %v589_v7  ;;  %460 = vmatpush1.bf16.msra.mxu1 %v590_v8  ;;  %v607_v19 = vld [vmem:[%s900_s1 + $0x60] ss:$16 sps:$4 sm:$0xff]   ;;  %v608_v20 = vld [vmem:[%s900_s1 + $0x68] ss:$16 sps:$4 sm:$0xff]   ;;  %v609_v21 = vld [vmem:[%s900_s1 + $0x44] ss:$16 sps:$4 sm:$0xff]  }
   0x8   :  { %420 = vmatprep.subr.bf16.mxu0 %v591_v9  ;;  %461 = vmatprep.subr.bf16.mxu1 %v593_v10  ;;  %v611_v22 = vld [vmem:[%s900_s1 + $0x4c] ss:$16 sps:$4 sm:$0xff]   ;;  %v613_v23 = vld [vmem:[%s900_s1 + $0x40] ss:$16 sps:$4 sm:$0xff]   ;;  %v614_v24 = vld [vmem:[%s900_s1 + $0x48] ss:$16 sps:$4 sm:$0xff]  }
   0x9   :  { %v615_v25 = vld [vmem:[%s900_s1 + $0x24] ss:$16 sps:$4 sm:$0xff]   ;;  %v617_v26 = vld [vmem:[%s900_s1 + $0x2c] ss:$16 sps:$4 sm:$0xff]   ;;  %v619_v27 = vld [vmem:[%s900_s1 + $0x20] ss:$16 sps:$4 sm:$0xff]  }
   0xa   :  { %v620_v28 = vld [vmem:[%s900_s1 + $0x28] ss:$16 sps:$4 sm:$0xff]   ;;  %v621_v29 = vld [vmem:[%s900_s1 + $0x4] ss:$16 sps:$4 sm:$0xff]   ;;  %v623_v30 = vld [vmem:[%s900_s1 + $0xc] ss:$16 sps:$4 sm:$0xff]  }
   0xb   :  { %421 = vmatpush1.bf16.msra.mxu0 %v595_v11  ;;  %462 = vmatpush1.bf16.msra.mxu1 %v596_v12  ;;  %v625_v31 = vld [vmem:[%s900_s1] ss:$16 sps:$4 sm:$0xff]   ;;  %v626_v32 = vld [vmem:[%s900_s1 + $0x8] ss:$16 sps:$4 sm:$0xff]   ;;  %v627_v33 = vld [vmem:[%s900_s1 + $0x1e4] ss:$16 sps:$4 sm:$0xff]  }
   0xc   :  { %422 = vmatprep.subr.bf16.mxu0 %v597_v13  ;;  %463 = vmatprep.subr.bf16.mxu1 %v599_v14  ;;  %v629_v34 = vld [vmem:[%s900_s1 + $0x1ec] ss:$16 sps:$4 sm:$0xff]   ;;  %v631_v35 = vld [vmem:[%s900_s1 + $0x1e0] ss:$16 sps:$4 sm:$0xff]   ;;  %v632_v36 = vld [vmem:[%s900_s1 + $0x1e8] ss:$16 sps:$4 sm:$0xff]  }
   0xd   :  { %v633_v37 = vld [vmem:[%s900_s1 + $0x1c4] ss:$16 sps:$4 sm:$0xff]   ;;  %v635_v38 = vld [vmem:[%s900_s1 + $0x1cc] ss:$16 sps:$4 sm:$0xff]   ;;  %v637_v39 = vld [vmem:[%s900_s1 + $0x1c0] ss:$16 sps:$4 sm:$0xff]  }
   0xe   :  { %v638_v40 = vld [vmem:[%s900_s1 + $0x1c8] ss:$16 sps:$4 sm:$0xff]   ;;  %v639_v41 = vld [vmem:[%s900_s1 + $0x1a4] ss:$16 sps:$4 sm:$0xff]   ;;  %v641_v42 = vld [vmem:[%s900_s1 + $0x1ac] ss:$16 sps:$4 sm:$0xff]  }
   0xf   :  { %423 = vmatpush1.bf16.msra.mxu0 %v601_v15  ;;  %464 = vmatpush1.bf16.msra.mxu1 %v602_v16  ;;  %v643_v43 = vld [vmem:[%s900_s1 + $0x1a0] ss:$16 sps:$4 sm:$0xff]   ;;  %v644_v44 = vld [vmem:[%s900_s1 + $0x1a8] ss:$16 sps:$4 sm:$0xff]   ;;  %v645_v45 = vld [vmem:[%s900_s1 + $0x184] ss:$16 sps:$4 sm:$0xff]  }
  0x10   :  { %424 = vmatprep.subr.bf16.mxu0 %v603_v17  ;;  %465 = vmatprep.subr.bf16.mxu1 %v605_v18  ;;  %v647_v46 = vld [vmem:[%s900_s1 + $0x18c] ss:$16 sps:$4 sm:$0xff]   ;;  %v79_v47 = vld [vmem:[%s901_s2] sm:$0x7]  ;;  %v650_v50 = vld [vmem:[%s900_s1 + $0x188] ss:$16 sps:$4 sm:$0xff]  }
  0x11   :  { %v512_v48 = vld.sshfl [vmem:[%s902_s0] sm:$0x33 pattern:$0x76325410]  ;;  %82 = vperm.xlu0 %578, %v79_v47   ;;  %v651_v52 = vld [vmem:[%s900_s1 + $0x164] ss:$16 sps:$4 sm:$0xff]  }
  0x12   :  { %v649_v49 = vld [vmem:[%s900_s1 + $0x180] ss:$16 sps:$4 sm:$0xff]   ;;  %v93_v51 = vcombine.high %v512_v48, %v512_v48  ;;  %v653_v53 = vld [vmem:[%s900_s1 + $0x16c] ss:$16 sps:$4 sm:$0xff]   ;;  %v656_v55 = vld [vmem:[%s900_s1 + $0x168] ss:$16 sps:$4 sm:$0xff]  }
  0x13   :  { %425 = vmatpush1.bf16.msra.mxu0 %v607_v19  ;;  %466 = vmatpush1.bf16.msra.mxu1 %v608_v20  ;;  %v655_v54 = vld [vmem:[%s900_s1 + $0x160] ss:$16 sps:$4 sm:$0xff]   ;;  %v657_v56 = vld [vmem:[%s900_s1 + $0x144] ss:$16 sps:$4 sm:$0xff]   ;;  %v659_v57 = vld [vmem:[%s900_s1 + $0x14c] ss:$16 sps:$4 sm:$0xff]  }
  0x14   :  { %426 = vmatprep.subr.bf16.mxu0 %v609_v21  ;;  %467 = vmatprep.subr.bf16.mxu1 %v611_v22  ;;  %v661_v58 = vld [vmem:[%s900_s1 + $0x140] ss:$16 sps:$4 sm:$0xff]   ;;  %v662_v59 = vld [vmem:[%s900_s1 + $0x148] ss:$16 sps:$4 sm:$0xff]   ;;  %v663_v60 = vld [vmem:[%s900_s1 + $0x124] ss:$16 sps:$4 sm:$0xff]  }
  0x15   :  { %448 = vmatprep.mubr.bf16.mxu0 %v93_v51  ;;  %489 = vmatprep.mubr.bf16.mxu1 %v93_v51  ;;  %v665_v61 = vld [vmem:[%s900_s1 + $0x12c] ss:$16 sps:$4 sm:$0xff]   ;;  %v667_v62 = vld [vmem:[%s900_s1 + $0x120] ss:$16 sps:$4 sm:$0xff]   ;;  %v668_v63 = vld [vmem:[%s900_s1 + $0x128] ss:$16 sps:$4 sm:$0xff]  }
  0x16   :  { %v669_v0 = vld [vmem:[%s900_s1 + $0x104] ss:$16 sps:$4 sm:$0xff]   ;;  %v671_v1 = vld [vmem:[%s900_s1 + $0x10c] ss:$16 sps:$4 sm:$0xff]   ;;  %v673_v2 = vld [vmem:[%s900_s1 + $0x100] ss:$16 sps:$4 sm:$0xff]  }
  0x17   :  { %427 = vmatpush1.bf16.msra.mxu0 %v613_v23  ;;  %468 = vmatpush1.bf16.msra.mxu1 %v614_v24  ;;  %v674_v3 = vld [vmem:[%s900_s1 + $0x108] ss:$16 sps:$4 sm:$0xff]  }
  0x18   :  { %428 = vmatprep.subr.bf16.mxu0 %v615_v25  ;;  %469 = vmatprep.subr.bf16.mxu1 %v617_v26 }
  0x1b   :  { %429 = vmatpush1.bf16.msra.mxu0 %v619_v27  ;;  %470 = vmatpush1.bf16.msra.mxu1 %v620_v28 }
  0x1c   :  { %430 = vmatprep.subr.bf16.mxu0 %v621_v29  ;;  %471 = vmatprep.subr.bf16.mxu1 %v623_v30 }
  0x1f   :  { %431 = vmatpush1.bf16.msra.mxu0 %v625_v31  ;;  %472 = vmatpush1.bf16.msra.mxu1 %v626_v32 }
  0x20   :  { %432 = vmatprep.subr.bf16.mxu0 %v627_v33  ;;  %473 = vmatprep.subr.bf16.mxu1 %v629_v34 }
  0x23   :  { %433 = vmatpush2.bf16.msra.mxu0 %v631_v35  ;;  %474 = vmatpush2.bf16.msra.mxu1 %v632_v36 }
  0x24   :  { %434 = vmatprep.subr.bf16.mxu0 %v633_v37  ;;  %475 = vmatprep.subr.bf16.mxu1 %v635_v38 }
  0x27   :  { %435 = vmatpush2.bf16.msra.mxu0 %v637_v39  ;;  %476 = vmatpush2.bf16.msra.mxu1 %v638_v40 }
  0x28   :  { %436 = vmatprep.subr.bf16.mxu0 %v639_v41  ;;  %477 = vmatprep.subr.bf16.mxu1 %v641_v42 }
  0x2b   :  { %437 = vmatpush2.bf16.msra.mxu0 %v643_v43  ;;  %478 = vmatpush2.bf16.msra.mxu1 %v644_v44 }
  0x2c   :  { %438 = vmatprep.subr.bf16.mxu0 %v645_v45  ;;  %479 = vmatprep.subr.bf16.mxu1 %v647_v46 }
  0x2f   :  { %439 = vmatpush2.bf16.msra.mxu0 %v649_v49  ;;  %480 = vmatpush2.bf16.msra.mxu1 %v650_v50 }
  0x30   :  { %440 = vmatprep.subr.bf16.mxu0 %v651_v52  ;;  %481 = vmatprep.subr.bf16.mxu1 %v653_v53 }
  0x33   :  { %441 = vmatpush2.bf16.msra.mxu0 %v655_v54  ;;  %482 = vmatpush2.bf16.msra.mxu1 %v656_v55 }
  0x34   :  { %442 = vmatprep.subr.bf16.mxu0 %v657_v56  ;;  %483 = vmatprep.subr.bf16.mxu1 %v659_v57 }
  0x37   :  { %443 = vmatpush2.bf16.msra.mxu0 %v661_v58  ;;  %484 = vmatpush2.bf16.msra.mxu1 %v662_v59 }
  0x38   :  { %444 = vmatprep.subr.bf16.mxu0 %v663_v60  ;;  %485 = vmatprep.subr.bf16.mxu1 %v665_v61 }
  0x3b   :  { %445 = vmatpush2.bf16.msra.mxu0 %v667_v62  ;;  %486 = vmatpush2.bf16.msra.mxu1 %v668_v63 }
  0x3c   :  { %446 = vmatprep.subr.bf16.mxu0 %v669_v0  ;;  %487 = vmatprep.subr.bf16.mxu1 %v671_v1 }
  0x3f   :  { %447 = vmatpush2.bf16.msra.mxu0 %v673_v2  ;;  %488 = vmatpush2.bf16.msra.mxu1 %v674_v3 }
  0x42   :  { %449 = vmatmul.mubr.bf16.vlgmr.msra.gmra.mxu0 %v512_v48  ;;  %490 = vmatmul.mubr.bf16.vlgmr.msra.gmra.mxu1 %v512_v48 }
  0x8c   :  { %v83_v4 = vpop.permute.xlu0 %82 }
 0x102   :  { %v450_v5 = vpop.f32.mrf.mxu0  ;;  %v491_v6 = vpop.f32.mrf.mxu1 }
 0x103   :  { %v451_v9 = vadd.f32 %v450_v5, %v83_v4  ;;  %v492_v10 = vadd.f32 %v491_v6, %v83_v4 }
 0x104   :  { %v452_v7 = vpop.f32.mrf.mxu0  ;;  %v493_v8 = vpop.f32.mrf.mxu1 }
 0x105   :  { %v453_v11 = vadd.f32 %v452_v7, %v83_v4  ;;  %v494_v12 = vadd.f32 %v493_v8, %v83_v4 }
 0x106   :  { %v454_v13 = vpop.f32.mrf.mxu0  ;;  %v495_v14 = vpop.f32.mrf.mxu1 }
 0x107   :  { %v502_v15 = vcombine.low %v451_v9, %v453_v11  ;;  %v503_v16 = vcombine.low %v492_v10, %v494_v12 }
 0x108   :  { %v455_v17 = vpop.f32.mrf.mxu0  ;;  %v496_v18 = vpop.f32.mrf.mxu1 }
 0x109   :  { %506 = vst [vmem:[%s903_s3] sm:$0x77] %v502_v15  ;;  %507 = vst [vmem:[%s903_s3 + $0x8] sm:$0x77] %v503_v16 }

</bundles_post_ra>
